<compile_context>
chip_gen: v6e
topology: v6e:2x2x1
jax: 0.10.0
libtpu: 0.0.40
codegen_flags: <defaults>
</compile_context>

<pallas_src>
import functools

import jax
import jax.numpy as jnp
from jax import lax
from jax.experimental import pallas as pl
from jax.experimental.pallas import tpu as pltpu

NEG_SLOPE = 0.01  # PyTorch LeakyReLU default negative_slope
P = 128           # lane-padded feature width


# ---------------------------------------------------------------------------
# Fused forward kernel
# ---------------------------------------------------------------------------
def _fused_gnn_kernel(x_ref, e_ref, u_ref,
                      row_ref, cole_ref, colt_ref, eb_ref, nb_ref, nbt_ref,
                      w_ref, b_ref,
                      eout_ref, vout_ref, *, plan):
    f32, bf16 = jnp.float32, jnp.bfloat16
    N = x_ref.shape[0]
    E = e_ref.shape[0]
    B = u_ref.shape[0]

    def dotw(a, wi):                       # bf16 MXU matmul, f32 accumulation
        return jnp.dot(a.astype(bf16), w_ref[wi], preferred_element_type=f32)

    def lin(a, wb):                        # Lin (no activation)
        wi, bi = wb
        return dotw(a, wi) + b_ref[bi]

    def lrelu(y):
        return jnp.where(y > 0, y, NEG_SLOPE * y)

    def sel(g, v):                         # exact row-select / segment-sum (f32 MXU)
        return jnp.dot(g, v, preferred_element_type=f32)

    # ---- gather / scatter operators built in-kernel from int32 indices ----
    n_cols_E = lax.broadcasted_iota(jnp.int32, (E, N), 1)
    G_row = (row_ref[...] == n_cols_E).astype(f32)           # [E,N]  x[row]
    G_col = (cole_ref[...] == n_cols_E).astype(f32)          # [E,N]  x[col]
    b_cols_E = lax.broadcasted_iota(jnp.int32, (E, B), 1)
    G_eb = (eb_ref[...] == b_cols_E).astype(f32)             # [E,B]  u[batch[row]]
    b_cols_N = lax.broadcasted_iota(jnp.int32, (N, B), 1)
    G_nb = (nb_ref[...] == b_cols_N).astype(f32)             # [N,B]  u[batch]
    n_rows_E = lax.broadcasted_iota(jnp.int32, (N, E), 0)
    S_col = (colt_ref[...] == n_rows_E).astype(f32)          # [N,E]  scatter over col
    cnt_col = jnp.maximum(jnp.sum(S_col, axis=1, keepdims=True), 1.0)
    b_rows_N = lax.broadcasted_iota(jnp.int32, (B, N), 0)
    S_nb = (nbt_ref[...] == b_rows_N).astype(f32)            # [B,N]  scatter over batch
    cnt_nb = jnp.maximum(jnp.sum(S_nb, axis=1, keepdims=True), 1.0)

    # ---- embeddings (Lin + LeakyReLU) ----
    x = lrelu(lin(x_ref[...], plan["node_emb"]))
    e = lrelu(lin(e_ref[...], plan["edge_emb"]))
    u = lrelu(lin(u_ref[...], plan["global_emb"]))

    # ---- message-passing blocks (unrolled, residuals in VMEM/vregs) ----
    for lp in plan["mp"]:
        # EdgeModel: mlp2(cat([x[row], x[col], edge_attr, u[batch[row]]]))
        he = lrelu(sel(G_row, dotw(x, lp["e1_src"]))         # project-then-gather
                   + sel(G_col, dotw(x, lp["e1_dst"]))
                   + dotw(e, lp["e1_e"])
                   + sel(G_eb, dotw(u, lp["e1_u"]))
                   + b_ref[lp["e1_b"]])
        e_new = lin(he, lp["e2"])

        # NodeModel: mlp1(cat([x[row], edge_new])) -> scatter_mean(col) ->
        #            mlp2(cat([x, agg, u[batch]]))
        h1 = lrelu(sel(G_row, dotw(x, lp["n1a_x"]))
                   + dotw(e_new, lp["n1a_e"]) + b_ref[lp["n1a_b"]])
        msg = lin(h1, lp["n1b"])
        agg = sel(S_col, msg) / cnt_col                      # scatter_mean over dst
        h2 = lrelu(dotw(x, lp["n2a_x"]) + dotw(agg, lp["n2a_agg"])
                   + sel(G_nb, dotw(u, lp["n2a_u"])) + b_ref[lp["n2a_b"]])
        x_new = lin(h2, lp["n2b"])

        # GlobalModel: mlp2(cat([u, scatter_mean(x_new, batch)]))
        node_mean = sel(S_nb, x_new) / cnt_nb
        hg = lrelu(dotw(u, lp["g1_u"]) + dotw(node_mean, lp["g1_nm"])
                   + b_ref[lp["g1_b"]])
        u_new = lin(hg, lp["g2"])

        # residual connections
        x = x + x_new
        e = e + e_new
        u = u + u_new

    # ---- decoders ----
    eout_ref[...] = lin(e, plan["edge_dec"])
    vh = lrelu(lin(u, plan["value1"]))
    vout_ref[...] = lin(vh, plan["value2"])


# ---------------------------------------------------------------------------
# Parameter init (deterministic, PyTorch-Linear-style uniform fan-in scaling)
# ---------------------------------------------------------------------------
def init_linear(key, fan_in, fan_out):
    kw, kb = jax.random.split(key)
    bound = 1.0 / (fan_in ** 0.5)
    return {
        "w": jax.random.uniform(kw, (fan_in, fan_out), jnp.float32, -bound, bound),
        "b": jax.random.uniform(kb, (fan_out,), jnp.float32, -bound, bound),
    }


def init_params(key, cfg):
    keys = iter(jax.random.split(key, 8 + 8 * cfg["n_passes"]))
    p = {
        "edge_emb": init_linear(next(keys), cfg["edge_feature_dim"], cfg["edge_embedding_dim"]),
        "node_emb": init_linear(next(keys), cfg["node_feature_dim"], cfg["node_embedding_dim"]),
        "global_emb": init_linear(next(keys), cfg["global_feature_dim"], cfg["global_embedding_dim"]),
    }
    mp = []
    for i in range(cfg["n_passes"]):
        e_in = cfg["edge_embedding_dim"] if i == 0 else cfg["edge_target_dim"]
        n_in = cfg["node_embedding_dim"] if i == 0 else cfg["node_target_dim"]
        g_in = cfg["global_embedding_dim"] if i == 0 else cfg["global_target_dim"]
        mp.append({
            "edge_mlp1": init_linear(next(keys), 2 * n_in + e_in + g_in, cfg["edge_hidden_dim"]),
            "edge_mlp2": init_linear(next(keys), cfg["edge_hidden_dim"], cfg["edge_target_dim"]),
            "node_mlp1a": init_linear(next(keys), n_in + cfg["edge_target_dim"], cfg["node_hidden_dim"]),
            "node_mlp1b": init_linear(next(keys), cfg["node_hidden_dim"], cfg["node_hidden_dim"]),
            "node_mlp2a": init_linear(next(keys), n_in + cfg["node_hidden_dim"] + g_in, cfg["node_hidden_dim"]),
            "node_mlp2b": init_linear(next(keys), cfg["node_hidden_dim"], cfg["node_target_dim"]),
            "global_mlp1": init_linear(next(keys), g_in + cfg["node_target_dim"], cfg["global_hidden_dim"]),
            "global_mlp2": init_linear(next(keys), cfg["global_hidden_dim"], cfg["global_target_dim"]),
        })
    p["mp"] = mp
    p["edge_dec"] = init_linear(next(keys), cfg["edge_target_dim"], cfg["edge_dim_out"])
    p["value1"] = init_linear(next(keys), cfg["global_target_dim"], cfg["value_embedding_dim"])
    p["value2"] = init_linear(next(keys), cfg["value_embedding_dim"], 1)
    return p


# ---------------------------------------------------------------------------
# Pack params: split concat-weights, zero-pad to [128,128], stack into one
# bf16 weight slab + one f32 bias slab.  Done ONCE; the static `plan` of
# slab indices is closed over by the kernel.
# ---------------------------------------------------------------------------
def pack_params(params, cfg):
    Ws, Bs = [], []

    def addw(w):
        pw = jnp.zeros((P, P), jnp.float32).at[: w.shape[0], : w.shape[1]].set(w)
        Ws.append(pw.astype(jnp.bfloat16))
        return len(Ws) - 1

    def addb(b):
        pb = jnp.zeros((1, P), jnp.float32).at[0, : b.shape[0]].set(b)
        Bs.append(pb)
        return len(Bs) - 1

    def add_lin(pp):
        return (addw(pp["w"]), addb(pp["b"]))

    plan = {
        "edge_emb": add_lin(params["edge_emb"]),
        "node_emb": add_lin(params["node_emb"]),
        "global_emb": add_lin(params["global_emb"]),
        "mp": [],
    }
    nh = cfg["node_hidden_dim"]
    for i, layer in enumerate(params["mp"]):
        n_in = cfg["node_embedding_dim"] if i == 0 else cfg["node_target_dim"]
        e_in = cfg["edge_embedding_dim"] if i == 0 else cfg["edge_target_dim"]
        g_in = cfg["global_embedding_dim"] if i == 0 else cfg["global_target_dim"]
        w_e1 = layer["edge_mlp1"]["w"]
        w_n1 = layer["node_mlp1a"]["w"]
        w_n2 = layer["node_mlp2a"]["w"]
        w_g1 = layer["global_mlp1"]["w"]
        plan["mp"].append(dict(
            # edge_mlp1 input order: [src, dst, edge_attr, u[batch[row]]]
            e1_src=addw(w_e1[:n_in]),
            e1_dst=addw(w_e1[n_in:2 * n_in]),
            e1_e=addw(w_e1[2 * n_in:2 * n_in + e_in]),
            e1_u=addw(w_e1[2 * n_in + e_in:]),
            e1_b=addb(layer["edge_mlp1"]["b"]),
            e2=add_lin(layer["edge_mlp2"]),
            # node_mlp1a input order: [x[row], edge_new]
            n1a_x=addw(w_n1[:n_in]),
            n1a_e=addw(w_n1[n_in:]),
            n1a_b=addb(layer["node_mlp1a"]["b"]),
            n1b=add_lin(layer["node_mlp1b"]),
            # node_mlp2a input order: [x, agg, u[batch]]
            n2a_x=addw(w_n2[:n_in]),
            n2a_agg=addw(w_n2[n_in:n_in + nh]),
            n2a_u=addw(w_n2[n_in + nh:]),
            n2a_b=addb(layer["node_mlp2a"]["b"]),
            n2b=add_lin(layer["node_mlp2b"]),
            # global_mlp1 input order: [u, node_mean]
            g1_u=addw(w_g1[:g_in]),
            g1_nm=addw(w_g1[g_in:]),
            g1_b=addb(layer["global_mlp1"]["b"]),
            g2=add_lin(layer["global_mlp2"]),
        ))
    plan["edge_dec"] = add_lin(params["edge_dec"])
    plan["value1"] = add_lin(params["value1"])
    plan["value2"] = add_lin(params["value2"])

    W = jnp.stack(Ws, axis=0)   # [NW, 128, 128] bf16
    B = jnp.stack(Bs, axis=0)   # [NB,   1, 128] f32
    return W, B, plan


# ---------------------------------------------------------------------------
# Forward wrapper: one fused pallas_call
# ---------------------------------------------------------------------------
def forward(W, Bst, plan, cfg, x, edge_index, edge_attr, u, batch):
    row = edge_index[0].astype(jnp.int32)
    col = edge_index[1].astype(jnp.int32)
    nb = batch.astype(jnp.int32)
    eb = nb[row]                                  # batch index per edge (tiny glue)
    E, N, B = row.shape[0], x.shape[0], u.shape[0]

    pad = lambda a: jnp.pad(a, ((0, 0), (0, P - a.shape[1])))
    xp, ep, up = pad(x), pad(edge_attr), pad(u)   # lane-pad features to 128

    kern = functools.partial(_fused_gnn_kernel, plan=plan)
    full2 = lambda s: pl.BlockSpec(s, lambda i: (0, 0))
    full3 = lambda s: pl.BlockSpec(s, lambda i: (0, 0, 0))

    eout, vout = pl.pallas_call(
        kern,
        out_shape=(jax.ShapeDtypeStruct((E, P), jnp.float32),
                   jax.ShapeDtypeStruct((B, P), jnp.float32)),
        grid=(1,),
        in_specs=[
            full2((N, P)), full2((E, P)), full2((B, P)),
            full2((E, 1)), full2((E, 1)), full2((1, E)),
            full2((E, 1)), full2((N, 1)), full2((1, N)),
            full3(W.shape), full3(Bst.shape),
        ],
        out_specs=(full2((E, P)), full2((B, P))),
        compiler_params=pltpu.CompilerParams(dimension_semantics=("arbitrary",)),
    )(xp, ep, up,
      row[:, None], col[:, None], col[None, :],
      eb[:, None], nb[:, None], nb[None, :],
      W, Bst)

    edge_out = eout[:, : cfg["edge_dim_out"]]     # slice lane-dense outputs at the end
    value_out = vout[:, :1]
    return edge_out, value_out


# ---------------------------------------------------------------------------
# Main
# ---------------------------------------------------------------------------
if __name__ == "__main__":
    cfg = dict(
        n_passes=2,
        use_value_critic=True,
        use_batch_norm=False,
        logit_normalizer=10.0,
        edge_feature_dim=6, edge_embedding_dim=32, edge_hidden_dim=32, edge_target_dim=32,
        node_feature_dim=5, node_embedding_dim=32, node_hidden_dim=32, node_target_dim=32,
        global_feature_dim=4, global_embedding_dim=32, global_hidden_dim=32, global_target_dim=32,
        edge_dim_out=1, value_embedding_dim=32,
    )

    key = jax.random.PRNGKey(0)
    k_par, k_x, k_e, k_u = jax.random.split(key, 4)
    params = init_params(k_par, cfg)
    W, Bst, plan = pack_params(params, cfg)

    # Two graphs of 4 nodes each, fully connected (directed, no self-loops):
    # 12 edges per graph, 24 edges total.
    def fc_edges(n, offset):
        return [(i + offset, j + offset) for i in range(n) for j in range(n) if i != j]

    edges = fc_edges(4, 0) + fc_edges(4, 4)
    edge_index = jnp.array(edges, dtype=jnp.int32).T          # [2, 24]
    batch = jnp.array([0] * 4 + [1] * 4, dtype=jnp.int32)     # [8]

    x = jax.random.normal(k_x, (8, cfg["node_feature_dim"]), dtype=jnp.float32)
    edge_attr = jax.random.normal(k_e, (24, cfg["edge_feature_dim"]), dtype=jnp.float32)
    u = jax.random.normal(k_u, (2, cfg["global_feature_dim"]), dtype=jnp.float32)

    fwd = jax.jit(functools.partial(forward, W, Bst, plan, cfg))
    edge_out, value_out = fwd(x, edge_index, edge_attr, u, batch)
    jax.block_until_ready((edge_out, value_out))

    assert edge_out.shape == (24, cfg["edge_dim_out"])
    assert value_out.shape == (2, 1)
    print("KERNEL_OK")
</pallas_src>

<mosaic_0001>
module attributes {stable_mosaic.version = 11 : i64} {
  func.func @_fused_gnn_kernel(%arg0: i32, %arg1: memref<8x128xf32, #tpu.memory_space<vmem>>, %arg2: memref<24x128xf32, #tpu.memory_space<vmem>>, %arg3: memref<2x128xf32, #tpu.memory_space<vmem>>, %arg4: memref<24x1xi32, #tpu.memory_space<vmem>>, %arg5: memref<24x1xi32, #tpu.memory_space<vmem>>, %arg6: memref<1x24xi32, #tpu.memory_space<vmem>>, %arg7: memref<24x1xi32, #tpu.memory_space<vmem>>, %arg8: memref<8x1xi32, #tpu.memory_space<vmem>>, %arg9: memref<1x8xi32, #tpu.memory_space<vmem>>, %arg10: memref<36x128x128xbf16, #tpu.memory_space<vmem>>, %arg11: memref<22x1x128xf32, #tpu.memory_space<vmem>>, %arg12: memref<24x128xf32, #tpu.memory_space<vmem>>, %arg13: memref<2x128xf32, #tpu.memory_space<vmem>>) attributes {dimension_semantics = [#tpu.dimension_semantics<arbitrary>], iteration_bounds = array<i64: 1>, scalar_prefetch = 0 : i64, scratch_operands = 0 : i64, tpu.core_type = #tpu.core_type<tc>, window_params = [{pipeline_mode = #tpu.pipeline_mode<synchronous>, transform_indices = @transform_0, window_bounds = array<i64: 8, 128>}, {pipeline_mode = #tpu.pipeline_mode<synchronous>, transform_indices = @transform_1, window_bounds = array<i64: 24, 128>}, {pipeline_mode = #tpu.pipeline_mode<synchronous>, transform_indices = @transform_2, window_bounds = array<i64: 2, 128>}, {pipeline_mode = #tpu.pipeline_mode<synchronous>, transform_indices = @transform_3, window_bounds = array<i64: 24, 1>}, {pipeline_mode = #tpu.pipeline_mode<synchronous>, transform_indices = @transform_4, window_bounds = array<i64: 24, 1>}, {pipeline_mode = #tpu.pipeline_mode<synchronous>, transform_indices = @transform_5, window_bounds = array<i64: 1, 24>}, {pipeline_mode = #tpu.pipeline_mode<synchronous>, transform_indices = @transform_6, window_bounds = array<i64: 24, 1>}, {pipeline_mode = #tpu.pipeline_mode<synchronous>, transform_indices = @transform_7, window_bounds = array<i64: 8, 1>}, {pipeline_mode = #tpu.pipeline_mode<synchronous>, transform_indices = @transform_8, window_bounds = array<i64: 1, 8>}, {pipeline_mode = #tpu.pipeline_mode<synchronous>, transform_indices = @transform_9, window_bounds = array<i64: 36, 128, 128>}, {pipeline_mode = #tpu.pipeline_mode<synchronous>, transform_indices = @transform_10, window_bounds = array<i64: 22, 1, 128>}, {pipeline_mode = #tpu.pipeline_mode<synchronous>, transform_indices = @transform_11, window_bounds = array<i64: 24, 128>}, {pipeline_mode = #tpu.pipeline_mode<synchronous>, transform_indices = @transform_12, window_bounds = array<i64: 2, 128>}]} {
    %0 = tpu.iota {dimensions = array<i32: 1>} : vector<24x8xi32>
    %c0 = arith.constant 0 : index
    %c0_0 = arith.constant 0 : index
    %1 = vector.load %arg4[%c0, %c0_0] : memref<24x1xi32, #tpu.memory_space<vmem>>, vector<24x1xi32>
    %2 = vector.broadcast %1 : vector<24x1xi32> to vector<24x8xi32>
    %3 = arith.cmpi eq, %2, %0 : vector<24x8xi32>
    %4 = arith.extui %3 : vector<24x8xi1> to vector<24x8xi32>
    %5 = arith.sitofp %4 : vector<24x8xi32> to vector<24x8xf32>
    %c0_1 = arith.constant 0 : index
    %c0_2 = arith.constant 0 : index
    %6 = vector.load %arg5[%c0_1, %c0_2] : memref<24x1xi32, #tpu.memory_space<vmem>>, vector<24x1xi32>
    %7 = vector.broadcast %6 : vector<24x1xi32> to vector<24x8xi32>
    %8 = arith.cmpi eq, %7, %0 : vector<24x8xi32>
    %9 = arith.extui %8 : vector<24x8xi1> to vector<24x8xi32>
    %10 = arith.sitofp %9 : vector<24x8xi32> to vector<24x8xf32>
    %11 = tpu.iota {dimensions = array<i32: 1>} : vector<24x2xi32>
    %c0_3 = arith.constant 0 : index
    %c0_4 = arith.constant 0 : index
    %12 = vector.load %arg7[%c0_3, %c0_4] : memref<24x1xi32, #tpu.memory_space<vmem>>, vector<24x1xi32>
    %13 = vector.broadcast %12 : vector<24x1xi32> to vector<24x2xi32>
    %14 = arith.cmpi eq, %13, %11 : vector<24x2xi32>
    %15 = arith.extui %14 : vector<24x2xi1> to vector<24x2xi32>
    %16 = arith.sitofp %15 : vector<24x2xi32> to vector<24x2xf32>
    %17 = tpu.iota {dimensions = array<i32: 1>} : vector<8x2xi32>
    %c0_5 = arith.constant 0 : index
    %c0_6 = arith.constant 0 : index
    %18 = vector.load %arg8[%c0_5, %c0_6] : memref<8x1xi32, #tpu.memory_space<vmem>>, vector<8x1xi32>
    %19 = vector.broadcast %18 : vector<8x1xi32> to vector<8x2xi32>
    %20 = arith.cmpi eq, %19, %17 : vector<8x2xi32>
    %21 = arith.extui %20 : vector<8x2xi1> to vector<8x2xi32>
    %22 = arith.sitofp %21 : vector<8x2xi32> to vector<8x2xf32>
    %23 = tpu.iota {dimensions = array<i32: 0>} : vector<8x24xi32>
    %c0_7 = arith.constant 0 : index
    %c0_8 = arith.constant 0 : index
    %24 = vector.load %arg6[%c0_7, %c0_8] : memref<1x24xi32, #tpu.memory_space<vmem>>, vector<1x24xi32>
    %25 = vector.broadcast %24 : vector<1x24xi32> to vector<8x24xi32>
    %26 = arith.cmpi eq, %25, %23 : vector<8x24xi32>
    %27 = arith.extui %26 : vector<8x24xi1> to vector<8x24xi32>
    %28 = arith.sitofp %27 : vector<8x24xi32> to vector<8x24xf32>
    %cst = arith.constant dense<0.000000e+00> : vector<8xf32>
    %29 = vector.multi_reduction <add>, %28, %cst [1] : vector<8x24xf32> to vector<8xf32>
    %30 = vector.shape_cast %29 : vector<8xf32> to vector<8x1xf32>
    %cst_9 = arith.constant 1.000000e+00 : f32
    %31 = vector.broadcast %cst_9 : f32 to vector<8x1xf32>
    %32 = arith.maximumf %30, %31 : vector<8x1xf32>
    %33 = tpu.iota {dimensions = array<i32: 0>} : vector<2x8xi32>
    %c0_10 = arith.constant 0 : index
    %c0_11 = arith.constant 0 : index
    %34 = vector.load %arg9[%c0_10, %c0_11] : memref<1x8xi32, #tpu.memory_space<vmem>>, vector<1x8xi32>
    %35 = vector.broadcast %34 : vector<1x8xi32> to vector<2x8xi32>
    %36 = arith.cmpi eq, %35, %33 : vector<2x8xi32>
    %37 = arith.extui %36 : vector<2x8xi1> to vector<2x8xi32>
    %38 = arith.sitofp %37 : vector<2x8xi32> to vector<2x8xf32>
    %cst_12 = arith.constant dense<0.000000e+00> : vector<2xf32>
    %39 = vector.multi_reduction <add>, %38, %cst_12 [1] : vector<2x8xf32> to vector<2xf32>
    %40 = vector.shape_cast %39 : vector<2xf32> to vector<2x1xf32>
    %cst_13 = arith.constant 1.000000e+00 : f32
    %41 = vector.broadcast %cst_13 : f32 to vector<2x1xf32>
    %42 = arith.maximumf %40, %41 : vector<2x1xf32>
    %c0_14 = arith.constant 0 : index
    %c0_15 = arith.constant 0 : index
    %43 = vector.load %arg1[%c0_14, %c0_15] : memref<8x128xf32, #tpu.memory_space<vmem>>, vector<8x128xf32>
    %44 = arith.truncf %43 : vector<8x128xf32> to vector<8x128xbf16>
    %c1 = arith.constant 1 : index
    %c0_16 = arith.constant 0 : index
    %c0_17 = arith.constant 0 : index
    %45 = vector.load %arg10[%c1, %c0_16, %c0_17] : memref<36x128x128xbf16, #tpu.memory_space<vmem>>, vector<1x128x128xbf16>
    %46 = vector.shape_cast %45 : vector<1x128x128xbf16> to vector<128x128xbf16>
    %cst_18 = arith.constant dense<0.000000e+00> : vector<8x128xf32>
    %47 = tpu.matmul %44, %46, %cst_18 {dimension_numbers = #tpu.dot_dimension_numbers<[1], [0], [0], [1], [0, 0, 1, 1], [], []>} : vector<8x128xbf16>, vector<128x128xbf16>, vector<8x128xf32> -> vector<8x128xf32>
    %c1_19 = arith.constant 1 : index
    %c0_20 = arith.constant 0 : index
    %c0_21 = arith.constant 0 : index
    %48 = vector.load %arg11[%c1_19, %c0_20, %c0_21] : memref<22x1x128xf32, #tpu.memory_space<vmem>>, vector<1x1x128xf32>
    %49 = vector.shape_cast %48 : vector<1x1x128xf32> to vector<1x128xf32>
    %50 = vector.broadcast %49 : vector<1x128xf32> to vector<8x128xf32>
    %51 = arith.addf %47, %50 : vector<8x128xf32>
    %cst_22 = arith.constant 0.000000e+00 : f32
    %52 = vector.broadcast %cst_22 : f32 to vector<8x128xf32>
    %53 = arith.cmpf ogt, %51, %52 : vector<8x128xf32>
    %cst_23 = arith.constant 0.00999999977 : f32
    %54 = vector.broadcast %cst_23 : f32 to vector<8x128xf32>
    %55 = arith.mulf %54, %51 : vector<8x128xf32>
    %56 = arith.select %53, %51, %55 : vector<8x128xi1>, vector<8x128xf32>
    %c0_24 = arith.constant 0 : index
    %c0_25 = arith.constant 0 : index
    %57 = vector.load %arg2[%c0_24, %c0_25] : memref<24x128xf32, #tpu.memory_space<vmem>>, vector<24x128xf32>
    %58 = arith.truncf %57 : vector<24x128xf32> to vector<24x128xbf16>
    %c0_26 = arith.constant 0 : index
    %c0_27 = arith.constant 0 : index
    %c0_28 = arith.constant 0 : index
    %59 = vector.load %arg10[%c0_26, %c0_27, %c0_28] : memref<36x128x128xbf16, #tpu.memory_space<vmem>>, vector<1x128x128xbf16>
    %60 = vector.shape_cast %59 : vector<1x128x128xbf16> to vector<128x128xbf16>
    %cst_29 = arith.constant dense<0.000000e+00> : vector<24x128xf32>
    %61 = tpu.matmul %58, %60, %cst_29 {dimension_numbers = #tpu.dot_dimension_numbers<[1], [0], [0], [1], [0, 0, 1, 1], [], []>} : vector<24x128xbf16>, vector<128x128xbf16>, vector<24x128xf32> -> vector<24x128xf32>
    %c0_30 = arith.constant 0 : index
    %c0_31 = arith.constant 0 : index
    %c0_32 = arith.constant 0 : index
    %62 = vector.load %arg11[%c0_30, %c0_31, %c0_32] : memref<22x1x128xf32, #tpu.memory_space<vmem>>, vector<1x1x128xf32>
    %63 = vector.shape_cast %62 : vector<1x1x128xf32> to vector<1x128xf32>
    %64 = vector.broadcast %63 : vector<1x128xf32> to vector<24x128xf32>
    %65 = arith.addf %61, %64 : vector<24x128xf32>
    %cst_33 = arith.constant 0.000000e+00 : f32
    %66 = vector.broadcast %cst_33 : f32 to vector<24x128xf32>
    %67 = arith.cmpf ogt, %65, %66 : vector<24x128xf32>
    %cst_34 = arith.constant 0.00999999977 : f32
    %68 = vector.broadcast %cst_34 : f32 to vector<24x128xf32>
    %69 = arith.mulf %68, %65 : vector<24x128xf32>
    %70 = arith.select %67, %65, %69 : vector<24x128xi1>, vector<24x128xf32>
    %c0_35 = arith.constant 0 : index
    %c0_36 = arith.constant 0 : index
    %71 = vector.load %arg3[%c0_35, %c0_36] : memref<2x128xf32, #tpu.memory_space<vmem>>, vector<2x128xf32>
    %72 = arith.truncf %71 : vector<2x128xf32> to vector<2x128xbf16>
    %c2 = arith.constant 2 : index
    %c0_37 = arith.constant 0 : index
    %c0_38 = arith.constant 0 : index
    %73 = vector.load %arg10[%c2, %c0_37, %c0_38] : memref<36x128x128xbf16, #tpu.memory_space<vmem>>, vector<1x128x128xbf16>
    %74 = vector.shape_cast %73 : vector<1x128x128xbf16> to vector<128x128xbf16>
    %cst_39 = arith.constant dense<0.000000e+00> : vector<2x128xf32>
    %75 = tpu.matmul %72, %74, %cst_39 {dimension_numbers = #tpu.dot_dimension_numbers<[1], [0], [0], [1], [0, 0, 1, 1], [], []>} : vector<2x128xbf16>, vector<128x128xbf16>, vector<2x128xf32> -> vector<2x128xf32>
    %c2_40 = arith.constant 2 : index
    %c0_41 = arith.constant 0 : index
    %c0_42 = arith.constant 0 : index
    %76 = vector.load %arg11[%c2_40, %c0_41, %c0_42] : memref<22x1x128xf32, #tpu.memory_space<vmem>>, vector<1x1x128xf32>
    %77 = vector.shape_cast %76 : vector<1x1x128xf32> to vector<1x128xf32>
    %78 = vector.broadcast %77 : vector<1x128xf32> to vector<2x128xf32>
    %79 = arith.addf %75, %78 : vector<2x128xf32>
    %cst_43 = arith.constant 0.000000e+00 : f32
    %80 = vector.broadcast %cst_43 : f32 to vector<2x128xf32>
    %81 = arith.cmpf ogt, %79, %80 : vector<2x128xf32>
    %cst_44 = arith.constant 0.00999999977 : f32
    %82 = vector.broadcast %cst_44 : f32 to vector<2x128xf32>
    %83 = arith.mulf %82, %79 : vector<2x128xf32>
    %84 = arith.select %81, %79, %83 : vector<2x128xi1>, vector<2x128xf32>
    %85 = arith.truncf %56 : vector<8x128xf32> to vector<8x128xbf16>
    %c3 = arith.constant 3 : index
    %c0_45 = arith.constant 0 : index
    %c0_46 = arith.constant 0 : index
    %86 = vector.load %arg10[%c3, %c0_45, %c0_46] : memref<36x128x128xbf16, #tpu.memory_space<vmem>>, vector<1x128x128xbf16>
    %87 = vector.shape_cast %86 : vector<1x128x128xbf16> to vector<128x128xbf16>
    %cst_47 = arith.constant dense<0.000000e+00> : vector<8x128xf32>
    %88 = tpu.matmul %85, %87, %cst_47 {dimension_numbers = #tpu.dot_dimension_numbers<[1], [0], [0], [1], [0, 0, 1, 1], [], []>} : vector<8x128xbf16>, vector<128x128xbf16>, vector<8x128xf32> -> vector<8x128xf32>
    %cst_48 = arith.constant dense<0.000000e+00> : vector<24x128xf32>
    %89 = tpu.matmul %5, %88, %cst_48 {dimension_numbers = #tpu.dot_dimension_numbers<[1], [0], [0], [1], [0, 0, 1, 1], [], []>} : vector<24x8xf32>, vector<8x128xf32>, vector<24x128xf32> -> vector<24x128xf32>
    %90 = arith.truncf %56 : vector<8x128xf32> to vector<8x128xbf16>
    %c4 = arith.constant 4 : index
    %c0_49 = arith.constant 0 : index
    %c0_50 = arith.constant 0 : index
    %91 = vector.load %arg10[%c4, %c0_49, %c0_50] : memref<36x128x128xbf16, #tpu.memory_space<vmem>>, vector<1x128x128xbf16>
    %92 = vector.shape_cast %91 : vector<1x128x128xbf16> to vector<128x128xbf16>
    %cst_51 = arith.constant dense<0.000000e+00> : vector<8x128xf32>
    %93 = tpu.matmul %90, %92, %cst_51 {dimension_numbers = #tpu.dot_dimension_numbers<[1], [0], [0], [1], [0, 0, 1, 1], [], []>} : vector<8x128xbf16>, vector<128x128xbf16>, vector<8x128xf32> -> vector<8x128xf32>
    %cst_52 = arith.constant dense<0.000000e+00> : vector<24x128xf32>
    %94 = tpu.matmul %10, %93, %cst_52 {dimension_numbers = #tpu.dot_dimension_numbers<[1], [0], [0], [1], [0, 0, 1, 1], [], []>} : vector<24x8xf32>, vector<8x128xf32>, vector<24x128xf32> -> vector<24x128xf32>
    %95 = arith.addf %89, %94 : vector<24x128xf32>
    %96 = arith.truncf %70 : vector<24x128xf32> to vector<24x128xbf16>
    %c5 = arith.constant 5 : index
    %c0_53 = arith.constant 0 : index
    %c0_54 = arith.constant 0 : index
    %97 = vector.load %arg10[%c5, %c0_53, %c0_54] : memref<36x128x128xbf16, #tpu.memory_space<vmem>>, vector<1x128x128xbf16>
    %98 = vector.shape_cast %97 : vector<1x128x128xbf16> to vector<128x128xbf16>
    %cst_55 = arith.constant dense<0.000000e+00> : vector<24x128xf32>
    %99 = tpu.matmul %96, %98, %cst_55 {dimension_numbers = #tpu.dot_dimension_numbers<[1], [0], [0], [1], [0, 0, 1, 1], [], []>} : vector<24x128xbf16>, vector<128x128xbf16>, vector<24x128xf32> -> vector<24x128xf32>
    %100 = arith.addf %95, %99 : vector<24x128xf32>
    %101 = arith.truncf %84 : vector<2x128xf32> to vector<2x128xbf16>
    %c6 = arith.constant 6 : index
    %c0_56 = arith.constant 0 : index
    %c0_57 = arith.constant 0 : index
    %102 = vector.load %arg10[%c6, %c0_56, %c0_57] : memref<36x128x128xbf16, #tpu.memory_space<vmem>>, vector<1x128x128xbf16>
    %103 = vector.shape_cast %102 : vector<1x128x128xbf16> to vector<128x128xbf16>
    %cst_58 = arith.constant dense<0.000000e+00> : vector<2x128xf32>
    %104 = tpu.matmul %101, %103, %cst_58 {dimension_numbers = #tpu.dot_dimension_numbers<[1], [0], [0], [1], [0, 0, 1, 1], [], []>} : vector<2x128xbf16>, vector<128x128xbf16>, vector<2x128xf32> -> vector<2x128xf32>
    %cst_59 = arith.constant dense<0.000000e+00> : vector<24x128xf32>
    %105 = tpu.matmul %16, %104, %cst_59 {dimension_numbers = #tpu.dot_dimension_numbers<[1], [0], [0], [1], [0, 0, 1, 1], [], []>} : vector<24x2xf32>, vector<2x128xf32>, vector<24x128xf32> -> vector<24x128xf32>
    %106 = arith.addf %100, %105 : vector<24x128xf32>
    %c3_60 = arith.constant 3 : index
    %c0_61 = arith.constant 0 : index
    %c0_62 = arith.constant 0 : index
    %107 = vector.load %arg11[%c3_60, %c0_61, %c0_62] : memref<22x1x128xf32, #tpu.memory_space<vmem>>, vector<1x1x128xf32>
    %108 = vector.shape_cast %107 : vector<1x1x128xf32> to vector<1x128xf32>
    %109 = vector.broadcast %108 : vector<1x128xf32> to vector<24x128xf32>
    %110 = arith.addf %106, %109 : vector<24x128xf32>
    %cst_63 = arith.constant 0.000000e+00 : f32
    %111 = vector.broadcast %cst_63 : f32 to vector<24x128xf32>
    %112 = arith.cmpf ogt, %110, %111 : vector<24x128xf32>
    %cst_64 = arith.constant 0.00999999977 : f32
    %113 = vector.broadcast %cst_64 : f32 to vector<24x128xf32>
    %114 = arith.mulf %113, %110 : vector<24x128xf32>
    %115 = arith.select %112, %110, %114 : vector<24x128xi1>, vector<24x128xf32>
    %116 = arith.truncf %115 : vector<24x128xf32> to vector<24x128xbf16>
    %c7 = arith.constant 7 : index
    %c0_65 = arith.constant 0 : index
    %c0_66 = arith.constant 0 : index
    %117 = vector.load %arg10[%c7, %c0_65, %c0_66] : memref<36x128x128xbf16, #tpu.memory_space<vmem>>, vector<1x128x128xbf16>
    %118 = vector.shape_cast %117 : vector<1x128x128xbf16> to vector<128x128xbf16>
    %cst_67 = arith.constant dense<0.000000e+00> : vector<24x128xf32>
    %119 = tpu.matmul %116, %118, %cst_67 {dimension_numbers = #tpu.dot_dimension_numbers<[1], [0], [0], [1], [0, 0, 1, 1], [], []>} : vector<24x128xbf16>, vector<128x128xbf16>, vector<24x128xf32> -> vector<24x128xf32>
    %c4_68 = arith.constant 4 : index
    %c0_69 = arith.constant 0 : index
    %c0_70 = arith.constant 0 : index
    %120 = vector.load %arg11[%c4_68, %c0_69, %c0_70] : memref<22x1x128xf32, #tpu.memory_space<vmem>>, vector<1x1x128xf32>
    %121 = vector.shape_cast %120 : vector<1x1x128xf32> to vector<1x128xf32>
    %122 = vector.broadcast %121 : vector<1x128xf32> to vector<24x128xf32>
    %123 = arith.addf %119, %122 : vector<24x128xf32>
    %124 = arith.truncf %56 : vector<8x128xf32> to vector<8x128xbf16>
    %c8 = arith.constant 8 : index
    %c0_71 = arith.constant 0 : index
    %c0_72 = arith.constant 0 : index
    %125 = vector.load %arg10[%c8, %c0_71, %c0_72] : memref<36x128x128xbf16, #tpu.memory_space<vmem>>, vector<1x128x128xbf16>
    %126 = vector.shape_cast %125 : vector<1x128x128xbf16> to vector<128x128xbf16>
    %cst_73 = arith.constant dense<0.000000e+00> : vector<8x128xf32>
    %127 = tpu.matmul %124, %126, %cst_73 {dimension_numbers = #tpu.dot_dimension_numbers<[1], [0], [0], [1], [0, 0, 1, 1], [], []>} : vector<8x128xbf16>, vector<128x128xbf16>, vector<8x128xf32> -> vector<8x128xf32>
    %cst_74 = arith.constant dense<0.000000e+00> : vector<24x128xf32>
    %128 = tpu.matmul %5, %127, %cst_74 {dimension_numbers = #tpu.dot_dimension_numbers<[1], [0], [0], [1], [0, 0, 1, 1], [], []>} : vector<24x8xf32>, vector<8x128xf32>, vector<24x128xf32> -> vector<24x128xf32>
    %129 = arith.truncf %123 : vector<24x128xf32> to vector<24x128xbf16>
    %c9 = arith.constant 9 : index
    %c0_75 = arith.constant 0 : index
    %c0_76 = arith.constant 0 : index
    %130 = vector.load %arg10[%c9, %c0_75, %c0_76] : memref<36x128x128xbf16, #tpu.memory_space<vmem>>, vector<1x128x128xbf16>
    %131 = vector.shape_cast %130 : vector<1x128x128xbf16> to vector<128x128xbf16>
    %cst_77 = arith.constant dense<0.000000e+00> : vector<24x128xf32>
    %132 = tpu.matmul %129, %131, %cst_77 {dimension_numbers = #tpu.dot_dimension_numbers<[1], [0], [0], [1], [0, 0, 1, 1], [], []>} : vector<24x128xbf16>, vector<128x128xbf16>, vector<24x128xf32> -> vector<24x128xf32>
    %133 = arith.addf %128, %132 : vector<24x128xf32>
    %c5_78 = arith.constant 5 : index
    %c0_79 = arith.constant 0 : index
    %c0_80 = arith.constant 0 : index
    %134 = vector.load %arg11[%c5_78, %c0_79, %c0_80] : memref<22x1x128xf32, #tpu.memory_space<vmem>>, vector<1x1x128xf32>
    %135 = vector.shape_cast %134 : vector<1x1x128xf32> to vector<1x128xf32>
    %136 = vector.broadcast %135 : vector<1x128xf32> to vector<24x128xf32>
    %137 = arith.addf %133, %136 : vector<24x128xf32>
    %cst_81 = arith.constant 0.000000e+00 : f32
    %138 = vector.broadcast %cst_81 : f32 to vector<24x128xf32>
    %139 = arith.cmpf ogt, %137, %138 : vector<24x128xf32>
    %cst_82 = arith.constant 0.00999999977 : f32
    %140 = vector.broadcast %cst_82 : f32 to vector<24x128xf32>
    %141 = arith.mulf %140, %137 : vector<24x128xf32>
    %142 = arith.select %139, %137, %141 : vector<24x128xi1>, vector<24x128xf32>
    %143 = arith.truncf %142 : vector<24x128xf32> to vector<24x128xbf16>
    %c10 = arith.constant 10 : index
    %c0_83 = arith.constant 0 : index
    %c0_84 = arith.constant 0 : index
    %144 = vector.load %arg10[%c10, %c0_83, %c0_84] : memref<36x128x128xbf16, #tpu.memory_space<vmem>>, vector<1x128x128xbf16>
    %145 = vector.shape_cast %144 : vector<1x128x128xbf16> to vector<128x128xbf16>
    %cst_85 = arith.constant dense<0.000000e+00> : vector<24x128xf32>
    %146 = tpu.matmul %143, %145, %cst_85 {dimension_numbers = #tpu.dot_dimension_numbers<[1], [0], [0], [1], [0, 0, 1, 1], [], []>} : vector<24x128xbf16>, vector<128x128xbf16>, vector<24x128xf32> -> vector<24x128xf32>
    %c6_86 = arith.constant 6 : index
    %c0_87 = arith.constant 0 : index
    %c0_88 = arith.constant 0 : index
    %147 = vector.load %arg11[%c6_86, %c0_87, %c0_88] : memref<22x1x128xf32, #tpu.memory_space<vmem>>, vector<1x1x128xf32>
    %148 = vector.shape_cast %147 : vector<1x1x128xf32> to vector<1x128xf32>
    %149 = vector.broadcast %148 : vector<1x128xf32> to vector<24x128xf32>
    %150 = arith.addf %146, %149 : vector<24x128xf32>
    %cst_89 = arith.constant dense<0.000000e+00> : vector<8x128xf32>
    %151 = tpu.matmul %28, %150, %cst_89 {dimension_numbers = #tpu.dot_dimension_numbers<[1], [0], [0], [1], [0, 0, 1, 1], [], []>} : vector<8x24xf32>, vector<24x128xf32>, vector<8x128xf32> -> vector<8x128xf32>
    %152 = vector.broadcast %32 : vector<8x1xf32> to vector<8x128xf32>
    %153 = arith.divf %151, %152 : vector<8x128xf32>
    %154 = arith.truncf %56 : vector<8x128xf32> to vector<8x128xbf16>
    %c11 = arith.constant 11 : index
    %c0_90 = arith.constant 0 : index
    %c0_91 = arith.constant 0 : index
    %155 = vector.load %arg10[%c11, %c0_90, %c0_91] : memref<36x128x128xbf16, #tpu.memory_space<vmem>>, vector<1x128x128xbf16>
    %156 = vector.shape_cast %155 : vector<1x128x128xbf16> to vector<128x128xbf16>
    %cst_92 = arith.constant dense<0.000000e+00> : vector<8x128xf32>
    %157 = tpu.matmul %154, %156, %cst_92 {dimension_numbers = #tpu.dot_dimension_numbers<[1], [0], [0], [1], [0, 0, 1, 1], [], []>} : vector<8x128xbf16>, vector<128x128xbf16>, vector<8x128xf32> -> vector<8x128xf32>
    %158 = arith.truncf %153 : vector<8x128xf32> to vector<8x128xbf16>
    %c12 = arith.constant 12 : index
    %c0_93 = arith.constant 0 : index
    %c0_94 = arith.constant 0 : index
    %159 = vector.load %arg10[%c12, %c0_93, %c0_94] : memref<36x128x128xbf16, #tpu.memory_space<vmem>>, vector<1x128x128xbf16>
    %160 = vector.shape_cast %159 : vector<1x128x128xbf16> to vector<128x128xbf16>
    %cst_95 = arith.constant dense<0.000000e+00> : vector<8x128xf32>
    %161 = tpu.matmul %158, %160, %cst_95 {dimension_numbers = #tpu.dot_dimension_numbers<[1], [0], [0], [1], [0, 0, 1, 1], [], []>} : vector<8x128xbf16>, vector<128x128xbf16>, vector<8x128xf32> -> vector<8x128xf32>
    %162 = arith.addf %157, %161 : vector<8x128xf32>
    %163 = arith.truncf %84 : vector<2x128xf32> to vector<2x128xbf16>
    %c13 = arith.constant 13 : index
    %c0_96 = arith.constant 0 : index
    %c0_97 = arith.constant 0 : index
    %164 = vector.load %arg10[%c13, %c0_96, %c0_97] : memref<36x128x128xbf16, #tpu.memory_space<vmem>>, vector<1x128x128xbf16>
    %165 = vector.shape_cast %164 : vector<1x128x128xbf16> to vector<128x128xbf16>
    %cst_98 = arith.constant dense<0.000000e+00> : vector<2x128xf32>
    %166 = tpu.matmul %163, %165, %cst_98 {dimension_numbers = #tpu.dot_dimension_numbers<[1], [0], [0], [1], [0, 0, 1, 1], [], []>} : vector<2x128xbf16>, vector<128x128xbf16>, vector<2x128xf32> -> vector<2x128xf32>
    %cst_99 = arith.constant dense<0.000000e+00> : vector<8x128xf32>
    %167 = tpu.matmul %22, %166, %cst_99 {dimension_numbers = #tpu.dot_dimension_numbers<[1], [0], [0], [1], [0, 0, 1, 1], [], []>} : vector<8x2xf32>, vector<2x128xf32>, vector<8x128xf32> -> vector<8x128xf32>
    %168 = arith.addf %162, %167 : vector<8x128xf32>
    %c7_100 = arith.constant 7 : index
    %c0_101 = arith.constant 0 : index
    %c0_102 = arith.constant 0 : index
    %169 = vector.load %arg11[%c7_100, %c0_101, %c0_102] : memref<22x1x128xf32, #tpu.memory_space<vmem>>, vector<1x1x128xf32>
    %170 = vector.shape_cast %169 : vector<1x1x128xf32> to vector<1x128xf32>
    %171 = vector.broadcast %170 : vector<1x128xf32> to vector<8x128xf32>
    %172 = arith.addf %168, %171 : vector<8x128xf32>
    %cst_103 = arith.constant 0.000000e+00 : f32
    %173 = vector.broadcast %cst_103 : f32 to vector<8x128xf32>
    %174 = arith.cmpf ogt, %172, %173 : vector<8x128xf32>
    %cst_104 = arith.constant 0.00999999977 : f32
    %175 = vector.broadcast %cst_104 : f32 to vector<8x128xf32>
    %176 = arith.mulf %175, %172 : vector<8x128xf32>
    %177 = arith.select %174, %172, %176 : vector<8x128xi1>, vector<8x128xf32>
    %178 = arith.truncf %177 : vector<8x128xf32> to vector<8x128xbf16>
    %c14 = arith.constant 14 : index
    %c0_105 = arith.constant 0 : index
    %c0_106 = arith.constant 0 : index
    %179 = vector.load %arg10[%c14, %c0_105, %c0_106] : memref<36x128x128xbf16, #tpu.memory_space<vmem>>, vector<1x128x128xbf16>
    %180 = vector.shape_cast %179 : vector<1x128x128xbf16> to vector<128x128xbf16>
    %cst_107 = arith.constant dense<0.000000e+00> : vector<8x128xf32>
    %181 = tpu.matmul %178, %180, %cst_107 {dimension_numbers = #tpu.dot_dimension_numbers<[1], [0], [0], [1], [0, 0, 1, 1], [], []>} : vector<8x128xbf16>, vector<128x128xbf16>, vector<8x128xf32> -> vector<8x128xf32>
    %c8_108 = arith.constant 8 : index
    %c0_109 = arith.constant 0 : index
    %c0_110 = arith.constant 0 : index
    %182 = vector.load %arg11[%c8_108, %c0_109, %c0_110] : memref<22x1x128xf32, #tpu.memory_space<vmem>>, vector<1x1x128xf32>
    %183 = vector.shape_cast %182 : vector<1x1x128xf32> to vector<1x128xf32>
    %184 = vector.broadcast %183 : vector<1x128xf32> to vector<8x128xf32>
    %185 = arith.addf %181, %184 : vector<8x128xf32>
    %cst_111 = arith.constant dense<0.000000e+00> : vector<2x128xf32>
    %186 = tpu.matmul %38, %185, %cst_111 {dimension_numbers = #tpu.dot_dimension_numbers<[1], [0], [0], [1], [0, 0, 1, 1], [], []>} : vector<2x8xf32>, vector<8x128xf32>, vector<2x128xf32> -> vector<2x128xf32>
    %187 = vector.broadcast %42 : vector<2x1xf32> to vector<2x128xf32>
    %188 = arith.divf %186, %187 : vector<2x128xf32>
    %189 = arith.truncf %84 : vector<2x128xf32> to vector<2x128xbf16>
    %c15 = arith.constant 15 : index
    %c0_112 = arith.constant 0 : index
    %c0_113 = arith.constant 0 : index
    %190 = vector.load %arg10[%c15, %c0_112, %c0_113] : memref<36x128x128xbf16, #tpu.memory_space<vmem>>, vector<1x128x128xbf16>
    %191 = vector.shape_cast %190 : vector<1x128x128xbf16> to vector<128x128xbf16>
    %cst_114 = arith.constant dense<0.000000e+00> : vector<2x128xf32>
    %192 = tpu.matmul %189, %191, %cst_114 {dimension_numbers = #tpu.dot_dimension_numbers<[1], [0], [0], [1], [0, 0, 1, 1], [], []>} : vector<2x128xbf16>, vector<128x128xbf16>, vector<2x128xf32> -> vector<2x128xf32>
    %193 = arith.truncf %188 : vector<2x128xf32> to vector<2x128xbf16>
    %c16 = arith.constant 16 : index
    %c0_115 = arith.constant 0 : index
    %c0_116 = arith.constant 0 : index
    %194 = vector.load %arg10[%c16, %c0_115, %c0_116] : memref<36x128x128xbf16, #tpu.memory_space<vmem>>, vector<1x128x128xbf16>
    %195 = vector.shape_cast %194 : vector<1x128x128xbf16> to vector<128x128xbf16>
    %cst_117 = arith.constant dense<0.000000e+00> : vector<2x128xf32>
    %196 = tpu.matmul %193, %195, %cst_117 {dimension_numbers = #tpu.dot_dimension_numbers<[1], [0], [0], [1], [0, 0, 1, 1], [], []>} : vector<2x128xbf16>, vector<128x128xbf16>, vector<2x128xf32> -> vector<2x128xf32>
    %197 = arith.addf %192, %196 : vector<2x128xf32>
    %c9_118 = arith.constant 9 : index
    %c0_119 = arith.constant 0 : index
    %c0_120 = arith.constant 0 : index
    %198 = vector.load %arg11[%c9_118, %c0_119, %c0_120] : memref<22x1x128xf32, #tpu.memory_space<vmem>>, vector<1x1x128xf32>
    %199 = vector.shape_cast %198 : vector<1x1x128xf32> to vector<1x128xf32>
    %200 = vector.broadcast %199 : vector<1x128xf32> to vector<2x128xf32>
    %201 = arith.addf %197, %200 : vector<2x128xf32>
    %cst_121 = arith.constant 0.000000e+00 : f32
    %202 = vector.broadcast %cst_121 : f32 to vector<2x128xf32>
    %203 = arith.cmpf ogt, %201, %202 : vector<2x128xf32>
    %cst_122 = arith.constant 0.00999999977 : f32
    %204 = vector.broadcast %cst_122 : f32 to vector<2x128xf32>
    %205 = arith.mulf %204, %201 : vector<2x128xf32>
    %206 = arith.select %203, %201, %205 : vector<2x128xi1>, vector<2x128xf32>
    %207 = arith.truncf %206 : vector<2x128xf32> to vector<2x128xbf16>
    %c17 = arith.constant 17 : index
    %c0_123 = arith.constant 0 : index
    %c0_124 = arith.constant 0 : index
    %208 = vector.load %arg10[%c17, %c0_123, %c0_124] : memref<36x128x128xbf16, #tpu.memory_space<vmem>>, vector<1x128x128xbf16>
    %209 = vector.shape_cast %208 : vector<1x128x128xbf16> to vector<128x128xbf16>
    %cst_125 = arith.constant dense<0.000000e+00> : vector<2x128xf32>
    %210 = tpu.matmul %207, %209, %cst_125 {dimension_numbers = #tpu.dot_dimension_numbers<[1], [0], [0], [1], [0, 0, 1, 1], [], []>} : vector<2x128xbf16>, vector<128x128xbf16>, vector<2x128xf32> -> vector<2x128xf32>
    %c10_126 = arith.constant 10 : index
    %c0_127 = arith.constant 0 : index
    %c0_128 = arith.constant 0 : index
    %211 = vector.load %arg11[%c10_126, %c0_127, %c0_128] : memref<22x1x128xf32, #tpu.memory_space<vmem>>, vector<1x1x128xf32>
    %212 = vector.shape_cast %211 : vector<1x1x128xf32> to vector<1x128xf32>
    %213 = vector.broadcast %212 : vector<1x128xf32> to vector<2x128xf32>
    %214 = arith.addf %210, %213 : vector<2x128xf32>
    %215 = arith.addf %56, %185 : vector<8x128xf32>
    %216 = arith.addf %70, %123 : vector<24x128xf32>
    %217 = arith.addf %84, %214 : vector<2x128xf32>
    %218 = arith.truncf %215 : vector<8x128xf32> to vector<8x128xbf16>
    %c18 = arith.constant 18 : index
    %c0_129 = arith.constant 0 : index
    %c0_130 = arith.constant 0 : index
    %219 = vector.load %arg10[%c18, %c0_129, %c0_130] : memref<36x128x128xbf16, #tpu.memory_space<vmem>>, vector<1x128x128xbf16>
    %220 = vector.shape_cast %219 : vector<1x128x128xbf16> to vector<128x128xbf16>
    %cst_131 = arith.constant dense<0.000000e+00> : vector<8x128xf32>
    %221 = tpu.matmul %218, %220, %cst_131 {dimension_numbers = #tpu.dot_dimension_numbers<[1], [0], [0], [1], [0, 0, 1, 1], [], []>} : vector<8x128xbf16>, vector<128x128xbf16>, vector<8x128xf32> -> vector<8x128xf32>
    %cst_132 = arith.constant dense<0.000000e+00> : vector<24x128xf32>
    %222 = tpu.matmul %5, %221, %cst_132 {dimension_numbers = #tpu.dot_dimension_numbers<[1], [0], [0], [1], [0, 0, 1, 1], [], []>} : vector<24x8xf32>, vector<8x128xf32>, vector<24x128xf32> -> vector<24x128xf32>
    %223 = arith.truncf %215 : vector<8x128xf32> to vector<8x128xbf16>
    %c19 = arith.constant 19 : index
    %c0_133 = arith.constant 0 : index
    %c0_134 = arith.constant 0 : index
    %224 = vector.load %arg10[%c19, %c0_133, %c0_134] : memref<36x128x128xbf16, #tpu.memory_space<vmem>>, vector<1x128x128xbf16>
    %225 = vector.shape_cast %224 : vector<1x128x128xbf16> to vector<128x128xbf16>
    %cst_135 = arith.constant dense<0.000000e+00> : vector<8x128xf32>
    %226 = tpu.matmul %223, %225, %cst_135 {dimension_numbers = #tpu.dot_dimension_numbers<[1], [0], [0], [1], [0, 0, 1, 1], [], []>} : vector<8x128xbf16>, vector<128x128xbf16>, vector<8x128xf32> -> vector<8x128xf32>
    %cst_136 = arith.constant dense<0.000000e+00> : vector<24x128xf32>
    %227 = tpu.matmul %10, %226, %cst_136 {dimension_numbers = #tpu.dot_dimension_numbers<[1], [0], [0], [1], [0, 0, 1, 1], [], []>} : vector<24x8xf32>, vector<8x128xf32>, vector<24x128xf32> -> vector<24x128xf32>
    %228 = arith.addf %222, %227 : vector<24x128xf32>
    %229 = arith.truncf %216 : vector<24x128xf32> to vector<24x128xbf16>
    %c20 = arith.constant 20 : index
    %c0_137 = arith.constant 0 : index
    %c0_138 = arith.constant 0 : index
    %230 = vector.load %arg10[%c20, %c0_137, %c0_138] : memref<36x128x128xbf16, #tpu.memory_space<vmem>>, vector<1x128x128xbf16>
    %231 = vector.shape_cast %230 : vector<1x128x128xbf16> to vector<128x128xbf16>
    %cst_139 = arith.constant dense<0.000000e+00> : vector<24x128xf32>
    %232 = tpu.matmul %229, %231, %cst_139 {dimension_numbers = #tpu.dot_dimension_numbers<[1], [0], [0], [1], [0, 0, 1, 1], [], []>} : vector<24x128xbf16>, vector<128x128xbf16>, vector<24x128xf32> -> vector<24x128xf32>
    %233 = arith.addf %228, %232 : vector<24x128xf32>
    %234 = arith.truncf %217 : vector<2x128xf32> to vector<2x128xbf16>
    %c21 = arith.constant 21 : index
    %c0_140 = arith.constant 0 : index
    %c0_141 = arith.constant 0 : index
    %235 = vector.load %arg10[%c21, %c0_140, %c0_141] : memref<36x128x128xbf16, #tpu.memory_space<vmem>>, vector<1x128x128xbf16>
    %236 = vector.shape_cast %235 : vector<1x128x128xbf16> to vector<128x128xbf16>
    %cst_142 = arith.constant dense<0.000000e+00> : vector<2x128xf32>
    %237 = tpu.matmul %234, %236, %cst_142 {dimension_numbers = #tpu.dot_dimension_numbers<[1], [0], [0], [1], [0, 0, 1, 1], [], []>} : vector<2x128xbf16>, vector<128x128xbf16>, vector<2x128xf32> -> vector<2x128xf32>
    %cst_143 = arith.constant dense<0.000000e+00> : vector<24x128xf32>
    %238 = tpu.matmul %16, %237, %cst_143 {dimension_numbers = #tpu.dot_dimension_numbers<[1], [0], [0], [1], [0, 0, 1, 1], [], []>} : vector<24x2xf32>, vector<2x128xf32>, vector<24x128xf32> -> vector<24x128xf32>
    %239 = arith.addf %233, %238 : vector<24x128xf32>
    %c11_144 = arith.constant 11 : index
    %c0_145 = arith.constant 0 : index
    %c0_146 = arith.constant 0 : index
    %240 = vector.load %arg11[%c11_144, %c0_145, %c0_146] : memref<22x1x128xf32, #tpu.memory_space<vmem>>, vector<1x1x128xf32>
    %241 = vector.shape_cast %240 : vector<1x1x128xf32> to vector<1x128xf32>
    %242 = vector.broadcast %241 : vector<1x128xf32> to vector<24x128xf32>
    %243 = arith.addf %239, %242 : vector<24x128xf32>
    %cst_147 = arith.constant 0.000000e+00 : f32
    %244 = vector.broadcast %cst_147 : f32 to vector<24x128xf32>
    %245 = arith.cmpf ogt, %243, %244 : vector<24x128xf32>
    %cst_148 = arith.constant 0.00999999977 : f32
    %246 = vector.broadcast %cst_148 : f32 to vector<24x128xf32>
    %247 = arith.mulf %246, %243 : vector<24x128xf32>
    %248 = arith.select %245, %243, %247 : vector<24x128xi1>, vector<24x128xf32>
    %249 = arith.truncf %248 : vector<24x128xf32> to vector<24x128xbf16>
    %c22 = arith.constant 22 : index
    %c0_149 = arith.constant 0 : index
    %c0_150 = arith.constant 0 : index
    %250 = vector.load %arg10[%c22, %c0_149, %c0_150] : memref<36x128x128xbf16, #tpu.memory_space<vmem>>, vector<1x128x128xbf16>
    %251 = vector.shape_cast %250 : vector<1x128x128xbf16> to vector<128x128xbf16>
    %cst_151 = arith.constant dense<0.000000e+00> : vector<24x128xf32>
    %252 = tpu.matmul %249, %251, %cst_151 {dimension_numbers = #tpu.dot_dimension_numbers<[1], [0], [0], [1], [0, 0, 1, 1], [], []>} : vector<24x128xbf16>, vector<128x128xbf16>, vector<24x128xf32> -> vector<24x128xf32>
    %c12_152 = arith.constant 12 : index
    %c0_153 = arith.constant 0 : index
    %c0_154 = arith.constant 0 : index
    %253 = vector.load %arg11[%c12_152, %c0_153, %c0_154] : memref<22x1x128xf32, #tpu.memory_space<vmem>>, vector<1x1x128xf32>
    %254 = vector.shape_cast %253 : vector<1x1x128xf32> to vector<1x128xf32>
    %255 = vector.broadcast %254 : vector<1x128xf32> to vector<24x128xf32>
    %256 = arith.addf %252, %255 : vector<24x128xf32>
    %257 = arith.truncf %215 : vector<8x128xf32> to vector<8x128xbf16>
    %c23 = arith.constant 23 : index
    %c0_155 = arith.constant 0 : index
    %c0_156 = arith.constant 0 : index
    %258 = vector.load %arg10[%c23, %c0_155, %c0_156] : memref<36x128x128xbf16, #tpu.memory_space<vmem>>, vector<1x128x128xbf16>
    %259 = vector.shape_cast %258 : vector<1x128x128xbf16> to vector<128x128xbf16>
    %cst_157 = arith.constant dense<0.000000e+00> : vector<8x128xf32>
    %260 = tpu.matmul %257, %259, %cst_157 {dimension_numbers = #tpu.dot_dimension_numbers<[1], [0], [0], [1], [0, 0, 1, 1], [], []>} : vector<8x128xbf16>, vector<128x128xbf16>, vector<8x128xf32> -> vector<8x128xf32>
    %cst_158 = arith.constant dense<0.000000e+00> : vector<24x128xf32>
    %261 = tpu.matmul %5, %260, %cst_158 {dimension_numbers = #tpu.dot_dimension_numbers<[1], [0], [0], [1], [0, 0, 1, 1], [], []>} : vector<24x8xf32>, vector<8x128xf32>, vector<24x128xf32> -> vector<24x128xf32>
    %262 = arith.truncf %256 : vector<24x128xf32> to vector<24x128xbf16>
    %c24 = arith.constant 24 : index
    %c0_159 = arith.constant 0 : index
    %c0_160 = arith.constant 0 : index
    %263 = vector.load %arg10[%c24, %c0_159, %c0_160] : memref<36x128x128xbf16, #tpu.memory_space<vmem>>, vector<1x128x128xbf16>
    %264 = vector.shape_cast %263 : vector<1x128x128xbf16> to vector<128x128xbf16>
    %cst_161 = arith.constant dense<0.000000e+00> : vector<24x128xf32>
    %265 = tpu.matmul %262, %264, %cst_161 {dimension_numbers = #tpu.dot_dimension_numbers<[1], [0], [0], [1], [0, 0, 1, 1], [], []>} : vector<24x128xbf16>, vector<128x128xbf16>, vector<24x128xf32> -> vector<24x128xf32>
    %266 = arith.addf %261, %265 : vector<24x128xf32>
    %c13_162 = arith.constant 13 : index
    %c0_163 = arith.constant 0 : index
    %c0_164 = arith.constant 0 : index
    %267 = vector.load %arg11[%c13_162, %c0_163, %c0_164] : memref<22x1x128xf32, #tpu.memory_space<vmem>>, vector<1x1x128xf32>
    %268 = vector.shape_cast %267 : vector<1x1x128xf32> to vector<1x128xf32>
    %269 = vector.broadcast %268 : vector<1x128xf32> to vector<24x128xf32>
    %270 = arith.addf %266, %269 : vector<24x128xf32>
    %cst_165 = arith.constant 0.000000e+00 : f32
    %271 = vector.broadcast %cst_165 : f32 to vector<24x128xf32>
    %272 = arith.cmpf ogt, %270, %271 : vector<24x128xf32>
    %cst_166 = arith.constant 0.00999999977 : f32
    %273 = vector.broadcast %cst_166 : f32 to vector<24x128xf32>
    %274 = arith.mulf %273, %270 : vector<24x128xf32>
    %275 = arith.select %272, %270, %274 : vector<24x128xi1>, vector<24x128xf32>
    %276 = arith.truncf %275 : vector<24x128xf32> to vector<24x128xbf16>
    %c25 = arith.constant 25 : index
    %c0_167 = arith.constant 0 : index
    %c0_168 = arith.constant 0 : index
    %277 = vector.load %arg10[%c25, %c0_167, %c0_168] : memref<36x128x128xbf16, #tpu.memory_space<vmem>>, vector<1x128x128xbf16>
    %278 = vector.shape_cast %277 : vector<1x128x128xbf16> to vector<128x128xbf16>
    %cst_169 = arith.constant dense<0.000000e+00> : vector<24x128xf32>
    %279 = tpu.matmul %276, %278, %cst_169 {dimension_numbers = #tpu.dot_dimension_numbers<[1], [0], [0], [1], [0, 0, 1, 1], [], []>} : vector<24x128xbf16>, vector<128x128xbf16>, vector<24x128xf32> -> vector<24x128xf32>
    %c14_170 = arith.constant 14 : index
    %c0_171 = arith.constant 0 : index
    %c0_172 = arith.constant 0 : index
    %280 = vector.load %arg11[%c14_170, %c0_171, %c0_172] : memref<22x1x128xf32, #tpu.memory_space<vmem>>, vector<1x1x128xf32>
    %281 = vector.shape_cast %280 : vector<1x1x128xf32> to vector<1x128xf32>
    %282 = vector.broadcast %281 : vector<1x128xf32> to vector<24x128xf32>
    %283 = arith.addf %279, %282 : vector<24x128xf32>
    %cst_173 = arith.constant dense<0.000000e+00> : vector<8x128xf32>
    %284 = tpu.matmul %28, %283, %cst_173 {dimension_numbers = #tpu.dot_dimension_numbers<[1], [0], [0], [1], [0, 0, 1, 1], [], []>} : vector<8x24xf32>, vector<24x128xf32>, vector<8x128xf32> -> vector<8x128xf32>
    %285 = vector.broadcast %32 : vector<8x1xf32> to vector<8x128xf32>
    %286 = arith.divf %284, %285 : vector<8x128xf32>
    %287 = arith.truncf %215 : vector<8x128xf32> to vector<8x128xbf16>
    %c26 = arith.constant 26 : index
    %c0_174 = arith.constant 0 : index
    %c0_175 = arith.constant 0 : index
    %288 = vector.load %arg10[%c26, %c0_174, %c0_175] : memref<36x128x128xbf16, #tpu.memory_space<vmem>>, vector<1x128x128xbf16>
    %289 = vector.shape_cast %288 : vector<1x128x128xbf16> to vector<128x128xbf16>
    %cst_176 = arith.constant dense<0.000000e+00> : vector<8x128xf32>
    %290 = tpu.matmul %287, %289, %cst_176 {dimension_numbers = #tpu.dot_dimension_numbers<[1], [0], [0], [1], [0, 0, 1, 1], [], []>} : vector<8x128xbf16>, vector<128x128xbf16>, vector<8x128xf32> -> vector<8x128xf32>
    %291 = arith.truncf %286 : vector<8x128xf32> to vector<8x128xbf16>
    %c27 = arith.constant 27 : index
    %c0_177 = arith.constant 0 : index
    %c0_178 = arith.constant 0 : index
    %292 = vector.load %arg10[%c27, %c0_177, %c0_178] : memref<36x128x128xbf16, #tpu.memory_space<vmem>>, vector<1x128x128xbf16>
    %293 = vector.shape_cast %292 : vector<1x128x128xbf16> to vector<128x128xbf16>
    %cst_179 = arith.constant dense<0.000000e+00> : vector<8x128xf32>
    %294 = tpu.matmul %291, %293, %cst_179 {dimension_numbers = #tpu.dot_dimension_numbers<[1], [0], [0], [1], [0, 0, 1, 1], [], []>} : vector<8x128xbf16>, vector<128x128xbf16>, vector<8x128xf32> -> vector<8x128xf32>
    %295 = arith.addf %290, %294 : vector<8x128xf32>
    %296 = arith.truncf %217 : vector<2x128xf32> to vector<2x128xbf16>
    %c28 = arith.constant 28 : index
    %c0_180 = arith.constant 0 : index
    %c0_181 = arith.constant 0 : index
    %297 = vector.load %arg10[%c28, %c0_180, %c0_181] : memref<36x128x128xbf16, #tpu.memory_space<vmem>>, vector<1x128x128xbf16>
    %298 = vector.shape_cast %297 : vector<1x128x128xbf16> to vector<128x128xbf16>
    %cst_182 = arith.constant dense<0.000000e+00> : vector<2x128xf32>
    %299 = tpu.matmul %296, %298, %cst_182 {dimension_numbers = #tpu.dot_dimension_numbers<[1], [0], [0], [1], [0, 0, 1, 1], [], []>} : vector<2x128xbf16>, vector<128x128xbf16>, vector<2x128xf32> -> vector<2x128xf32>
    %cst_183 = arith.constant dense<0.000000e+00> : vector<8x128xf32>
    %300 = tpu.matmul %22, %299, %cst_183 {dimension_numbers = #tpu.dot_dimension_numbers<[1], [0], [0], [1], [0, 0, 1, 1], [], []>} : vector<8x2xf32>, vector<2x128xf32>, vector<8x128xf32> -> vector<8x128xf32>
    %301 = arith.addf %295, %300 : vector<8x128xf32>
    %c15_184 = arith.constant 15 : index
    %c0_185 = arith.constant 0 : index
    %c0_186 = arith.constant 0 : index
    %302 = vector.load %arg11[%c15_184, %c0_185, %c0_186] : memref<22x1x128xf32, #tpu.memory_space<vmem>>, vector<1x1x128xf32>
    %303 = vector.shape_cast %302 : vector<1x1x128xf32> to vector<1x128xf32>
    %304 = vector.broadcast %303 : vector<1x128xf32> to vector<8x128xf32>
    %305 = arith.addf %301, %304 : vector<8x128xf32>
    %cst_187 = arith.constant 0.000000e+00 : f32
    %306 = vector.broadcast %cst_187 : f32 to vector<8x128xf32>
    %307 = arith.cmpf ogt, %305, %306 : vector<8x128xf32>
    %cst_188 = arith.constant 0.00999999977 : f32
    %308 = vector.broadcast %cst_188 : f32 to vector<8x128xf32>
    %309 = arith.mulf %308, %305 : vector<8x128xf32>
    %310 = arith.select %307, %305, %309 : vector<8x128xi1>, vector<8x128xf32>
    %311 = arith.truncf %310 : vector<8x128xf32> to vector<8x128xbf16>
    %c29 = arith.constant 29 : index
    %c0_189 = arith.constant 0 : index
    %c0_190 = arith.constant 0 : index
    %312 = vector.load %arg10[%c29, %c0_189, %c0_190] : memref<36x128x128xbf16, #tpu.memory_space<vmem>>, vector<1x128x128xbf16>
    %313 = vector.shape_cast %312 : vector<1x128x128xbf16> to vector<128x128xbf16>
    %cst_191 = arith.constant dense<0.000000e+00> : vector<8x128xf32>
    %314 = tpu.matmul %311, %313, %cst_191 {dimension_numbers = #tpu.dot_dimension_numbers<[1], [0], [0], [1], [0, 0, 1, 1], [], []>} : vector<8x128xbf16>, vector<128x128xbf16>, vector<8x128xf32> -> vector<8x128xf32>
    %c16_192 = arith.constant 16 : index
    %c0_193 = arith.constant 0 : index
    %c0_194 = arith.constant 0 : index
    %315 = vector.load %arg11[%c16_192, %c0_193, %c0_194] : memref<22x1x128xf32, #tpu.memory_space<vmem>>, vector<1x1x128xf32>
    %316 = vector.shape_cast %315 : vector<1x1x128xf32> to vector<1x128xf32>
    %317 = vector.broadcast %316 : vector<1x128xf32> to vector<8x128xf32>
    %318 = arith.addf %314, %317 : vector<8x128xf32>
    %cst_195 = arith.constant dense<0.000000e+00> : vector<2x128xf32>
    %319 = tpu.matmul %38, %318, %cst_195 {dimension_numbers = #tpu.dot_dimension_numbers<[1], [0], [0], [1], [0, 0, 1, 1], [], []>} : vector<2x8xf32>, vector<8x128xf32>, vector<2x128xf32> -> vector<2x128xf32>
    %320 = vector.broadcast %42 : vector<2x1xf32> to vector<2x128xf32>
    %321 = arith.divf %319, %320 : vector<2x128xf32>
    %322 = arith.truncf %217 : vector<2x128xf32> to vector<2x128xbf16>
    %c30 = arith.constant 30 : index
    %c0_196 = arith.constant 0 : index
    %c0_197 = arith.constant 0 : index
    %323 = vector.load %arg10[%c30, %c0_196, %c0_197] : memref<36x128x128xbf16, #tpu.memory_space<vmem>>, vector<1x128x128xbf16>
    %324 = vector.shape_cast %323 : vector<1x128x128xbf16> to vector<128x128xbf16>
    %cst_198 = arith.constant dense<0.000000e+00> : vector<2x128xf32>
    %325 = tpu.matmul %322, %324, %cst_198 {dimension_numbers = #tpu.dot_dimension_numbers<[1], [0], [0], [1], [0, 0, 1, 1], [], []>} : vector<2x128xbf16>, vector<128x128xbf16>, vector<2x128xf32> -> vector<2x128xf32>
    %326 = arith.truncf %321 : vector<2x128xf32> to vector<2x128xbf16>
    %c31 = arith.constant 31 : index
    %c0_199 = arith.constant 0 : index
    %c0_200 = arith.constant 0 : index
    %327 = vector.load %arg10[%c31, %c0_199, %c0_200] : memref<36x128x128xbf16, #tpu.memory_space<vmem>>, vector<1x128x128xbf16>
    %328 = vector.shape_cast %327 : vector<1x128x128xbf16> to vector<128x128xbf16>
    %cst_201 = arith.constant dense<0.000000e+00> : vector<2x128xf32>
    %329 = tpu.matmul %326, %328, %cst_201 {dimension_numbers = #tpu.dot_dimension_numbers<[1], [0], [0], [1], [0, 0, 1, 1], [], []>} : vector<2x128xbf16>, vector<128x128xbf16>, vector<2x128xf32> -> vector<2x128xf32>
    %330 = arith.addf %325, %329 : vector<2x128xf32>
    %c17_202 = arith.constant 17 : index
    %c0_203 = arith.constant 0 : index
    %c0_204 = arith.constant 0 : index
    %331 = vector.load %arg11[%c17_202, %c0_203, %c0_204] : memref<22x1x128xf32, #tpu.memory_space<vmem>>, vector<1x1x128xf32>
    %332 = vector.shape_cast %331 : vector<1x1x128xf32> to vector<1x128xf32>
    %333 = vector.broadcast %332 : vector<1x128xf32> to vector<2x128xf32>
    %334 = arith.addf %330, %333 : vector<2x128xf32>
    %cst_205 = arith.constant 0.000000e+00 : f32
    %335 = vector.broadcast %cst_205 : f32 to vector<2x128xf32>
    %336 = arith.cmpf ogt, %334, %335 : vector<2x128xf32>
    %cst_206 = arith.constant 0.00999999977 : f32
    %337 = vector.broadcast %cst_206 : f32 to vector<2x128xf32>
    %338 = arith.mulf %337, %334 : vector<2x128xf32>
    %339 = arith.select %336, %334, %338 : vector<2x128xi1>, vector<2x128xf32>
    %340 = arith.truncf %339 : vector<2x128xf32> to vector<2x128xbf16>
    %c32 = arith.constant 32 : index
    %c0_207 = arith.constant 0 : index
    %c0_208 = arith.constant 0 : index
    %341 = vector.load %arg10[%c32, %c0_207, %c0_208] : memref<36x128x128xbf16, #tpu.memory_space<vmem>>, vector<1x128x128xbf16>
    %342 = vector.shape_cast %341 : vector<1x128x128xbf16> to vector<128x128xbf16>
    %cst_209 = arith.constant dense<0.000000e+00> : vector<2x128xf32>
    %343 = tpu.matmul %340, %342, %cst_209 {dimension_numbers = #tpu.dot_dimension_numbers<[1], [0], [0], [1], [0, 0, 1, 1], [], []>} : vector<2x128xbf16>, vector<128x128xbf16>, vector<2x128xf32> -> vector<2x128xf32>
    %c18_210 = arith.constant 18 : index
    %c0_211 = arith.constant 0 : index
    %c0_212 = arith.constant 0 : index
    %344 = vector.load %arg11[%c18_210, %c0_211, %c0_212] : memref<22x1x128xf32, #tpu.memory_space<vmem>>, vector<1x1x128xf32>
    %345 = vector.shape_cast %344 : vector<1x1x128xf32> to vector<1x128xf32>
    %346 = vector.broadcast %345 : vector<1x128xf32> to vector<2x128xf32>
    %347 = arith.addf %343, %346 : vector<2x128xf32>
    %348 = arith.addf %216, %256 : vector<24x128xf32>
    %349 = arith.addf %217, %347 : vector<2x128xf32>
    %350 = arith.truncf %348 : vector<24x128xf32> to vector<24x128xbf16>
    %c33 = arith.constant 33 : index
    %c0_213 = arith.constant 0 : index
    %c0_214 = arith.constant 0 : index
    %351 = vector.load %arg10[%c33, %c0_213, %c0_214] : memref<36x128x128xbf16, #tpu.memory_space<vmem>>, vector<1x128x128xbf16>
    %352 = vector.shape_cast %351 : vector<1x128x128xbf16> to vector<128x128xbf16>
    %cst_215 = arith.constant dense<0.000000e+00> : vector<24x128xf32>
    %353 = tpu.matmul %350, %352, %cst_215 {dimension_numbers = #tpu.dot_dimension_numbers<[1], [0], [0], [1], [0, 0, 1, 1], [], []>} : vector<24x128xbf16>, vector<128x128xbf16>, vector<24x128xf32> -> vector<24x128xf32>
    %c19_216 = arith.constant 19 : index
    %c0_217 = arith.constant 0 : index
    %c0_218 = arith.constant 0 : index
    %354 = vector.load %arg11[%c19_216, %c0_217, %c0_218] : memref<22x1x128xf32, #tpu.memory_space<vmem>>, vector<1x1x128xf32>
    %355 = vector.shape_cast %354 : vector<1x1x128xf32> to vector<1x128xf32>
    %356 = vector.broadcast %355 : vector<1x128xf32> to vector<24x128xf32>
    %357 = arith.addf %353, %356 : vector<24x128xf32>
    %c0_219 = arith.constant 0 : index
    %c0_220 = arith.constant 0 : index
    %358 = vector.load %arg12[%c0_219, %c0_220] : memref<24x128xf32, #tpu.memory_space<vmem>>, vector<24x128xf32>
    tpu.vector_store %arg12[%c0_219, %c0_220], %357 {strides = array<i32>} : memref<24x128xf32, #tpu.memory_space<vmem>>, vector<24x128xf32>,
    %359 = arith.truncf %349 : vector<2x128xf32> to vector<2x128xbf16>
    %c34 = arith.constant 34 : index
    %c0_221 = arith.constant 0 : index
    %c0_222 = arith.constant 0 : index
    %360 = vector.load %arg10[%c34, %c0_221, %c0_222] : memref<36x128x128xbf16, #tpu.memory_space<vmem>>, vector<1x128x128xbf16>
    %361 = vector.shape_cast %360 : vector<1x128x128xbf16> to vector<128x128xbf16>
    %cst_223 = arith.constant dense<0.000000e+00> : vector<2x128xf32>
    %362 = tpu.matmul %359, %361, %cst_223 {dimension_numbers = #tpu.dot_dimension_numbers<[1], [0], [0], [1], [0, 0, 1, 1], [], []>} : vector<2x128xbf16>, vector<128x128xbf16>, vector<2x128xf32> -> vector<2x128xf32>
    %c20_224 = arith.constant 20 : index
    %c0_225 = arith.constant 0 : index
    %c0_226 = arith.constant 0 : index
    %363 = vector.load %arg11[%c20_224, %c0_225, %c0_226] : memref<22x1x128xf32, #tpu.memory_space<vmem>>, vector<1x1x128xf32>
    %364 = vector.shape_cast %363 : vector<1x1x128xf32> to vector<1x128xf32>
    %365 = vector.broadcast %364 : vector<1x128xf32> to vector<2x128xf32>
    %366 = arith.addf %362, %365 : vector<2x128xf32>
    %cst_227 = arith.constant 0.000000e+00 : f32
    %367 = vector.broadcast %cst_227 : f32 to vector<2x128xf32>
    %368 = arith.cmpf ogt, %366, %367 : vector<2x128xf32>
    %cst_228 = arith.constant 0.00999999977 : f32
    %369 = vector.broadcast %cst_228 : f32 to vector<2x128xf32>
    %370 = arith.mulf %369, %366 : vector<2x128xf32>
    %371 = arith.select %368, %366, %370 : vector<2x128xi1>, vector<2x128xf32>
    %372 = arith.truncf %371 : vector<2x128xf32> to vector<2x128xbf16>
    %c35 = arith.constant 35 : index
    %c0_229 = arith.constant 0 : index
    %c0_230 = arith.constant 0 : index
    %373 = vector.load %arg10[%c35, %c0_229, %c0_230] : memref<36x128x128xbf16, #tpu.memory_space<vmem>>, vector<1x128x128xbf16>
    %374 = vector.shape_cast %373 : vector<1x128x128xbf16> to vector<128x128xbf16>
    %cst_231 = arith.constant dense<0.000000e+00> : vector<2x128xf32>
    %375 = tpu.matmul %372, %374, %cst_231 {dimension_numbers = #tpu.dot_dimension_numbers<[1], [0], [0], [1], [0, 0, 1, 1], [], []>} : vector<2x128xbf16>, vector<128x128xbf16>, vector<2x128xf32> -> vector<2x128xf32>
    %c21_232 = arith.constant 21 : index
    %c0_233 = arith.constant 0 : index
    %c0_234 = arith.constant 0 : index
    %376 = vector.load %arg11[%c21_232, %c0_233, %c0_234] : memref<22x1x128xf32, #tpu.memory_space<vmem>>, vector<1x1x128xf32>
    %377 = vector.shape_cast %376 : vector<1x1x128xf32> to vector<1x128xf32>
    %378 = vector.broadcast %377 : vector<1x128xf32> to vector<2x128xf32>
    %379 = arith.addf %375, %378 : vector<2x128xf32>
    %c0_235 = arith.constant 0 : index
    %c0_236 = arith.constant 0 : index
    %380 = vector.load %arg13[%c0_235, %c0_236] : memref<2x128xf32, #tpu.memory_space<vmem>>, vector<2x128xf32>
    tpu.vector_store %arg13[%c0_235, %c0_236], %379 {strides = array<i32>} : memref<2x128xf32, #tpu.memory_space<vmem>>, vector<2x128xf32>,
    return
  }
  func.func @transform_0(%arg0: i32) -> (i32, i32) {
    %c0_i32 = arith.constant 0 : i32
    %c0_i32_0 = arith.constant 0 : i32
    %c0_i32_1 = arith.constant 0 : i32
    return %c0_i32, %c0_i32_0 : i32, i32
  }
  func.func @transform_1(%arg0: i32) -> (i32, i32) {
    %c0_i32 = arith.constant 0 : i32
    %c0_i32_0 = arith.constant 0 : i32
    %c0_i32_1 = arith.constant 0 : i32
    return %c0_i32, %c0_i32_0 : i32, i32
  }
  func.func @transform_2(%arg0: i32) -> (i32, i32) {
    %c0_i32 = arith.constant 0 : i32
    %c0_i32_0 = arith.constant 0 : i32
    %c0_i32_1 = arith.constant 0 : i32
    return %c0_i32, %c0_i32_0 : i32, i32
  }
  func.func @transform_3(%arg0: i32) -> (i32, i32) {
    %c0_i32 = arith.constant 0 : i32
    %c0_i32_0 = arith.constant 0 : i32
    %c0_i32_1 = arith.constant 0 : i32
    return %c0_i32, %c0_i32_0 : i32, i32
  }
  func.func @transform_4(%arg0: i32) -> (i32, i32) {
    %c0_i32 = arith.constant 0 : i32
    %c0_i32_0 = arith.constant 0 : i32
    %c0_i32_1 = arith.constant 0 : i32
    return %c0_i32, %c0_i32_0 : i32, i32
  }
  func.func @transform_5(%arg0: i32) -> (i32, i32) {
    %c0_i32 = arith.constant 0 : i32
    %c0_i32_0 = arith.constant 0 : i32
    %c0_i32_1 = arith.constant 0 : i32
    return %c0_i32, %c0_i32_0 : i32, i32
  }
  func.func @transform_6(%arg0: i32) -> (i32, i32) {
    %c0_i32 = arith.constant 0 : i32
    %c0_i32_0 = arith.constant 0 : i32
    %c0_i32_1 = arith.constant 0 : i32
    return %c0_i32, %c0_i32_0 : i32, i32
  }
  func.func @transform_7(%arg0: i32) -> (i32, i32) {
    %c0_i32 = arith.constant 0 : i32
    %c0_i32_0 = arith.constant 0 : i32
    %c0_i32_1 = arith.constant 0 : i32
    return %c0_i32, %c0_i32_0 : i32, i32
  }
  func.func @transform_8(%arg0: i32) -> (i32, i32) {
    %c0_i32 = arith.constant 0 : i32
    %c0_i32_0 = arith.constant 0 : i32
    %c0_i32_1 = arith.constant 0 : i32
    return %c0_i32, %c0_i32_0 : i32, i32
  }
  func.func @transform_9(%arg0: i32) -> (i32, i32, i32) {
    %c0_i32 = arith.constant 0 : i32
    %c0_i32_0 = arith.constant 0 : i32
    %c0_i32_1 = arith.constant 0 : i32
    %c0_i32_2 = arith.constant 0 : i32
    return %c0_i32, %c0_i32_0, %c0_i32_1 : i32, i32, i32
  }
  func.func @transform_10(%arg0: i32) -> (i32, i32, i32) {
    %c0_i32 = arith.constant 0 : i32
    %c0_i32_0 = arith.constant 0 : i32
    %c0_i32_1 = arith.constant 0 : i32
    %c0_i32_2 = arith.constant 0 : i32
    return %c0_i32, %c0_i32_0, %c0_i32_1 : i32, i32, i32
  }
  func.func @transform_11(%arg0: i32) -> (i32, i32) {
    %c0_i32 = arith.constant 0 : i32
    %c0_i32_0 = arith.constant 0 : i32
    %c0_i32_1 = arith.constant 0 : i32
    return %c0_i32, %c0_i32_0 : i32, i32
  }
  func.func @transform_12(%arg0: i32) -> (i32, i32) {
    %c0_i32 = arith.constant 0 : i32
    %c0_i32_0 = arith.constant 0 : i32
    %c0_i32_1 = arith.constant 0 : i32
    return %c0_i32, %c0_i32_0 : i32, i32
  }
}

</mosaic_0001>

<bundles_post_ra>
// kernel: forward.1
= control target key start
LH: loop header
LB: loop body
LE: loop exit
PB: predicated region body
PF: predicated region fallthrough
CT: control target
= control target key end

     0   :  { %18 = vsyncpa [#allocation3], 0  ;;  %s8173_s0 = inlined_call_operand.vmem [shape: f32[8,128], index: 0, kind: input, shape index: {}]   ;;  %s8174_s1 = inlined_call_operand.vmem [shape: f32[24,128], index: 1, kind: input, shape index: {}]   ;;  %s8175_s2 = inlined_call_operand.vmem [shape: f32[2,128], index: 2, kind: input, shape index: {}]   ;;  %s8176_s3 = inlined_call_operand.vmem [shape: s32[24,1], index: 3, kind: input, shape index: {}]   ;;  %s8177_s4 = inlined_call_operand.vmem [shape: s32[24,1], index: 4, kind: input, shape index: {}]   ;;  %s8178_s5 = inlined_call_operand.vmem [shape: s32[1,24], index: 5, kind: input, shape index: {}]   ;;  %s8179_s6 = inlined_call_operand.vmem [shape: s32[24,1], index: 6, kind: input, shape index: {}]   ;;  %s8180_s7 = inlined_call_operand.vmem [shape: s32[8,1], index: 7, kind: input, shape index: {}]   ;;  %s8181_s8 = inlined_call_operand.hbm [shape: s32[1,8], index: 8, kind: input, shape index: {}]   ;;  %s8182_s9 = inlined_call_operand.hbm [shape: bf16[36,128,128], index: 9, kind: input, shape index: {}]   ;;  %s8183_s10 = inlined_call_operand.hbm [shape: f32[22,1,128], index: 10, kind: input, shape index: {}]   ;;  %s8184_s11 = inlined_call_operand.vmem [shape: f32[24,128], index: 11, kind: output, shape index: {0}]   ;;  %s8185_s12 = inlined_call_operand.vmem [shape: f32[2,128], index: 12, kind: output, shape index: {1}]  }
   0x1   :  { %19 = vsyncpa [#allocation5], 0  ;;  %s7445_s21 = smov [#allocation4]  }
   0x2   :  { %s51_s22 = sshll.u32 %s7445_s21, 4  ;;  %s52_s22 = int_to_ptr.vmem [resolvable:$true] %s51_s22 }
   0x3   :  { %s7389_s23 = scalar_lea.vmem %s52_s22, 36864  ;;  %p7394_p1 = scmp.lt.s32.totalorder %s52_s22, %s52_s22 }
   0x4   :  { %p7390_p0 = scmp.ne.s32.totalorder %s52_s22, %s7389_s23  ;;  %p7395_p2 = scmp.lt.s32.totalorder %s7389_s23, %s7389_s23 }
   0x6   :  { %p7396_p3 = por %p7395_p2, %p7394_p1 }
   0x8   :  { %p7397_p4 = pnand %p7396_p3, %p7390_p0 }
   0xa   :  { %7400 = shalt.err (!%p7397_p4)
}
   0xb   :  { %s7446_s24 = smov 64   ;;  %s7447_s25 = smov 4  }
   0xc   :  { %57 = dma.hbm_to_vmem [thread:$0]  %s8182_s9, 36864, %s52_s22, [#allocation5], %s7446_s24, %s7446_s24, %s7447_s25  }
   0xd   :  { %s7448_s28 = smov [#allocation2]   ;;  %s7449_s30 = smov [#allocation6]  }
   0xe   :  { %s42_s29 = sshll.u32 %s7448_s28, 4  ;;  %s63_s13 = sshll.u32 %s7449_s30, 4  ;;  %s43_s29 = int_to_ptr.vmem [resolvable:$true] %s42_s29  ;;  %s64_s13 = int_to_ptr.vmem [resolvable:$true] %s63_s13 }
   0xf   :  { %s7409_s14 = scalar_lea.vmem %s43_s29, 16  ;;  %s7413_s15 = scalar_lea.vmem %s43_s29, 32 }
  0x10   :  { %p7410_p5 = scmp.ne.s32.totalorder %s43_s29, %s7409_s14  ;;  %p7414_p6 = scmp.lt.s32.totalorder %s43_s29, %s43_s29 }
  0x11   :  { %p7415_p7 = scmp.lt.s32.totalorder %s7413_s15, %s7409_s14 }
  0x13   :  { %p7416_p8 = por %p7415_p7, %p7414_p6 }
  0x15   :  { %p7417_p9 = pnand %p7416_p8, %p7410_p5 }
  0x17   :  { %7420 = shalt.err (!%p7417_p9)
}
  0x18   :  { %45 = dma.hbm_to_vmem [thread:$0]  %s8181_s8, 16, %s43_s29, [#allocation3]  }
  0x19   :  { %s7429_s18 = scalar_lea.vmem %s64_s13, 352  ;;  %p7434_p11 = scmp.lt.s32.totalorder %s64_s13, %s64_s13 }
  0x1a   :  { %p7430_p10 = scmp.ne.s32.totalorder %s64_s13, %s7429_s18  ;;  %p7435_p12 = scmp.lt.s32.totalorder %s7429_s18, %s7429_s18 }
  0x1c   :  { %p7436_p13 = por %p7435_p12, %p7434_p11 }
  0x1e   :  { %p7437_p0 = pnand %p7436_p13, %p7430_p10 }
  0x20   :  { %7440 = shalt.err (!%p7437_p0)
}
  0x21   :  { %s7450_s9 = smov 16   ;;  %s7451_s19 = smov 1  }
  0x22   :  { %69 = dma.hbm_to_vmem [thread:$0]  %s8183_s10, 352, %s64_s13, [#allocation5], %s7450_s9, %s7450_s9, %s7451_s19  }
  0x23   :  { %7441 = dma.done.wait [#allocation3], 16  }
  0x24   :  { %7442 = vsyncadd [#allocation3], 4294967280 }
  0x25   :  { %7443 = dma.done.wait [#allocation5], 37216  }
  0x26   :  { %7444 = vsyncadd [#allocation5], 4294930080  ;;  %v7452_v0 = vmov 0.0   ;;  %vm7453_vm0 = vmmov 0   ;;  %v7089_v1 = vld [vmem:[#allocation4 + $0x78] sm:$0xff]   ;;  %v7090_v2 = vld [vmem:[#allocation4 + $0x70] sm:$0xff]  }
  0x27   :  { %6231 = vmatprep.subr.bf16.mxu0 %v7452_v0  ;;  %6247 = vmatprep.mubr.msk.bf16.mxu0 %vm7453_vm0, %v7452_v0  ;;  %v7091_v3 = vld [vmem:[#allocation4 + $0x68] sm:$0xff]   ;;  %v7092_v4 = vld [vmem:[#allocation4 + $0x60] sm:$0xff]   ;;  %v7093_v5 = vld [vmem:[#allocation4 + $0x58] sm:$0xff]   ;;  %v7454_v50 = vmov 0   ;;  %vm760_vm4 = vcmask 64512   ;;  %vm1173_vm13 = vcmask 1041408  }
  0x28   :  { %6232 = vmatpush3.bf16.msra.mxu0 %v7089_v1  ;;  %v7094_v6 = vld [vmem:[#allocation4 + $0x50] sm:$0xff]   ;;  %v7105_v7 = vld [vmem:[#allocation4 + $0x38] sm:$0xff]   ;;  %v7107_v9 = vld [vmem:[#allocation4 + $0x28] sm:$0xff]   ;;  %7087 = vset.pattern.permute.xlu0 %v7454_v50  ;;  %vm1163_vm15 = vcmask 15360  }
  0x29   :  { %6233 = vmatprep.subr.bf16.mxu0 %v7452_v0  ;;  %v7106_v8 = vld [vmem:[#allocation4 + $0x30] sm:$0xff]   ;;  %6251 = vmatprep.subr.bf16.mxu1 %v7105_v7  ;;  %v7095_v10 = vld [vmem:[#allocation4 + $0x48] sm:$0xff]   ;;  %v7108_v11 = vld [vmem:[#allocation4 + $0x20] sm:$0xff]  }
  0x2a   :  { %6252 = vmatpush3.bf16.msra.mxu1 %v7105_v7  ;;  %v298_v12 = vld [vmem:[%s8174_s1] sm:$0xff]  ;;  %v299_v13 = vld [vmem:[%s8174_s1 + $0x8] sm:$0xff]  ;;  %v7110_v20 = vld [vmem:[#allocation4 + $0x10] sm:$0xff]   ;;  %7088 = vset.pattern.permute.xlu1 %v7454_v50 }
  0x2b   :  { %6253 = vmatprep.subr.bf16.mxu1 %v7106_v8  ;;  %v7096_v14 = vld [vmem:[#allocation4 + $0x40] sm:$0xff]   ;;  %v301_v16 = vpack.c.bf16 %v299_v13, %v298_v12  ;;  %v7109_v18 = vld [vmem:[#allocation4 + $0x18] sm:$0xff]   ;;  %v7098_v21 = vld [vmem:[#allocation4 + $0xb0] sm:$0xff]  }
  0x2c   :  { %6234 = vmatpush3.bf16.msra.mxu0 %v7090_v2  ;;  %v180_v15 = vld [vmem:[%s8173_s0] sm:$0xff]  ;;  %v7099_v22 = vld [vmem:[#allocation4 + $0xa8] sm:$0xff]   ;;  %v7102_v30 = vld [vmem:[#allocation4 + $0x90] sm:$0xff]  }
  0x2d   :  { %6235 = vmatprep.subr.bf16.mxu0 %v7452_v0  ;;  %6267 = vmatprep.mubr.bf16.mxu1 %v301_v16  ;;  %v181_v17 = vpack.c.bf16 %v180_v15, %v180_v15  ;;  %v7097_v19 = vld [vmem:[#allocation4 + $0xb8] sm:$0xff]   ;;  %v7111_v23 = vld [vmem:[#allocation4 + $0x8] sm:$0xff]   ;;  %v7112_v24 = vld [vmem:[#allocation4] sm:$0xff]  }
  0x2e   :  { %6254 = vmatpush3.bf16.msra.mxu1 %v7106_v8  ;;  %v7100_v25 = vld [vmem:[#allocation4 + $0xa0] sm:$0xff]   ;;  %v300_v26 = vld [vmem:[%s8174_s1 + $0x10] sm:$0xff]  ;;  %v7101_v27 = vld [vmem:[#allocation4 + $0x98] sm:$0xff]  }
  0x2f   :  { %6255 = vmatprep.subr.bf16.mxu1 %v7107_v9  ;;  %v7114_v28 = vld [vmem:[#allocation4 + $0xf8] sm:$0xff]   ;;  %v302_v29 = vpack.c.bf16 %v300_v26, %v300_v26  ;;  %v7116_v31 = vld [vmem:[#allocation4 + $0xf0] sm:$0xff]   ;;  %v7103_v32 = vld [vmem:[#allocation4 + $0x88] sm:$0xff]  }
  0x30   :  { %6236 = vmatpush3.bf16.msra.mxu0 %v7091_v3  ;;  %v7118_v33 = vld [vmem:[#allocation4 + $0xe8] sm:$0xff]   ;;  %v7104_v34 = vld [vmem:[#allocation4 + $0x80] sm:$0xff]   ;;  %v431_v35 = vld [vmem:[%s8175_s2] sm:$0x3] }
  0x31   :  { %6237 = vmatprep.subr.bf16.mxu0 %v7452_v0  ;;  %v7120_v36 = vld [vmem:[#allocation4 + $0xe0] sm:$0xff]   ;;  %v7113_v37 = vld [vmem:[#allocation4 + $0x138] sm:$0xff]   ;;  %v432_v38 = vpack.c.bf16 %v431_v35, %v431_v35  ;;  %v7115_v40 = vld [vmem:[#allocation4 + $0x130] sm:$0xff]   ;;  %v80_v35 = vlaneseq }
  0x32   :  { %6256 = vmatpush3.bf16.msra.mxu1 %v7107_v9  ;;  %v7122_v39 = vld [vmem:[#allocation4 + $0xd8] sm:$0xff]   ;;  %v7124_v41 = vld [vmem:[#allocation4 + $0xd0] sm:$0xff]   ;;  %v7117_v42 = vld [vmem:[#allocation4 + $0x128] sm:$0xff]  }
  0x33   :  { %6257 = vmatprep.subr.bf16.mxu1 %v7108_v11  ;;  %v7119_v43 = vld [vmem:[#allocation4 + $0x120] sm:$0xff]   ;;  %v7121_v44 = vld [vmem:[#allocation4 + $0x118] sm:$0xff]   ;;  %v7123_v45 = vld [vmem:[#allocation4 + $0x110] sm:$0xff]  }
  0x34   :  { %6238 = vmatpush3.bf16.msra.mxu0 %v7092_v4  ;;  %v7125_v46 = vld [vmem:[#allocation4 + $0x108] sm:$0xff]   ;;  %v7127_v48 = vld [vmem:[#allocation4 + $0x100] sm:$0xff]   ;;  %v7130_v8 = vld [vmem:[#allocation4 + $0x1b0] sm:$0xff]  }
  0x35   :  { %6239 = vmatprep.subr.bf16.mxu0 %v7452_v0  ;;  %v7126_v47 = vld [vmem:[#allocation4 + $0xc8] sm:$0xff]   ;;  %v7128_v49 = vld [vmem:[#allocation4 + $0xc0] sm:$0xff]   ;;  %v7133_v13 = vld [vmem:[#allocation4 + $0x198] sm:$0xff]  }
  0x36   :  { %6258 = vmatpush3.bf16.msra.mxu1 %v7108_v11  ;;  %v103_v51 = vld [vmem:[%s8177_s4] sm:$0xff]  ;;  %v104_v52 = vld [vmem:[%s8177_s4 + $0x8] sm:$0xff]  ;;  %v105_v55 = vld [vmem:[%s8177_s4 + $0x10] sm:$0xff] }
  0x37   :  { %6259 = vmatprep.subr.bf16.mxu1 %v7109_v18  ;;  %107 = vperm.xlu0 %7087, %v103_v51   ;;  %v83_v53 = vld [vmem:[%s8176_s3 + $0x8] sm:$0xff]  ;;  %v124_v54 = vld [vmem:[%s8179_s6] sm:$0xff]  ;;  %v126_v56 = vld [vmem:[%s8179_s6 + $0x10] sm:$0xff] }
  0x38   :  { %6240 = vmatpush3.bf16.msra.mxu0 %v7093_v5  ;;  %113 = vperm.xlu1 %7088, %v105_v55   ;;  %v145_v57 = vld [vmem:[%s8180_s7] sm:$0xff]  ;;  %v84_v59 = vld [vmem:[%s8176_s3 + $0x10] sm:$0xff]  ;;  %v125_v60 = vld [vmem:[%s8179_s6 + $0x8] sm:$0xff] }
  0x39   :  { %6241 = vmatprep.subr.bf16.mxu0 %v7452_v0  ;;  %v82_v58 = vld [vmem:[%s8176_s3] sm:$0xff]  ;;  %v7131_v9 = vld [vmem:[#allocation4 + $0x1a8] sm:$0xff]   ;;  %v7134_v15 = vld [vmem:[#allocation4 + $0x190] sm:$0xff]  }
  0x3a   :  { %6260 = vmatpush3.bf16.msra.mxu1 %v7109_v18  ;;  %v5505_v61 = vld [vmem:[#allocation6 + $0x1] ss:$0 sm:$0xff]  ;;  %v7129_v5 = vld [vmem:[#allocation4 + $0x1b8] sm:$0xff]   ;;  %v7135_v16 = vld [vmem:[#allocation4 + $0x188] sm:$0xff]  }
  0x3b   :  { %6261 = vmatprep.subr.bf16.mxu1 %v7110_v20  ;;  %110 = vperm.xlu0 %7087, %v104_v52   ;;  %v5514_v52 = vld [vmem:[#allocation6] ss:$0 sm:$0xff] }
  0x3c   :  { %6242 = vmatpush3.bf16.msra.mxu0 %v7094_v6  ;;  %86 = vperm.xlu1 %7088, %v82_v58  }
  0x3d   :  { %6243 = vmatprep.subr.bf16.mxu0 %v7452_v0 }
  0x3e   :  { %6262 = vmatpush3.bf16.msra.mxu1 %v7110_v20  ;;  %v7136_v20 = vld [vmem:[#allocation4 + $0x180] sm:$0xff]  }
  0x3f   :  { %6263 = vmatprep.subr.bf16.mxu1 %v7111_v23  ;;  %89 = vperm.xlu0 %7087, %v83_v53  }
  0x40   :  { %6244 = vmatpush3.bf16.msra.mxu0 %v7095_v10  ;;  %92 = vperm.xlu1 %7088, %v84_v59   ;;  %v7132_v10 = vld [vmem:[#allocation4 + $0x1a0] sm:$0xff]  }
  0x41   :  { %6245 = vmatprep.subr.bf16.mxu0 %v7452_v0 }
  0x42   :  { %6264 = vmatpush3.bf16.msra.mxu1 %v7111_v23 }
  0x43   :  { %6265 = vmatprep.subr.bf16.mxu1 %v7112_v24  ;;  %128 = vperm.xlu0 %7087, %v124_v54  }
  0x44   :  { %6246 = vmatpush3.bf16.msra.mxu0 %v7096_v14  ;;  %131 = vperm.xlu1 %7088, %v125_v60  }
  0x45   :  { %6271 = vmatprep.subr.bf16.mxu0 %v7452_v0 }
  0x46   :  { %6266 = vmatpush3.bf16.msra.mxu1 %v7112_v24 }
  0x47   :  { %6248 = vmatmul.mubr.bf16.vlgmr.msra.gmra.mxu0 %v181_v17  ;;  %6291 = vmatprep.subr.bf16.mxu1 %v7452_v0  ;;  %v5523_v17 = vld [vmem:[#allocation6 + $0x2] ss:$0 sm:$0xff] }
  0x48   :  { %6272 = vmatpush3.bf16.msra.mxu0 %v7097_v19  ;;  %6287 = vmatprep.mubr.msk.bf16.mxu0 %vm7453_vm0, %v7452_v0 }
  0x49   :  { %6273 = vmatprep.subr.bf16.mxu0 %v7452_v0  ;;  %6268 = vmatmul.mubr.bf16.vlgmr.msra.gmra.mxu1 %v302_v29  ;;  %v7139_v29 = vld [vmem:[#allocation4 + $0x228] sm:$0xff]  }
  0x4a   :  { %6292 = vmatpush3.bf16.msra.mxu1 %v7114_v28  ;;  %6307 = vmatprep.mubr.msk.bf16.mxu1 %vm7453_vm0, %v7452_v0  ;;  %v7138_v28 = vld [vmem:[#allocation4 + $0x230] sm:$0xff]  }
  0x4b   :  { %6293 = vmatprep.subr.bf16.mxu1 %v7452_v0  ;;  %134 = vperm.xlu0 %7087, %v126_v56  }
  0x4c   :  { %6274 = vmatpush3.bf16.msra.mxu0 %v7098_v21 }
  0x4d   :  { %6275 = vmatprep.subr.bf16.mxu0 %v7452_v0 }
  0x4e   :  { %6294 = vmatpush3.bf16.msra.mxu1 %v7116_v31  ;;  %v7141_v31 = vld [vmem:[#allocation4 + $0x218] sm:$0xff]  }
  0x4f   :  { %6295 = vmatprep.subr.bf16.mxu1 %v7452_v0  ;;  %147 = vperm.xlu0 %7087, %v145_v57   ;;  %v7146_v57 = vld [vmem:[#allocation4 + $0x170] sm:$0xff]  }
  0x50   :  { %6276 = vmatpush3.bf16.msra.mxu0 %v7099_v22 }
  0x51   :  { %6277 = vmatprep.subr.bf16.mxu0 %v7452_v0 }
  0x52   :  { %6296 = vmatpush3.bf16.msra.mxu1 %v7118_v33  ;;  %v7143_v33 = vld [vmem:[#allocation4 + $0x208] sm:$0xff]  }
  0x53   :  { %6297 = vmatprep.subr.bf16.mxu1 %v7452_v0 }
  0x54   :  { %6278 = vmatpush3.bf16.msra.mxu0 %v7100_v25  ;;  %v7137_v25 = vld [vmem:[#allocation4 + $0x238] sm:$0xff]  }
  0x55   :  { %6279 = vmatprep.subr.bf16.mxu0 %v7452_v0 }
  0x56   :  { %6298 = vmatpush3.bf16.msra.mxu1 %v7120_v36  ;;  %v7661_v36 = vand.u32 127, %v80_v35 }
  0x57   :  { %6299 = vmatprep.subr.bf16.mxu1 %v7452_v0 }
  0x58   :  { %6280 = vmatpush3.bf16.msra.mxu0 %v7101_v27 }
  0x59   :  { %6281 = vmatprep.subr.bf16.mxu0 %v7452_v0 }
  0x5a   :  { %6300 = vmatpush3.bf16.msra.mxu1 %v7122_v39 }
  0x5b   :  { %6301 = vmatprep.subr.bf16.mxu1 %v7452_v0 }
  0x5c   :  { %6282 = vmatpush3.bf16.msra.mxu0 %v7102_v30  ;;  %v7140_v30 = vld [vmem:[#allocation4 + $0x220] sm:$0xff]  }
  0x5d   :  { %6283 = vmatprep.subr.bf16.mxu0 %v7452_v0 }
  0x5e   :  { %6302 = vmatpush3.bf16.msra.mxu1 %v7124_v41 }
  0x5f   :  { %6303 = vmatprep.subr.bf16.mxu1 %v7452_v0 }
  0x60   :  { %6284 = vmatpush3.bf16.msra.mxu0 %v7103_v32  ;;  %v7142_v32 = vld [vmem:[#allocation4 + $0x210] sm:$0xff]  }
  0x61   :  { %6285 = vmatprep.subr.bf16.mxu0 %v7452_v0 }
  0x62   :  { %6304 = vmatpush3.bf16.msra.mxu1 %v7126_v47 }
  0x63   :  { %6305 = vmatprep.subr.bf16.mxu1 %v7452_v0 }
  0x64   :  { %6286 = vmatpush3.bf16.msra.mxu0 %v7104_v34  ;;  %v7144_v34 = vld [vmem:[#allocation4 + $0x200] sm:$0xff]  }
  0x65   :  { %6311 = vmatprep.subr.bf16.mxu0 %v7452_v0 }
  0x66   :  { %6306 = vmatpush3.bf16.msra.mxu1 %v7128_v49 }
  0x67   :  { %6288 = vmatmul.mubr.bf16.vlgmr.msra.gmra.mxu0 %v432_v38  ;;  %6331 = vmatprep.subr.mxu1 %v7452_v0 }
  0x68   :  { %6312 = vmatpush3.bf16.msra.mxu0 %v7113_v37  ;;  %6327 = vmatprep.mubr.msk.bf16.mxu0 %vm7453_vm0, %v7452_v0 }
  0x69   :  { %6313 = vmatprep.subr.bf16.mxu0 %v7452_v0 }
  0x6c   :  { %6314 = vmatpush3.bf16.msra.mxu0 %v7115_v40 }
  0x6d   :  { %6315 = vmatprep.subr.bf16.mxu0 %v7452_v0 }
  0x70   :  { %6316 = vmatpush3.bf16.msra.mxu0 %v7117_v42  ;;  %v7145_v42 = vld [vmem:[#allocation4 + $0x178] sm:$0xff]  }
  0x71   :  { %6317 = vmatprep.subr.bf16.mxu0 %v7452_v0 }
  0x74   :  { %6318 = vmatpush3.bf16.msra.mxu0 %v7119_v43 }
  0x75   :  { %6319 = vmatprep.subr.bf16.mxu0 %v7452_v0 }
  0x78   :  { %6320 = vmatpush3.bf16.msra.mxu0 %v7121_v44 }
  0x79   :  { %6321 = vmatprep.subr.bf16.mxu0 %v7452_v0 }
  0x7c   :  { %6322 = vmatpush3.bf16.msra.mxu0 %v7123_v45 }
  0x7d   :  { %6323 = vmatprep.subr.bf16.mxu0 %v7452_v0 }
  0x80   :  { %6324 = vmatpush3.bf16.msra.mxu0 %v7125_v46 }
  0x81   :  { %6325 = vmatprep.subr.bf16.mxu0 %v7452_v0 }
  0x84   :  { %6326 = vmatpush3.bf16.msra.mxu0 %v7127_v48 }
  0x85   :  { %6373 = vmatprep.subr.bf16.mxu0 %v7452_v0 }
  0xb2   :  { %v108_v37 = vpop.permute.xlu0 %107 }
  0xb3   :  { %vm115_vm3 = vcmp.eq.s32.totalorder %v108_v37, %v7661_v36  ;;  %v114_v46 = vpop.permute.xlu1 %113  ;;  %v7155_v37 = vld [vmem:[#allocation4 + $0x1e8] sm:$0xff]  }
  0xb4   :  { %v7665_v39 = vsel %vm115_vm3, 1.0, %v7452_v0  ;;  %vm117_vm6 = vcmp.eq.s32.totalorder %v114_v46, %v7661_v36 }
  0xb5   :  { %v7680_v53 = vsel %vm117_vm6, 1.0, %v7452_v0 }
  0xb6   :  { %v111_v43 = vpop.permute.xlu0 %110 }
  0xb7   :  { %vm116_vm5 = vcmp.eq.s32.totalorder %v111_v43, %v7661_v36  ;;  %v87_v54 = vpop.permute.xlu1 %86  ;;  %v7160_v43 = vld [vmem:[#allocation4 + $0x1c0] sm:$0xff]  }
  0xb8   :  { %v7675_v49 = vsel %vm116_vm5, 1.0, %v7452_v0  ;;  %vm94_vm7 = vcmp.eq.s32.totalorder %v87_v54, %v7661_v36 }
  0xb9   :  { %v7691_v59 = vsel %vm94_vm7, 1.0, %v7452_v0 }
  0xba   :  { %v90_v58 = vpop.permute.xlu0 %89 }
  0xbb   :  { %vm95_vm8 = vcmp.eq.s32.totalorder %v90_v58, %v7661_v36 }
 0x107   :  { %v289_v62 = vpop.f32.mrf.mxu0 }
 0x108   :  { %v290_v63 = vadd.f32 %v5505_v61, %v289_v62  ;;  %v7147_v62 = vld [vmem:[#allocation4 + $0x168] sm:$0xff]  }
 0x109   :  { %v6249_v1 = vpop.f32.mrf.mxu0  ;;  %v7631_v11 = vpop.f32.mrf.mxu1 }
 0x10a   :  { %vm295_vm1 = vcmp.gt.f32.partialorder %v290_v63, 0.0  ;;  %v296_v2 = vmul.f32 0.01, %v290_v63  ;;  %v93_v1 = vpop.permute.xlu1 %92 }
 0x10b   :  { %v292_v3 = vpop.f32.mrf.mxu0  ;;  %v7633_v12 = vpop.f32.mrf.mxu1  ;;  %vm96_vm11 = vcmp.eq.s32.totalorder %v93_v1, %v7661_v36 }
 0x10c   :  { %v7616_v4 = vsel %vm295_vm1, %v290_v63, %v296_v2  ;;  %v409_v55 = vadd.f32 %v5514_v52, %v7633_v12  ;;  %v7699_v63 = vsel %vm95_vm8, 1.0, %v7452_v0  ;;  %v7151_v12 = vld [vmem:[#allocation4 + $0x148] sm:$0xff]  }
 0x10d   :  { %v7620_v6 = vpack.c.bf16 %v7616_v4, %v7616_v4  ;;  %v6250_v7 = vpop.f32.mrf.mxu0  ;;  %v6270_v14 = vpop.f32.mrf.mxu1 }
 0x10e   :  { %v425_v60 = vmul.f32 0.01, %v409_v55  ;;  %vm422_vm9 = vcmp.gt.f32.partialorder %v409_v55, 0.0  ;;  %v7711_v7 = vsel %vm96_vm11, 1.0, %v7452_v0  ;;  %v417_v14 = vadd.f32 %v7631_v11, %v5514_v52  ;;  %v129_v11 = vpop.permute.xlu0 %128 }
 0x10f   :  { %6308 = vmatmul.mubr.bf16.vlgmr.msra.gmra.mxu1 %v7620_v6  ;;  %6328 = vmatmul.mubr.bf16.vlgmr.msra.gmra.mxu0 %v7620_v6  ;;  %v411_v38 = vpop.f32.mrf.mxu1  ;;  %vm136_vm14 = vcmp.eq.s32.totalorder %v129_v11, %v7661_v36  ;;  %vm162_vm11 = vcmask 195584  }
 0x110   :  { %6374 = vmatpush3.bf16.msra.mxu0 %v7129_v5  ;;  %6389 = vmatprep.mubr.msk.bf16.mxu0 %vm7453_vm0, %v7452_v0  ;;  %v412_v56 = vadd.f32 %v5514_v52, %v411_v38  ;;  %v7704_v2 = vsel %vm422_vm9, %v409_v55, %v425_v60  ;;  %v7148_v5 = vld [vmem:[#allocation4 + $0x160] sm:$0xff]   ;;  %vm424_vm12 = vcmp.gt.f32.partialorder %v417_v14, 0.0 }
 0x111   :  { %6375 = vmatprep.subr.bf16.mxu0 %v7452_v0  ;;  %6333 = vmatprep.mubr.msk.f32.mxu1 %vm7453_vm0, %v7452_v0  ;;  %v7156_v38 = vld [vmem:[#allocation4 + $0x1e0] sm:$0xff]  }
 0x112   :  { %v426_v61 = vmul.f32 0.01, %v412_v56  ;;  %vm423_vm10 = vcmp.gt.f32.partialorder %v412_v56, 0.0 }
 0x114   :  { %6376 = vmatpush3.bf16.msra.mxu0 %v7130_v8  ;;  %v7706_v3 = vsel %vm423_vm10, %v412_v56, %v426_v61 }
 0x115   :  { %6377 = vmatprep.subr.bf16.mxu0 %v7452_v0  ;;  %v939_v8 = vpack.c.bf16 %v7706_v3, %v7704_v2 }
 0x118   :  { %6378 = vmatpush3.bf16.msra.mxu0 %v7131_v9  ;;  %v7149_v9 = vld [vmem:[#allocation4 + $0x158] sm:$0xff]  }
 0x119   :  { %6379 = vmatprep.subr.bf16.mxu0 %v7452_v0 }
 0x11c   :  { %6380 = vmatpush3.bf16.msra.mxu0 %v7132_v10  ;;  %v7150_v10 = vld [vmem:[#allocation4 + $0x150] sm:$0xff]  }
 0x11d   :  { %6381 = vmatprep.subr.bf16.mxu0 %v7452_v0 }
 0x120   :  { %6382 = vmatpush3.bf16.msra.mxu0 %v7133_v13 }
 0x121   :  { %6383 = vmatprep.subr.bf16.mxu0 %v7452_v0 }
 0x124   :  { %6384 = vmatpush3.bf16.msra.mxu0 %v7134_v15 }
 0x125   :  { %6385 = vmatprep.subr.bf16.mxu0 %v7452_v0 }
 0x127   :  { %v540_v18 = vpop.f32.mrf.mxu0 }
 0x128   :  { %v541_v19 = vadd.f32 %v5523_v17, %v540_v18  ;;  %6386 = vmatpush3.bf16.msra.mxu0 %v7135_v16  ;;  %v7152_v16 = vld [vmem:[#allocation4 + $0x140] sm:$0xff]   ;;  %v427_v18 = vmul.f32 0.01, %v417_v14 }
 0x129   :  { %6387 = vmatprep.subr.bf16.mxu0 %v7452_v0  ;;  %v6289_v21 = vpop.f32.mrf.mxu0 }
 0x12a   :  { %vm546_vm2 = vcmp.gt.f32.partialorder %v541_v19, 0.0  ;;  %v547_v22 = vmul.f32 0.01, %v541_v19 }
 0x12b   :  { %v543_v23 = vpop.f32.mrf.mxu0 }
 0x12c   :  { %v7639_v24 = vsel %vm546_vm2, %v541_v19, %v547_v22  ;;  %6388 = vmatpush3.bf16.msra.mxu0 %v7136_v20  ;;  %v7718_v20 = vsel %vm424_vm12, %v417_v14, %v427_v18  ;;  %v132_v22 = vpop.permute.xlu1 %131  ;;  %v7728_v23 = vsel %vm136_vm14, 1.0, %v7452_v0 }
 0x12d   :  { %v7643_v26 = vpack.c.bf16 %v7639_v24, %v7639_v24  ;;  %6424 = vmatprep.subr.bf16.mxu0 %v7452_v0  ;;  %v6290_v27 = vpop.f32.mrf.mxu0  ;;  %v940_v21 = vpack.c.bf16 %v7718_v20, %v7718_v20  ;;  %vm137_vm1 = vcmp.eq.s32.totalorder %v132_v22, %v7661_v36 }
 0x12e   :  { %v7736_v27 = vsel %vm137_vm1, 1.0, %v7452_v0 }
 0x12f   :  { %6390 = vmatmul.mubr.bf16.vlgmr.msra.gmra.mxu0 %v7643_v26 }
 0x130   :  { %6425 = vmatpush3.bf16.msra.mxu0 %v7137_v25  ;;  %6440 = vmatprep.mubr.msk.bf16.mxu0 %vm7453_vm0, %v7452_v0  ;;  %v135_v25 = vpop.permute.xlu0 %134 }
 0x131   :  { %6426 = vmatprep.subr.bf16.mxu0 %v7452_v0  ;;  %vm138_vm2 = vcmp.eq.s32.totalorder %v135_v25, %v7661_v36 }
 0x134   :  { %6427 = vmatpush3.bf16.msra.mxu0 %v7138_v28  ;;  %v7744_v28 = vsel %vm138_vm2, 1.0, %v7452_v0  ;;  %vm175_vm2 = vcmask 58368  }
 0x135   :  { %6428 = vmatprep.subr.bf16.mxu0 %v7452_v0 }
 0x138   :  { %6429 = vmatpush3.bf16.msra.mxu0 %v7139_v29 }
 0x139   :  { %6430 = vmatprep.subr.bf16.mxu0 %v7452_v0 }
 0x13c   :  { %6431 = vmatpush3.bf16.msra.mxu0 %v7140_v30 }
 0x13d   :  { %6432 = vmatprep.subr.bf16.mxu0 %v7452_v0 }
 0x140   :  { %6433 = vmatpush3.bf16.msra.mxu0 %v7141_v31 }
 0x141   :  { %6434 = vmatprep.subr.bf16.mxu0 %v7452_v0 }
 0x144   :  { %6435 = vmatpush3.bf16.msra.mxu0 %v7142_v32 }
 0x145   :  { %6436 = vmatprep.subr.bf16.mxu0 %v7452_v0 }
 0x148   :  { %6437 = vmatpush3.bf16.msra.mxu0 %v7143_v33  ;;  %v7153_v33 = vld [vmem:[#allocation4 + $0x1f8] sm:$0xff]  }
 0x149   :  { %6438 = vmatprep.subr.bf16.mxu0 %v7452_v0 }
 0x14c   :  { %6439 = vmatpush3.bf16.msra.mxu0 %v7144_v34  ;;  %v7154_v34 = vld [vmem:[#allocation4 + $0x1f0] sm:$0xff]  }
 0x14d   :  { %6464 = vmatprep.subr.mxu0 %v7452_v0 }
 0x14f   :  { %6441 = vmatmul.mubr.bf16.vlgmr.msra.gmra.mxu0 %v7620_v6 }
 0x150   :  { %6466 = vmatprep.mubr.msk.f32.mxu0 %vm7453_vm0, %v7452_v0 }
 0x1cf   :  { %v649_v40 = vpop.f32.mrf.mxu1  ;;  %v754_v41 = vpop.f32.mrf.mxu0 }
 0x1d0   :  { %6332 = vmatpush3.msra.mxu1 %v754_v41  ;;  %v7158_v41 = vld [vmem:[#allocation4 + $0x1d0] sm:$0xff]  }
 0x1d1   :  { %v6309_v44 = vpop.f32.mrf.mxu1  ;;  %v6329_v45 = vpop.f32.mrf.mxu0  ;;  %6334 = vmatmul.mubr.msk.f32.vlgmr.msra.gmra.mxu1 %vm760_vm4, %v7665_v39  ;;  %6342 = vmatprep.subr.mxu1 %v7452_v0 }
 0x1d2   :  { %6343 = vmatpush3.msra.mxu1 %v649_v40  ;;  %6336 = vmatprep.mubr.msk.f32.mxu1 %vm7453_vm0, %v7452_v0  ;;  %v7157_v40 = vld [vmem:[#allocation4 + $0x1d8] sm:$0xff]  }
 0x1d3   :  { %v652_v47 = vpop.f32.mrf.mxu1  ;;  %v757_v48 = vpop.f32.mrf.mxu0  ;;  %6353 = vmatprep.subr.bf16.mxu1 %v7145_v42  ;;  %v7161_v44 = vld [vmem:[#allocation4 + $0x278] sm:$0xff]  }
 0x1d5   :  { %v6310_v50 = vpop.f32.mrf.mxu1  ;;  %v6330_v51 = vpop.f32.mrf.mxu0  ;;  %6337 = vmatmul.mubr.msk.f32.gmra.mxu1 %vm760_vm4, %v7675_v49 }
 0x1d6   :  { %6339 = vmatprep.mubr.msk.f32.mxu1 %vm7453_vm0, %v7452_v0 }
 0x1d9   :  { %6340 = vmatmul.mubr.msk.f32.gmra.mxu1 %vm760_vm4, %v7680_v53 }
 0x1da   :  { %6344 = vmatprep.mubr.msk.f32.mxu1 %vm7453_vm0, %v7452_v0 }
 0x1dd   :  { %6345 = vmatmul.mubr.msk.f32.vlgmr.msra.gmra.mxu1 %vm760_vm4, %v7691_v59 }
 0x1de   :  { %6354 = vmatpush3.bf16.msra.mxu1 %v7145_v42  ;;  %6347 = vmatprep.mubr.msk.f32.mxu1 %vm7453_vm0, %v7452_v0  ;;  %v7159_v42 = vld [vmem:[#allocation4 + $0x1c8] sm:$0xff]  }
 0x1df   :  { %6355 = vmatprep.subr.bf16.mxu1 %v7146_v57 }
 0x1e1   :  { %6348 = vmatmul.mubr.msk.f32.gmra.mxu1 %vm760_vm4, %v7699_v63 }
 0x1e2   :  { %6356 = vmatpush3.bf16.msra.mxu1 %v7146_v57  ;;  %6350 = vmatprep.mubr.msk.f32.mxu1 %vm7453_vm0, %v7452_v0 }
 0x1e3   :  { %6357 = vmatprep.subr.bf16.mxu1 %v7147_v62 }
 0x1e5   :  { %6351 = vmatmul.mubr.msk.f32.gmra.mxu1 %vm760_vm4, %v7711_v7 }
 0x1e6   :  { %6358 = vmatpush3.bf16.msra.mxu1 %v7147_v62  ;;  %6369 = vmatprep.mubr.bf16.mxu1 %v939_v8 }
 0x1e7   :  { %6359 = vmatprep.subr.bf16.mxu1 %v7148_v5 }
 0x1ea   :  { %6360 = vmatpush3.bf16.msra.mxu1 %v7148_v5 }
 0x1eb   :  { %6361 = vmatprep.subr.bf16.mxu1 %v7149_v9 }
 0x1ee   :  { %6362 = vmatpush3.bf16.msra.mxu1 %v7149_v9 }
 0x1ef   :  { %6363 = vmatprep.subr.bf16.mxu1 %v7150_v10  ;;  %v1157_v13 = vpop.f32.mrf.mxu0 }
 0x1f1   :  { %v6391_v15 = vpop.f32.mrf.mxu0 }
 0x1f2   :  { %6364 = vmatpush3.bf16.msra.mxu1 %v7150_v10  ;;  %v5574_v10 = vld [vmem:[#allocation6 + $0x3] ss:$0 sm:$0xff] }
 0x1f3   :  { %6365 = vmatprep.subr.bf16.mxu1 %v7151_v12  ;;  %v1160_v17 = vpop.f32.mrf.mxu0 }
 0x1f5   :  { %v6392_v19 = vpop.f32.mrf.mxu0 }
 0x1f6   :  { %6366 = vmatpush3.bf16.msra.mxu1 %v7151_v12 }
 0x1f7   :  { %6367 = vmatprep.subr.bf16.mxu1 %v7152_v16 }
 0x1fa   :  { %6368 = vmatpush3.bf16.msra.mxu1 %v7152_v16 }
 0x1fb   :  { %6393 = vmatprep.subr.mxu1 %v7452_v0 }
 0x1fd   :  { %6370 = vmatmul.mubr.bf16.vlgmr.msra.gmra.mxu1 %v940_v21 }
 0x1fe   :  { %6394 = vmatpush3.msk.msra.mxu1 %vm1173_vm13, %v1157_v13  ;;  %6395 = vmatprep.mubr.msk.f32.mxu1 %vm7453_vm0, %v7452_v0 }
 0x1ff   :  { %6404 = vmatprep.subr.bf16.mxu1 %v7153_v33 }
 0x205   :  { %6396 = vmatmul.mubr.msk.f32.vlgmr.msra.gmra.mxu1 %vm1163_vm15, %v7728_v23 }
 0x206   :  { %6398 = vmatprep.mubr.msk.f32.mxu1 %vm7453_vm0, %v7452_v0  ;;  %6405 = vmatpush3.bf16.msra.mxu1 %v7153_v33 }
 0x207   :  { %6406 = vmatprep.subr.bf16.mxu1 %v7154_v34 }
 0x209   :  { %6399 = vmatmul.mubr.msk.f32.gmra.mxu1 %vm1163_vm15, %v7736_v27 }
 0x20a   :  { %6401 = vmatprep.mubr.msk.f32.mxu1 %vm7453_vm0, %v7452_v0  ;;  %6407 = vmatpush3.bf16.msra.mxu1 %v7154_v34 }
 0x20b   :  { %6408 = vmatprep.subr.bf16.mxu1 %v7155_v37 }
 0x20d   :  { %6402 = vmatmul.mubr.msk.f32.gmra.mxu1 %vm1163_vm15, %v7744_v28 }
 0x20e   :  { %6409 = vmatpush3.bf16.msra.mxu1 %v7155_v37 }
 0x20f   :  { %v1502_v29 = vpop.f32.mrf.mxu0  ;;  %6410 = vmatprep.subr.bf16.mxu1 %v7156_v38 }
 0x210   :  { %6465 = vmatpush3.msra.mxu0 %v1502_v29 }
 0x211   :  { %v6442_v30 = vpop.f32.mrf.mxu0  ;;  %6467 = vmatmul.mubr.msk.f32.vlgmr.msra.gmra.mxu0 %vm760_vm4, %v7691_v59 }
 0x212   :  { %6469 = vmatprep.mubr.msk.f32.mxu0 %vm7453_vm0, %v7452_v0  ;;  %6411 = vmatpush3.bf16.msra.mxu1 %v7156_v38 }
 0x213   :  { %v1505_v31 = vpop.f32.mrf.mxu0  ;;  %6412 = vmatprep.subr.bf16.mxu1 %v7157_v40 }
 0x215   :  { %v6443_v32 = vpop.f32.mrf.mxu0  ;;  %6470 = vmatmul.mubr.msk.f32.gmra.mxu0 %vm760_vm4, %v7699_v63 }
 0x216   :  { %6472 = vmatprep.mubr.msk.f32.mxu0 %vm7453_vm0, %v7452_v0  ;;  %6413 = vmatpush3.bf16.msra.mxu1 %v7157_v40 }
 0x217   :  { %6414 = vmatprep.subr.bf16.mxu1 %v7158_v41 }
 0x219   :  { %6473 = vmatmul.mubr.msk.f32.gmra.mxu0 %vm760_vm4, %v7711_v7 }
 0x21a   :  { %6415 = vmatpush3.bf16.msra.mxu1 %v7158_v41 }
 0x21b   :  { %6416 = vmatprep.subr.bf16.mxu1 %v7159_v42 }
 0x21e   :  { %6417 = vmatpush3.bf16.msra.mxu1 %v7159_v42 }
 0x21f   :  { %6418 = vmatprep.subr.bf16.mxu1 %v7160_v43 }
 0x222   :  { %6419 = vmatpush3.bf16.msra.mxu1 %v7160_v43 }
 0x223   :  { %6444 = vmatprep.subr.bf16.mxu1 %v7161_v44 }
 0x291   :  { %v836_v45 = vpop.f32.mrf.mxu1 }
 0x293   :  { %v6335_v46 = vpop.f32.mrf.mxu1 }
 0x295   :  { %v841_v47 = vpop.f32.mrf.mxu1 }
 0x297   :  { %v6338_v48 = vpop.f32.mrf.mxu1 }
 0x299   :  { %v846_v50 = vpop.f32.mrf.mxu1 }
 0x29b   :  { %v6341_v51 = vpop.f32.mrf.mxu1 }
 0x29c   :  { %v7163_v51 = vld [vmem:[#allocation4 + $0x268] sm:$0xff]  }
 0x29d   :  { %v925_v52 = vpop.f32.mrf.mxu1 }
 0x29e   :  { %v926_v1 = vadd.f32 %v925_v52, %v836_v45 }
 0x29f   :  { %v6346_v54 = vpop.f32.mrf.mxu1 }
 0x2a0   :  { %v7164_v54 = vld [vmem:[#allocation4 + $0x260] sm:$0xff]  }
 0x2a1   :  { %v930_v55 = vpop.f32.mrf.mxu1 }
 0x2a2   :  { %v931_v12 = vadd.f32 %v930_v55, %v841_v47  ;;  %v7162_v47 = vld [vmem:[#allocation4 + $0x270] sm:$0xff]   ;;  %v7165_v55 = vld [vmem:[#allocation4 + $0x258] sm:$0xff]  }
 0x2a3   :  { %v6349_v56 = vpop.f32.mrf.mxu1 }
 0x2a4   :  { %v7166_v56 = vld [vmem:[#allocation4 + $0x250] sm:$0xff]  }
 0x2a5   :  { %v935_v57 = vpop.f32.mrf.mxu1 }
 0x2a6   :  { %v936_v18 = vadd.f32 %v935_v57, %v846_v50  ;;  %v7167_v57 = vld [vmem:[#allocation4 + $0x248] sm:$0xff]  }
 0x2a7   :  { %v6352_v58 = vpop.f32.mrf.mxu1 }
 0x2a8   :  { %v7169_v58 = vld [vmem:[#allocation4 + $0x2b8] sm:$0xff]  }
 0x2a9   :  { %6475 = vmatprep.subr.bf16.mxu0 %v7169_v58 }
 0x2aa   :  { %6476 = vmatpush3.bf16.msra.mxu0 %v7169_v58  ;;  %v7792_v58 = vshrl.u32 %v80_v35, 7 }
 0x2bd   :  { %v6371_v60 = vpop.f32.mrf.mxu1 }
 0x2be   :  { %v1056_v11 = vadd.f32 %v6371_v60, %v936_v18  ;;  %v7170_v60 = vld [vmem:[#allocation4 + $0x2b0] sm:$0xff]  }
 0x2bf   :  { %v1040_v61 = vpop.f32.mrf.mxu1  ;;  %6477 = vmatprep.subr.bf16.mxu0 %v7170_v60  ;;  %v7174_v18 = vld [vmem:[#allocation4 + $0x290] sm:$0xff]  }
 0x2c0   :  { %v1054_v8 = vadd.f32 %v1040_v61, %v926_v1  ;;  %v7171_v61 = vld [vmem:[#allocation4 + $0x2a8] sm:$0xff]   ;;  %6478 = vmatpush3.bf16.msra.mxu0 %v7170_v60  ;;  %v5501_v60 = vld [vmem:[%s8178_s5] ss:$0 sm:$0xff] }
 0x2c1   :  { %v6372_v62 = vpop.f32.mrf.mxu1  ;;  %6479 = vmatprep.subr.bf16.mxu0 %v7171_v61  ;;  %vm159_vm10 = vcmp.eq.s32.totalorder %v5501_v60, %v7792_v58  ;;  %v7201_v60 = vld [vmem:[#allocation4 + $0x3b8] sm:$0xff]  }
 0x2c2   :  { %v7172_v62 = vld [vmem:[#allocation4 + $0x2a0] sm:$0xff]  }
 0x2c3   :  { %v1043_v5 = vpop.f32.mrf.mxu1 }
 0x2c4   :  { %v1055_v15 = vadd.f32 %v1043_v5, %v931_v12  ;;  %6480 = vmatpush3.bf16.msra.mxu0 %v7171_v61  ;;  %v7799_v61 = vsel %vm159_vm10, 1.0, %v7452_v0 }
 0x2c5   :  { %v1243_v9 = vpop.f32.mrf.mxu1  ;;  %6481 = vmatprep.subr.bf16.mxu0 %v7172_v62 }
 0x2c6   :  { %v1257_v13 = vadd.f32 %v1243_v9, %v1054_v8  ;;  %v5575_v8 = vld [vmem:[#allocation6 + $0x4] ss:$0 sm:$0xff] }
 0x2c7   :  { %v6397_v14 = vpop.f32.mrf.mxu1 }
 0x2c8   :  { %v1268_v16 = vadd.f32 %v5574_v10, %v1257_v13  ;;  %6482 = vmatpush3.bf16.msra.mxu0 %v7172_v62  ;;  %v163_v62 = vsel %vm162_vm11, %v7799_v61, 0.0 }
 0x2c9   :  { %v1248_v17 = vpop.f32.mrf.mxu1  ;;  %164 = vadd.xlane.f32.xlu1 %v163_v62 }
 0x2ca   :  { %v1258_v19 = vadd.f32 %v1248_v17, %v1055_v15  ;;  %v1274_v22 = vmul.f32 0.01, %v1268_v16  ;;  %vm1271_vm3 = vcmp.gt.f32.partialorder %v1268_v16, 0.0  ;;  %v7173_v17 = vld [vmem:[#allocation4 + $0x298] sm:$0xff]  }
 0x2cb   :  { %v6400_v21 = vpop.f32.mrf.mxu1  ;;  %6483 = vmatprep.subr.bf16.mxu0 %v7173_v17 }
 0x2cc   :  { %v1269_v25 = vadd.f32 %v5574_v10, %v1258_v19  ;;  %v1277_v34 = vsel %vm1271_vm3, %v1268_v16, %v1274_v22  ;;  %6484 = vmatpush3.bf16.msra.mxu0 %v7173_v17  ;;  %v7175_v19 = vld [vmem:[#allocation4 + $0x288] sm:$0xff]   ;;  %v7176_v21 = vld [vmem:[#allocation4 + $0x280] sm:$0xff]   ;;  %v7186_v17 = vld [vmem:[#allocation4 + $0x330] sm:$0xff]  }
 0x2cd   :  { %v1253_v29 = vpop.f32.mrf.mxu1  ;;  %6485 = vmatprep.subr.bf16.mxu0 %v7174_v18 }
 0x2ce   :  { %vm1272_vm5 = vcmp.gt.f32.partialorder %v1269_v25, 0.0  ;;  %v1275_v30 = vmul.f32 0.01, %v1269_v25  ;;  %v1259_v31 = vadd.f32 %v1253_v29, %v1056_v11 }
 0x2cf   :  { %v6403_v32 = vpop.f32.mrf.mxu1 }
 0x2d0   :  { %v1270_v33 = vadd.f32 %v5574_v10, %v1259_v31  ;;  %v1278_v37 = vsel %vm1272_vm5, %v1269_v25, %v1275_v30  ;;  %6486 = vmatpush3.bf16.msra.mxu0 %v7174_v18  ;;  %v5603_v25 = vld [vmem:[#allocation6 + $0x5] ss:$0 sm:$0xff]  ;;  %v7187_v18 = vld [vmem:[#allocation4 + $0x328] sm:$0xff]  }
 0x2d1   :  { %v7758_v38 = vpop.f32.mrf.mxu0  ;;  %v1280_v40 = vpack.c.bf16 %v1278_v37, %v1277_v34  ;;  %6487 = vmatprep.subr.bf16.mxu0 %v7175_v19 }
 0x2d2   :  { %vm1273_vm6 = vcmp.gt.f32.partialorder %v1270_v33, 0.0  ;;  %v1276_v41 = vmul.f32 0.01, %v1270_v33 }
 0x2d3   :  { %6420 = vmatprep.mubr.bf16.mxu1 %v1280_v40  ;;  %v6468_v42 = vpop.f32.mrf.mxu0 }
 0x2d4   :  { %v1279_v43 = vsel %vm1273_vm6, %v1270_v33, %v1276_v41  ;;  %6488 = vmatpush3.bf16.msra.mxu0 %v7175_v19  ;;  %v7188_v19 = vld [vmem:[#allocation4 + $0x320] sm:$0xff]  }
 0x2d5   :  { %v1281_v45 = vpack.c.bf16 %v1279_v43, %v1279_v43  ;;  %v7760_v46 = vpop.f32.mrf.mxu0  ;;  %6489 = vmatprep.subr.bf16.mxu0 %v7176_v21 }
 0x2d7   :  { %6421 = vmatmul.mubr.bf16.vlgmr.msra.gmra.mxu1 %v1281_v45  ;;  %v6471_v48 = vpop.f32.mrf.mxu0 }
 0x2d8   :  { %6445 = vmatpush3.bf16.msra.mxu1 %v7161_v44  ;;  %v7168_v44 = vld [vmem:[#allocation4 + $0x240] sm:$0xff]   ;;  %6490 = vmatpush3.bf16.msra.mxu0 %v7176_v21  ;;  %v7189_v21 = vld [vmem:[#allocation4 + $0x318] sm:$0xff]  }
 0x2d9   :  { %v1699_v50 = vpop.f32.mrf.mxu0  ;;  %6446 = vmatprep.subr.bf16.mxu1 %v7162_v47  ;;  %6524 = vmatprep.subr.bf16.mxu0 %v7452_v0 }
 0x2db   :  { %v6474_v52 = vpop.f32.mrf.mxu0 }
 0x2dc   :  { %6447 = vmatpush3.bf16.msra.mxu1 %v7162_v47 }
 0x2dd   :  { %6448 = vmatprep.subr.bf16.mxu1 %v7163_v51 }
 0x2e0   :  { %6449 = vmatpush3.bf16.msra.mxu1 %v7163_v51  ;;  %v7177_v51 = vld [vmem:[#allocation4 + $0x2f8] sm:$0xff]  }
 0x2e1   :  { %6450 = vmatprep.subr.bf16.mxu1 %v7164_v54 }
 0x2e4   :  { %6451 = vmatpush3.bf16.msra.mxu1 %v7164_v54  ;;  %v7180_v54 = vld [vmem:[#allocation4 + $0x2e0] sm:$0xff]  }
 0x2e5   :  { %6452 = vmatprep.subr.bf16.mxu1 %v7165_v55 }
 0x2e8   :  { %6453 = vmatpush3.bf16.msra.mxu1 %v7165_v55  ;;  %v7181_v55 = vld [vmem:[#allocation4 + $0x2d8] sm:$0xff]  }
 0x2e9   :  { %6454 = vmatprep.subr.bf16.mxu1 %v7166_v56 }
 0x2ec   :  { %6455 = vmatpush3.bf16.msra.mxu1 %v7166_v56  ;;  %v7182_v56 = vld [vmem:[#allocation4 + $0x2d0] sm:$0xff]  }
 0x2ed   :  { %6456 = vmatprep.subr.bf16.mxu1 %v7167_v57 }
 0x2f0   :  { %6457 = vmatpush3.bf16.msra.mxu1 %v7167_v57  ;;  %v7183_v57 = vld [vmem:[#allocation4 + $0x2c8] sm:$0xff]  }
 0x2f1   :  { %6458 = vmatprep.subr.bf16.mxu1 %v7168_v44 }
 0x2f4   :  { %6459 = vmatpush3.bf16.msra.mxu1 %v7168_v44  ;;  %v7184_v44 = vld [vmem:[#allocation4 + $0x2c0] sm:$0xff]  }
 0x2f5   :  { %6495 = vmatprep.subr.mxu1 %v7452_v0 }
 0x397   :  { %v6422_v1 = vpop.f32.mrf.mxu1 }
 0x398   :  { %v7763_v10 = vadd.f32 %v6422_v1, %v5575_v8 }
 0x399   :  { %v1389_v5 = vpop.f32.mrf.mxu1 }
 0x39a   :  { %v7765_v13 = vadd.f32 %v5575_v8, %v1389_v5  ;;  %v1509_v16 = vpack.c.bf16 %v7763_v10, %v7763_v10 }
 0x39b   :  { %v6423_v9 = vpop.f32.mrf.mxu1 }
 0x39d   :  { %v1392_v12 = vpop.f32.mrf.mxu1 }
 0x39e   :  { %v7767_v14 = vadd.f32 %v5575_v8, %v1392_v12 }
 0x3a0   :  { %v1508_v15 = vpack.c.bf16 %v7767_v14, %v7765_v13 }
 0x3a2   :  { %6460 = vmatprep.mubr.bf16.mxu1 %v1508_v15 }
 0x3a3   :  { %6461 = vmatmul.mubr.bf16.vlgmr.msra.gmra.mxu1 %v1509_v16  ;;  %v7185_v16 = vld [vmem:[#allocation4 + $0x338] sm:$0xff]  }
 0x3a4   :  { %6501 = vmatprep.mubr.msk.f32.mxu1 %vm7453_vm0, %v7452_v0 }
 0x463   :  { %v6462_v11 = vpop.f32.mrf.mxu1 }
 0x464   :  { %v1700_v22 = vadd.f32 %v6462_v11, %v1699_v50  ;;  %v7190_v11 = vld [vmem:[#allocation4 + $0x310] sm:$0xff]  }
 0x465   :  { %v1609_v29 = vpop.f32.mrf.mxu1 }
 0x466   :  { %v1690_v30 = vadd.f32 %v7758_v38, %v1609_v29  ;;  %v1713_v31 = vadd.f32 %v5603_v25, %v1700_v22  ;;  %v7178_v38 = vld [vmem:[#allocation4 + $0x2f0] sm:$0xff]  }
 0x467   :  { %v6463_v32 = vpop.f32.mrf.mxu1 }
 0x468   :  { %v1711_v33 = vadd.f32 %v5603_v25, %v1690_v30  ;;  %v1719_v40 = vmul.f32 0.01, %v1713_v31  ;;  %vm1716_vm7 = vcmp.gt.f32.partialorder %v1713_v31, 0.0  ;;  %v7192_v32 = vld [vmem:[#allocation4 + $0x300] sm:$0xff]  }
 0x469   :  { %v1612_v34 = vpop.f32.mrf.mxu1 }
 0x46a   :  { %v1695_v37 = vadd.f32 %v7760_v46, %v1612_v34  ;;  %v1717_v41 = vmul.f32 0.01, %v1711_v33  ;;  %vm1714_vm8 = vcmp.gt.f32.partialorder %v1711_v33, 0.0  ;;  %v1722_v45 = vsel %vm1716_vm7, %v1713_v31, %v1719_v40  ;;  %v7179_v46 = vld [vmem:[#allocation4 + $0x2e8] sm:$0xff]  }
 0x46b   :  { %v1724_v52 = vpack.c.bf16 %v1722_v45, %v1722_v45 }
 0x46c   :  { %v1712_v42 = vadd.f32 %v5603_v25, %v1695_v37  ;;  %v1720_v47 = vsel %vm1714_vm8, %v1711_v33, %v1717_v41  ;;  %v7191_v25 = vld [vmem:[#allocation4 + $0x308] sm:$0xff]   ;;  %v165_v33 = vpop.xlane.xlu1 %164 }
 0x46d   :  { %v166_v34 = vmax.f32 %v165_v33, 1.0 }
 0x46e   :  { %vm1715_vm9 = vcmp.gt.f32.partialorder %v1712_v42, 0.0  ;;  %v1718_v43 = vmul.f32 0.01, %v1712_v42 }
 0x46f   :  { %7377 = vrcp.f32 %v166_v34  ;;  %v7210_v34 = vld [vmem:[#allocation4 + $0x3f0] sm:$0xff]  }
 0x470   :  { %v1721_v48 = vsel %vm1715_vm9, %v1712_v42, %v1718_v43  ;;  %v7193_v43 = vld [vmem:[#allocation4 + $0x378] sm:$0xff]  }
 0x471   :  { %v1723_v50 = vpack.c.bf16 %v1721_v48, %v1720_v47  ;;  %v7194_v47 = vld [vmem:[#allocation4 + $0x370] sm:$0xff]   ;;  %v7195_v48 = vld [vmem:[#allocation4 + $0x368] sm:$0xff]  }
 0x473   :  { %6491 = vmatprep.mubr.bf16.mxu0 %v1723_v50  ;;  %v7196_v50 = vld [vmem:[#allocation4 + $0x360] sm:$0xff]  }
 0x474   :  { %6492 = vmatmul.mubr.bf16.vlgmr.msra.gmra.mxu0 %v1724_v52  ;;  %v7198_v52 = vld [vmem:[#allocation4 + $0x350] sm:$0xff]  }
 0x475   :  { %6525 = vmatpush3.bf16.msra.mxu0 %v7177_v51  ;;  %6540 = vmatprep.mubr.msk.bf16.mxu0 %vm7453_vm0, %v7452_v0  ;;  %v7197_v51 = vld [vmem:[#allocation4 + $0x358] sm:$0xff]  }
 0x476   :  { %6526 = vmatprep.subr.bf16.mxu0 %v7452_v0 }
 0x479   :  { %6527 = vmatpush3.bf16.msra.mxu0 %v7178_v38  ;;  %v7199_v38 = vld [vmem:[#allocation4 + $0x348] sm:$0xff]  }
 0x47a   :  { %6528 = vmatprep.subr.bf16.mxu0 %v7452_v0 }
 0x47c   :  { %v7820_v37 = vpop.eup %7377 }
 0x47d   :  { %6529 = vmatpush3.bf16.msra.mxu0 %v7179_v46  ;;  %v7200_v46 = vld [vmem:[#allocation4 + $0x340] sm:$0xff]  }
 0x47e   :  { %6530 = vmatprep.subr.bf16.mxu0 %v7452_v0 }
 0x481   :  { %6531 = vmatpush3.bf16.msra.mxu0 %v7180_v54 }
 0x482   :  { %6532 = vmatprep.subr.bf16.mxu0 %v7452_v0 }
 0x485   :  { %6533 = vmatpush3.bf16.msra.mxu0 %v7181_v55 }
 0x486   :  { %6534 = vmatprep.subr.bf16.mxu0 %v7452_v0 }
 0x489   :  { %6535 = vmatpush3.bf16.msra.mxu0 %v7182_v56 }
 0x48a   :  { %6536 = vmatprep.subr.bf16.mxu0 %v7452_v0 }
 0x48d   :  { %6537 = vmatpush3.bf16.msra.mxu0 %v7183_v57 }
 0x48e   :  { %6538 = vmatprep.subr.bf16.mxu0 %v7452_v0 }
 0x491   :  { %6539 = vmatpush3.bf16.msra.mxu0 %v7184_v44  ;;  %v148_v44 = vpop.permute.xlu0 %147 }
 0x492   :  { %6564 = vmatprep.subr.mxu0 %v7452_v0  ;;  %vm149_vm12 = vcmp.eq.s32.totalorder %v148_v44, %v7661_v36 }
 0x494   :  { %6541 = vmatmul.mubr.bf16.vlgmr.msra.gmra.mxu0 %v7620_v6  ;;  %v5604_v6 = vld [vmem:[#allocation6 + $0x6] ss:$0 sm:$0xff] }
 0x495   :  { %6566 = vmatprep.mubr.msk.f32.mxu0 %vm7453_vm0, %v7452_v0 }
 0x534   :  { %v6493_v1 = vpop.f32.mrf.mxu0 }
 0x535   :  { %v1841_v5 = vadd.f32 %v6493_v1, %v5604_v6 }
 0x536   :  { %v1832_v8 = vpop.f32.mrf.mxu0 }
 0x537   :  { %6496 = vmatpush3.msra.mxu1 %v1841_v5  ;;  %v1833_v15 = vadd.f32 %v5604_v6, %v1832_v8  ;;  %v7202_v5 = vld [vmem:[#allocation4 + $0x3b0] sm:$0xff]  }
 0x538   :  { %v6494_v35 = vpop.f32.mrf.mxu0  ;;  %6497 = vmatprep.subr.mxu1 %v7452_v0 }
 0x539   :  { %v7203_v35 = vld [vmem:[#allocation4 + $0x3a8] sm:$0xff]  }
 0x53a   :  { %v1835_v9 = vpop.f32.mrf.mxu0 }
 0x53b   :  { %v1836_v12 = vadd.f32 %v5604_v6, %v1835_v9  ;;  %v7838_v6 = vsel %vm149_vm12, 1.0, %v7452_v0  ;;  %v7204_v9 = vld [vmem:[#allocation4 + $0x3a0] sm:$0xff]  }
 0x53d   :  { %6498 = vmatpush3.msra.mxu1 %v1836_v12  ;;  %v7205_v12 = vld [vmem:[#allocation4 + $0x398] sm:$0xff]  }
 0x53e   :  { %6499 = vmatprep.subr.mxu1 %v7452_v0 }
 0x53f   :  { %6500 = vmatpush3.msra.mxu1 %v1833_v15  ;;  %v7206_v15 = vld [vmem:[#allocation4 + $0x390] sm:$0xff]  }
 0x540   :  { %6502 = vmatmul.mubr.msk.f32.vlgmr.msra.gmra.mxu1 %vm162_vm11, %v7799_v61  ;;  %6504 = vmatprep.subr.bf16.mxu1 %v7452_v0 }
 0x541   :  { %6505 = vmatpush3.bf16.msra.mxu1 %v7185_v16  ;;  %6520 = vmatprep.mubr.msk.bf16.mxu1 %vm7453_vm0, %v7452_v0  ;;  %v7207_v16 = vld [vmem:[#allocation4 + $0x388] sm:$0xff]  }
 0x542   :  { %6506 = vmatprep.subr.bf16.mxu1 %v7452_v0 }
 0x545   :  { %6507 = vmatpush3.bf16.msra.mxu1 %v7186_v17  ;;  %v7208_v17 = vld [vmem:[#allocation4 + $0x380] sm:$0xff]  }
 0x546   :  { %6508 = vmatprep.subr.bf16.mxu1 %v7452_v0 }
 0x549   :  { %6509 = vmatpush3.bf16.msra.mxu1 %v7187_v18 }
 0x54a   :  { %6510 = vmatprep.subr.bf16.mxu1 %v7452_v0 }
 0x54d   :  { %6511 = vmatpush3.bf16.msra.mxu1 %v7188_v19 }
 0x54e   :  { %6512 = vmatprep.subr.bf16.mxu1 %v7452_v0 }
 0x551   :  { %6513 = vmatpush3.bf16.msra.mxu1 %v7189_v21  ;;  %v5640_v21 = vld [vmem:[#allocation6 + $0x7] ss:$0 sm:$0xff] }
 0x552   :  { %6514 = vmatprep.subr.bf16.mxu1 %v7452_v0 }
 0x554   :  { %v7815_v22 = vpop.f32.mrf.mxu0 }
 0x555   :  { %6515 = vmatpush3.bf16.msra.mxu1 %v7190_v11 }
 0x556   :  { %v6542_v29 = vpop.f32.mrf.mxu0  ;;  %6516 = vmatprep.subr.bf16.mxu1 %v7452_v0 }
 0x558   :  { %v2129_v30 = vpop.f32.mrf.mxu0 }
 0x559   :  { %6517 = vmatpush3.bf16.msra.mxu1 %v7191_v25 }
 0x55a   :  { %v6543_v31 = vpop.f32.mrf.mxu0  ;;  %6518 = vmatprep.subr.bf16.mxu1 %v7452_v0 }
 0x55d   :  { %6519 = vmatpush3.bf16.msra.mxu1 %v7192_v32  ;;  %v7209_v32 = vld [vmem:[#allocation4 + $0x3f8] sm:$0xff]  }
 0x55e   :  { %6544 = vmatprep.subr.bf16.mxu1 %v7452_v0 }
 0x600   :  { %v1915_v40 = vpop.f32.mrf.mxu1 }
 0x601   :  { %v1920_v41 = vmul.f32 %v7820_v37, %v1915_v40  ;;  %v7212_v40 = vld [vmem:[#allocation4 + $0x3e0] sm:$0xff]  }
 0x602   :  { %v6503_v42 = vpop.f32.mrf.mxu1 }
 0x603   :  { %v1938_v45 = vpack.c.bf16 %v1920_v41, %v1920_v41  ;;  %v7213_v41 = vld [vmem:[#allocation4 + $0x3d8] sm:$0xff]   ;;  %v7214_v42 = vld [vmem:[#allocation4 + $0x3d0] sm:$0xff]  }
 0x605   :  { %6521 = vmatmul.mubr.bf16.vlgmr.msra.gmra.mxu1 %v1938_v45  ;;  %v7216_v45 = vld [vmem:[#allocation4 + $0x3c0] sm:$0xff]  }
 0x606   :  { %6545 = vmatpush3.bf16.msra.mxu1 %v7193_v43  ;;  %6560 = vmatprep.mubr.msk.bf16.mxu1 %vm7453_vm0, %v7452_v0  ;;  %v7215_v43 = vld [vmem:[#allocation4 + $0x3c8] sm:$0xff]  }
 0x607   :  { %6546 = vmatprep.subr.bf16.mxu1 %v7452_v0 }
 0x60a   :  { %6547 = vmatpush3.bf16.msra.mxu1 %v7194_v47  ;;  %v7217_v47 = vld [vmem:[#allocation4 + $0x4b8] sm:$0xff]  }
 0x60b   :  { %6548 = vmatprep.subr.bf16.mxu1 %v7452_v0 }
 0x60e   :  { %6549 = vmatpush3.bf16.msra.mxu1 %v7195_v48  ;;  %v7218_v48 = vld [vmem:[#allocation4 + $0x4b0] sm:$0xff]  }
 0x60f   :  { %6550 = vmatprep.subr.bf16.mxu1 %v7452_v0 }
 0x612   :  { %6551 = vmatpush3.bf16.msra.mxu1 %v7196_v50  ;;  %v7219_v50 = vld [vmem:[#allocation4 + $0x4a8] sm:$0xff]  }
 0x613   :  { %6552 = vmatprep.subr.bf16.mxu1 %v7452_v0 }
 0x616   :  { %6553 = vmatpush3.bf16.msra.mxu1 %v7197_v51  ;;  %v7220_v51 = vld [vmem:[#allocation4 + $0x4a0] sm:$0xff]  }
 0x617   :  { %6554 = vmatprep.subr.bf16.mxu1 %v7452_v0 }
 0x61a   :  { %6555 = vmatpush3.bf16.msra.mxu1 %v7198_v52  ;;  %v7221_v52 = vld [vmem:[#allocation4 + $0x498] sm:$0xff]  }
 0x61b   :  { %6556 = vmatprep.subr.bf16.mxu1 %v7452_v0 }
 0x61e   :  { %6557 = vmatpush3.bf16.msra.mxu1 %v7199_v38  ;;  %v7223_v38 = vld [vmem:[#allocation4 + $0x488] sm:$0xff]  }
 0x61f   :  { %6558 = vmatprep.subr.bf16.mxu1 %v7452_v0 }
 0x622   :  { %6559 = vmatpush3.bf16.msra.mxu1 %v7200_v46  ;;  %v7224_v46 = vld [vmem:[#allocation4 + $0x480] sm:$0xff]  }
 0x623   :  { %6589 = vmatprep.subr.mxu1 %v7452_v0 }
 0x625   :  { %6561 = vmatmul.mubr.bf16.vlgmr.msra.gmra.mxu1 %v7643_v26 }
 0x626   :  { %6591 = vmatprep.mubr.msk.f32.mxu1 %vm7453_vm0, %v7452_v0 }
 0x6c5   :  { %v2038_v54 = vpop.f32.mrf.mxu1 }
 0x6c6   :  { %v2127_v18 = vadd.f32 %v7815_v22, %v2038_v54  ;;  %v7211_v22 = vld [vmem:[#allocation4 + $0x3e8] sm:$0xff]   ;;  %v5503_v54 = vld [vmem:[#allocation2] ss:$0 sm:$0xff] }
 0x6c7   :  { %v6522_v55 = vpop.f32.mrf.mxu1  ;;  %vm172_vm1 = vcmp.eq.s32.totalorder %v5503_v54, %v7792_v58 }
 0x6c8   :  { %v7878_v55 = vsel %vm172_vm1, 1.0, %v7452_v0 }
 0x6c9   :  { %v2041_v56 = vpop.f32.mrf.mxu1 }
 0x6ca   :  { %v176_v56 = vsel %vm175_vm2, %v7878_v55, 0.0 }
 0x6cb   :  { %v6523_v57 = vpop.f32.mrf.mxu1  ;;  %177 = vadd.xlane.f32.xlu0 %v176_v56 }
 0x6cc   :  { %v5641_v57 = vld [vmem:[#allocation6 + $0x8] ss:$0 sm:$0xff] }
 0x6e5   :  { %v2231_v62 = vpop.f32.mrf.mxu1 }
 0x6e6   :  { %6565 = vmatpush3.msk.msra.mxu0 %vm1173_vm13, %v2231_v62  ;;  %v7225_v62 = vld [vmem:[#allocation4 + $0x438] sm:$0xff]  }
 0x6e7   :  { %v6562_v1 = vpop.f32.mrf.mxu1  ;;  %6567 = vmatmul.mubr.msk.f32.vlgmr.msra.gmra.mxu0 %vm1163_vm15, %v7838_v6  ;;  %6569 = vmatprep.subr.bf16.mxu0 %v7452_v0 }
 0x6e8   :  { %6570 = vmatpush3.bf16.msra.mxu0 %v7201_v60  ;;  %6585 = vmatprep.mubr.msk.bf16.mxu0 %vm7453_vm0, %v7452_v0 }
 0x6e9   :  { %v2234_v8 = vpop.f32.mrf.mxu1  ;;  %6571 = vmatprep.subr.bf16.mxu0 %v7452_v0 }
 0x6eb   :  { %v6563_v36 = vpop.f32.mrf.mxu1 }
 0x6ec   :  { %6572 = vmatpush3.bf16.msra.mxu0 %v7202_v5  ;;  %v7226_v36 = vld [vmem:[#allocation4 + $0x430] sm:$0xff]  }
 0x6ed   :  { %6573 = vmatprep.subr.bf16.mxu0 %v7452_v0 }
 0x6f0   :  { %6574 = vmatpush3.bf16.msra.mxu0 %v7203_v35 }
 0x6f1   :  { %6575 = vmatprep.subr.bf16.mxu0 %v7452_v0 }
 0x6f4   :  { %6576 = vmatpush3.bf16.msra.mxu0 %v7204_v9  ;;  %v7228_v9 = vld [vmem:[#allocation4 + $0x420] sm:$0xff]  }
 0x6f5   :  { %6577 = vmatprep.subr.bf16.mxu0 %v7452_v0 }
 0x6f8   :  { %6578 = vmatpush3.bf16.msra.mxu0 %v7205_v12  ;;  %v7229_v12 = vld [vmem:[#allocation4 + $0x418] sm:$0xff]  }
 0x6f9   :  { %6579 = vmatprep.subr.bf16.mxu0 %v7452_v0 }
 0x6fc   :  { %6580 = vmatpush3.bf16.msra.mxu0 %v7206_v15  ;;  %v7230_v15 = vld [vmem:[#allocation4 + $0x410] sm:$0xff]  }
 0x6fd   :  { %6581 = vmatprep.subr.bf16.mxu0 %v7452_v0 }
 0x700   :  { %6582 = vmatpush3.bf16.msra.mxu0 %v7207_v16  ;;  %v7231_v16 = vld [vmem:[#allocation4 + $0x408] sm:$0xff]  }
 0x701   :  { %6583 = vmatprep.subr.bf16.mxu0 %v7452_v0 }
 0x704   :  { %6584 = vmatpush3.bf16.msra.mxu0 %v7208_v17 }
 0x705   :  { %6614 = vmatprep.subr.bf16.mxu0 %v7452_v0 }
 0x7a7   :  { %v2309_v19 = vpop.f32.mrf.mxu0 }
 0x7a8   :  { %v2313_v11 = vadd.f32 %v2309_v19, %v2127_v18 }
 0x7a9   :  { %v6568_v25 = vpop.f32.mrf.mxu0 }
 0x7aa   :  { %v2322_v29 = vadd.f32 %v5640_v21, %v2313_v11  ;;  %v7232_v11 = vld [vmem:[#allocation4 + $0x400] sm:$0xff]   ;;  %v178_v25 = vpop.xlane.xlu0 %177 }
 0x7ac   :  { %vm2323_vm14 = vcmp.gt.f32.partialorder %v2322_v29, 0.0  ;;  %v2324_v30 = vmul.f32 0.01, %v2322_v29 }
 0x7ae   :  { %v2325_v31 = vsel %vm2323_vm14, %v2322_v29, %v2324_v30  ;;  %v179_v29 = vmax.f32 %v178_v25, 1.0  ;;  %v7254_v25 = vld [vmem:[#allocation4 + $0x550] sm:$0xff]  }
 0x7af   :  { %v2326_v33 = vpack.c.bf16 %v2325_v31, %v2325_v31 }
 0x7b0   :  { %7379 = vrcp.f32 %v179_v29  ;;  %v7255_v29 = vld [vmem:[#allocation4 + $0x548] sm:$0xff]  }
 0x7b1   :  { %6586 = vmatmul.mubr.bf16.vlgmr.msra.gmra.mxu0 %v2326_v33 }
 0x7b2   :  { %6615 = vmatpush3.bf16.msra.mxu0 %v7209_v32  ;;  %6630 = vmatprep.mubr.msk.bf16.mxu0 %vm7453_vm0, %v7452_v0 }
 0x7b3   :  { %6616 = vmatprep.subr.bf16.mxu0 %v7452_v0 }
 0x7b6   :  { %6617 = vmatpush3.bf16.msra.mxu0 %v7210_v34  ;;  %v7233_v34 = vld [vmem:[#allocation4 + $0x478] sm:$0xff]  }
 0x7b7   :  { %6618 = vmatprep.subr.bf16.mxu0 %v7452_v0 }
 0x7ba   :  { %6619 = vmatpush3.bf16.msra.mxu0 %v7211_v22 }
 0x7bb   :  { %6620 = vmatprep.subr.bf16.mxu0 %v7452_v0 }
 0x7bd   :  { %v7900_v30 = vpop.eup %7379 }
 0x7be   :  { %6621 = vmatpush3.bf16.msra.mxu0 %v7212_v40 }
 0x7bf   :  { %6622 = vmatprep.subr.bf16.mxu0 %v7452_v0 }
 0x7c2   :  { %6623 = vmatpush3.bf16.msra.mxu0 %v7213_v41 }
 0x7c3   :  { %6624 = vmatprep.subr.bf16.mxu0 %v7452_v0 }
 0x7c6   :  { %6625 = vmatpush3.bf16.msra.mxu0 %v7214_v42  ;;  %v7234_v42 = vld [vmem:[#allocation4 + $0x470] sm:$0xff]  }
 0x7c7   :  { %6626 = vmatprep.subr.bf16.mxu0 %v7452_v0 }
 0x7ca   :  { %6627 = vmatpush3.bf16.msra.mxu0 %v7215_v43 }
 0x7cb   :  { %6628 = vmatprep.subr.bf16.mxu0 %v7452_v0 }
 0x7ce   :  { %6629 = vmatpush3.bf16.msra.mxu0 %v7216_v45 }
 0x7cf   :  { %6654 = vmatprep.subr.bf16.mxu0 %v7452_v0 }
 0x7d1   :  { %6631 = vmatmul.mubr.bf16.vlgmr.msra.gmra.mxu0 %v7643_v26  ;;  %v7222_v26 = vld [vmem:[#allocation4 + $0x490] sm:$0xff]  }
 0x7d2   :  { %6655 = vmatpush3.bf16.msra.mxu0 %v7217_v47  ;;  %6670 = vmatprep.mubr.msk.bf16.mxu0 %vm7453_vm0, %v7452_v0  ;;  %v7235_v47 = vld [vmem:[#allocation4 + $0x468] sm:$0xff]  }
 0x7d3   :  { %6656 = vmatprep.subr.bf16.mxu0 %v7452_v0 }
 0x7d6   :  { %6657 = vmatpush3.bf16.msra.mxu0 %v7218_v48  ;;  %v7236_v48 = vld [vmem:[#allocation4 + $0x460] sm:$0xff]  }
 0x7d7   :  { %6658 = vmatprep.subr.bf16.mxu0 %v7452_v0 }
 0x7da   :  { %6659 = vmatpush3.bf16.msra.mxu0 %v7219_v50  ;;  %v7237_v50 = vld [vmem:[#allocation4 + $0x458] sm:$0xff]  }
 0x7db   :  { %6660 = vmatprep.subr.bf16.mxu0 %v7452_v0 }
 0x7de   :  { %6661 = vmatpush3.bf16.msra.mxu0 %v7220_v51  ;;  %v7238_v51 = vld [vmem:[#allocation4 + $0x450] sm:$0xff]  }
 0x7df   :  { %6662 = vmatprep.subr.bf16.mxu0 %v7452_v0 }
 0x7e2   :  { %6663 = vmatpush3.bf16.msra.mxu0 %v7221_v52  ;;  %v7239_v52 = vld [vmem:[#allocation4 + $0x448] sm:$0xff]  }
 0x7e3   :  { %6664 = vmatprep.subr.bf16.mxu0 %v7452_v0 }
 0x7e6   :  { %6665 = vmatpush3.bf16.msra.mxu0 %v7222_v26  ;;  %v7240_v26 = vld [vmem:[#allocation4 + $0x440] sm:$0xff]  }
 0x7e7   :  { %6666 = vmatprep.subr.bf16.mxu0 %v7452_v0 }
 0x7ea   :  { %6667 = vmatpush3.bf16.msra.mxu0 %v7223_v38 }
 0x7eb   :  { %6668 = vmatprep.subr.bf16.mxu0 %v7452_v0 }
 0x7ee   :  { %6669 = vmatpush3.bf16.msra.mxu0 %v7224_v46  ;;  %v5667_v46 = vld [vmem:[#allocation6 + $0x9] ss:$0 sm:$0xff] }
 0x7ef   :  { %6694 = vmatprep.subr.mxu0 %v7452_v0 }
 0x871   :  { %v2434_v44 = vpop.f32.mrf.mxu0 }
 0x872   :  { %v2435_v60 = vadd.f32 %v5641_v57, %v2434_v44 }
 0x873   :  { %v6587_v1 = vpop.f32.mrf.mxu0 }
 0x874   :  { %v2852_v5 = vadd.f32 %v2435_v60, %v7616_v4  ;;  %6590 = vmatpush3.msra.mxu1 %v2435_v60  ;;  %v7227_v4 = vld [vmem:[#allocation4 + $0x428] sm:$0xff]  }
 0x875   :  { %v2437_v8 = vpop.f32.mrf.mxu0  ;;  %6592 = vmatmul.mubr.msk.f32.vlgmr.msra.gmra.mxu1 %vm760_vm4, %v7878_v55  ;;  %6594 = vmatprep.subr.bf16.mxu1 %v7452_v0 }
 0x876   :  { %v7885_v58 = vpack.c.bf16 %v2852_v5, %v2852_v5  ;;  %6595 = vmatpush3.bf16.msra.mxu1 %v7225_v62  ;;  %6610 = vmatprep.mubr.msk.bf16.mxu1 %vm7453_vm0, %v7452_v0  ;;  %v7241_v5 = vld [vmem:[#allocation4 + $0x4f8] sm:$0xff]  }
 0x877   :  { %v6588_v35 = vpop.f32.mrf.mxu0  ;;  %6596 = vmatprep.subr.bf16.mxu1 %v7452_v0 }
 0x878   :  { %6671 = vmatmul.mubr.bf16.vlgmr.msra.gmra.mxu0 %v7885_v58  ;;  %v7243_v35 = vld [vmem:[#allocation4 + $0x4e8] sm:$0xff]  }
 0x879   :  { %6696 = vmatprep.mubr.msk.f32.mxu0 %vm7453_vm0, %v7452_v0 }
 0x87a   :  { %6597 = vmatpush3.bf16.msra.mxu1 %v7226_v36  ;;  %v7242_v36 = vld [vmem:[#allocation4 + $0x4f0] sm:$0xff]  }
 0x87b   :  { %6598 = vmatprep.subr.bf16.mxu1 %v7452_v0 }
 0x87e   :  { %6599 = vmatpush3.bf16.msra.mxu1 %v7227_v4  ;;  %v7244_v4 = vld [vmem:[#allocation4 + $0x4e0] sm:$0xff]  }
 0x87f   :  { %6600 = vmatprep.subr.bf16.mxu1 %v7452_v0 }
 0x882   :  { %6601 = vmatpush3.bf16.msra.mxu1 %v7228_v9  ;;  %v7245_v9 = vld [vmem:[#allocation4 + $0x4d8] sm:$0xff]  }
 0x883   :  { %6602 = vmatprep.subr.bf16.mxu1 %v7452_v0 }
 0x886   :  { %6603 = vmatpush3.bf16.msra.mxu1 %v7229_v12  ;;  %v7246_v12 = vld [vmem:[#allocation4 + $0x4d0] sm:$0xff]  }
 0x887   :  { %6604 = vmatprep.subr.bf16.mxu1 %v7452_v0 }
 0x88a   :  { %6605 = vmatpush3.bf16.msra.mxu1 %v7230_v15  ;;  %v7247_v15 = vld [vmem:[#allocation4 + $0x4c8] sm:$0xff]  }
 0x88b   :  { %6606 = vmatprep.subr.bf16.mxu1 %v7452_v0 }
 0x88e   :  { %6607 = vmatpush3.bf16.msra.mxu1 %v7231_v16  ;;  %v7248_v16 = vld [vmem:[#allocation4 + $0x4c0] sm:$0xff]  }
 0x88f   :  { %6608 = vmatprep.subr.bf16.mxu1 %v7452_v0 }
 0x891   :  { %v2720_v17 = vpop.f32.mrf.mxu0 }
 0x892   :  { %6609 = vmatpush3.bf16.msra.mxu1 %v7232_v11  ;;  %v7253_v11 = vld [vmem:[#allocation4 + $0x558] sm:$0xff]  }
 0x893   :  { %v6632_v18 = vpop.f32.mrf.mxu0  ;;  %6634 = vmatprep.subr.bf16.mxu1 %v7452_v0 }
 0x894   :  { %v7250_v18 = vld [vmem:[#allocation4 + $0x570] sm:$0xff]  }
 0x895   :  { %v2723_v19 = vpop.f32.mrf.mxu0 }
 0x896   :  { %v7251_v19 = vld [vmem:[#allocation4 + $0x568] sm:$0xff]  }
 0x897   :  { %v6633_v21 = vpop.f32.mrf.mxu0 }
 0x898   :  { %v7252_v21 = vld [vmem:[#allocation4 + $0x560] sm:$0xff]  }
 0x935   :  { %v2509_v31 = vpop.f32.mrf.mxu1 }
 0x936   :  { %v2514_v32 = vmul.f32 %v7900_v30, %v2509_v31  ;;  %v7256_v31 = vld [vmem:[#allocation4 + $0x540] sm:$0xff]  }
 0x937   :  { %v6593_v33 = vpop.f32.mrf.mxu1 }
 0x938   :  { %v2532_v22 = vpack.c.bf16 %v2514_v32, %v2514_v32  ;;  %v7903_v40 = vpop.f32.mrf.mxu0  ;;  %v5668_v32 = vld [vmem:[#allocation6 + $0xa] ss:$0 sm:$0xff] }
 0x93a   :  { %6611 = vmatmul.mubr.bf16.vlgmr.msra.gmra.mxu1 %v2532_v22  ;;  %v6672_v41 = vpop.f32.mrf.mxu0 }
 0x93b   :  { %6635 = vmatpush3.bf16.msra.mxu1 %v7233_v34  ;;  %6650 = vmatprep.mubr.msk.bf16.mxu1 %vm7453_vm0, %v7452_v0 }
 0x93c   :  { %v2960_v43 = vpop.f32.mrf.mxu0  ;;  %6636 = vmatprep.subr.bf16.mxu1 %v7452_v0 }
 0x93d   :  { %v7257_v43 = vld [vmem:[#allocation4 + $0x5f8] sm:$0xff]  }
 0x93e   :  { %v6673_v45 = vpop.f32.mrf.mxu0 }
 0x93f   :  { %6637 = vmatpush3.bf16.msra.mxu1 %v7234_v42 }
 0x940   :  { %6638 = vmatprep.subr.bf16.mxu1 %v7452_v0 }
 0x943   :  { %6639 = vmatpush3.bf16.msra.mxu1 %v7235_v47 }
 0x944   :  { %6640 = vmatprep.subr.bf16.mxu1 %v7452_v0 }
 0x947   :  { %6641 = vmatpush3.bf16.msra.mxu1 %v7236_v48  ;;  %v7258_v48 = vld [vmem:[#allocation4 + $0x5f0] sm:$0xff]  }
 0x948   :  { %6642 = vmatprep.subr.bf16.mxu1 %v7452_v0 }
 0x94b   :  { %6643 = vmatpush3.bf16.msra.mxu1 %v7237_v50  ;;  %v7259_v50 = vld [vmem:[#allocation4 + $0x5e8] sm:$0xff]  }
 0x94c   :  { %6644 = vmatprep.subr.bf16.mxu1 %v7452_v0 }
 0x94f   :  { %6645 = vmatpush3.bf16.msra.mxu1 %v7238_v51  ;;  %v7261_v51 = vld [vmem:[#allocation4 + $0x5d8] sm:$0xff]  }
 0x950   :  { %6646 = vmatprep.subr.bf16.mxu1 %v7452_v0 }
 0x953   :  { %6647 = vmatpush3.bf16.msra.mxu1 %v7239_v52  ;;  %v7262_v52 = vld [vmem:[#allocation4 + $0x5d0] sm:$0xff]  }
 0x954   :  { %6648 = vmatprep.subr.bf16.mxu1 %v7452_v0 }
 0x957   :  { %6649 = vmatpush3.bf16.msra.mxu1 %v7240_v26  ;;  %v7263_v26 = vld [vmem:[#allocation4 + $0x5c8] sm:$0xff]  }
 0x958   :  { %6674 = vmatprep.subr.bf16.mxu1 %v7452_v0 }
 0x9fa   :  { %v2632_v38 = vpop.f32.mrf.mxu1 }
 0x9fb   :  { %v2721_v54 = vadd.f32 %v2720_v17, %v2632_v38  ;;  %v7249_v17 = vld [vmem:[#allocation4 + $0x578] sm:$0xff]  }
 0x9fc   :  { %v6612_v56 = vpop.f32.mrf.mxu1 }
 0x9fd   :  { %v2734_v57 = vadd.f32 %v5667_v46, %v2721_v54  ;;  %v7264_v46 = vld [vmem:[#allocation4 + $0x5c0] sm:$0xff]   ;;  %v7265_v54 = vld [vmem:[#allocation4 + $0x538] sm:$0xff]  }
 0x9fe   :  { %v2635_v44 = vpop.f32.mrf.mxu1 }
 0x9ff   :  { %vm2735_vm3 = vcmp.gt.f32.partialorder %v2734_v57, 0.0  ;;  %v2736_v60 = vmul.f32 0.01, %v2734_v57 }
 0xa00   :  { %v6613_v62 = vpop.f32.mrf.mxu1 }
 0xa01   :  { %v2737_v1 = vsel %vm2735_vm3, %v2734_v57, %v2736_v60  ;;  %v7268_v60 = vld [vmem:[#allocation4 + $0x520] sm:$0xff]  }
 0xa02   :  { %v2738_v8 = vpack.c.bf16 %v2737_v1, %v2737_v1  ;;  %v7993_v1 = vadd.f32 %v7763_v10, %v7718_v20  ;;  %v7275_v10 = vld [vmem:[#allocation4 + $0x5a8] sm:$0xff]  }
 0xa04   :  { %6651 = vmatmul.mubr.bf16.vlgmr.msra.gmra.mxu1 %v2738_v8  ;;  %v7273_v8 = vld [vmem:[#allocation4 + $0x5b8] sm:$0xff]  }
 0xa05   :  { %6675 = vmatpush3.bf16.msra.mxu1 %v7241_v5  ;;  %6690 = vmatprep.mubr.msk.bf16.mxu1 %vm7453_vm0, %v7452_v0  ;;  %v3229_v5 = vpack.c.bf16 %v7993_v1, %v7993_v1 }
 0xa06   :  { %6676 = vmatprep.subr.bf16.mxu1 %v7452_v0 }
 0xa09   :  { %6677 = vmatpush3.bf16.msra.mxu1 %v7242_v36 }
 0xa0a   :  { %6678 = vmatprep.subr.bf16.mxu1 %v7452_v0 }
 0xa0d   :  { %6679 = vmatpush3.bf16.msra.mxu1 %v7243_v35  ;;  %v7274_v35 = vld [vmem:[#allocation4 + $0x5b0] sm:$0xff]  }
 0xa0e   :  { %6680 = vmatprep.subr.bf16.mxu1 %v7452_v0 }
 0xa11   :  { %6681 = vmatpush3.bf16.msra.mxu1 %v7244_v4 }
 0xa12   :  { %6682 = vmatprep.subr.bf16.mxu1 %v7452_v0 }
 0xa15   :  { %6683 = vmatpush3.bf16.msra.mxu1 %v7245_v9 }
 0xa16   :  { %6684 = vmatprep.subr.bf16.mxu1 %v7452_v0 }
 0xa19   :  { %6685 = vmatpush3.bf16.msra.mxu1 %v7246_v12  ;;  %v7276_v12 = vld [vmem:[#allocation4 + $0x5a0] sm:$0xff]  }
 0xa1a   :  { %6686 = vmatprep.subr.bf16.mxu1 %v7452_v0 }
 0xa1d   :  { %6687 = vmatpush3.bf16.msra.mxu1 %v7247_v15 }
 0xa1e   :  { %6688 = vmatprep.subr.bf16.mxu1 %v7452_v0 }
 0xa21   :  { %6689 = vmatpush3.bf16.msra.mxu1 %v7248_v16 }
 0xa22   :  { %6736 = vmatprep.subr.bf16.mxu1 %v7452_v0 }
 0xa24   :  { %6691 = vmatmul.mubr.bf16.vlgmr.msra.gmra.mxu1 %v7885_v58 }
 0xa25   :  { %6737 = vmatpush3.bf16.msra.mxu1 %v7249_v17  ;;  %6752 = vmatprep.mubr.msk.bf16.mxu1 %vm7453_vm0, %v7452_v0 }
 0xa26   :  { %6738 = vmatprep.subr.bf16.mxu1 %v7452_v0 }
 0xa29   :  { %6739 = vmatpush3.bf16.msra.mxu1 %v7250_v18 }
 0xa2a   :  { %6740 = vmatprep.subr.bf16.mxu1 %v7452_v0 }
 0xa2d   :  { %6741 = vmatpush3.bf16.msra.mxu1 %v7251_v19 }
 0xa2e   :  { %6742 = vmatprep.subr.bf16.mxu1 %v7452_v0 }
 0xa31   :  { %6743 = vmatpush3.bf16.msra.mxu1 %v7252_v21 }
 0xa32   :  { %6744 = vmatprep.subr.bf16.mxu1 %v7452_v0 }
 0xa35   :  { %6745 = vmatpush3.bf16.msra.mxu1 %v7253_v11 }
 0xa36   :  { %6746 = vmatprep.subr.bf16.mxu1 %v7452_v0 }
 0xa39   :  { %6747 = vmatpush3.bf16.msra.mxu1 %v7254_v25 }
 0xa3a   :  { %6748 = vmatprep.subr.bf16.mxu1 %v7452_v0 }
 0xa3d   :  { %6749 = vmatpush3.bf16.msra.mxu1 %v7255_v29 }
 0xa3e   :  { %6750 = vmatprep.subr.bf16.mxu1 %v7452_v0 }
 0xa41   :  { %6751 = vmatpush3.bf16.msra.mxu1 %v7256_v31 }
 0xa42   :  { %6787 = vmatprep.subr.bf16.mxu1 %v7452_v0 }
 0xac4   :  { %v2846_v33 = vpop.f32.mrf.mxu1 }
 0xac5   :  { %v2847_v34 = vadd.f32 %v5668_v32, %v2846_v33 }
 0xac6   :  { %v6652_v22 = vpop.f32.mrf.mxu1 }
 0xac7   :  { %v7937_v41 = vadd.f32 %v2847_v34, %v7639_v24  ;;  %v7260_v24 = vld [vmem:[#allocation4 + $0x5e0] sm:$0xff]  }
 0xac8   :  { %v2849_v42 = vpop.f32.mrf.mxu1 }
 0xac9   :  { %v7941_v45 = vpack.c.bf16 %v7937_v41, %v7937_v41 }
 0xaca   :  { %v6653_v47 = vpop.f32.mrf.mxu1 }
 0xacb   :  { %6753 = vmatmul.mubr.bf16.vlgmr.msra.gmra.mxu1 %v7941_v45 }
 0xacc   :  { %6788 = vmatpush3.bf16.msra.mxu1 %v7257_v43  ;;  %6803 = vmatprep.mubr.msk.bf16.mxu1 %vm7453_vm0, %v7452_v0  ;;  %v7277_v43 = vld [vmem:[#allocation4 + $0x598] sm:$0xff]  }
 0xacd   :  { %6789 = vmatprep.subr.bf16.mxu1 %v7452_v0 }
 0xad0   :  { %6790 = vmatpush3.bf16.msra.mxu1 %v7258_v48  ;;  %v7278_v48 = vld [vmem:[#allocation4 + $0x590] sm:$0xff]  }
 0xad1   :  { %6791 = vmatprep.subr.bf16.mxu1 %v7452_v0 }
 0xad4   :  { %6792 = vmatpush3.bf16.msra.mxu1 %v7259_v50 }
 0xad5   :  { %6793 = vmatprep.subr.bf16.mxu1 %v7452_v0 }
 0xad8   :  { %6794 = vmatpush3.bf16.msra.mxu1 %v7260_v24 }
 0xad9   :  { %6795 = vmatprep.subr.bf16.mxu1 %v7452_v0 }
 0xadc   :  { %6796 = vmatpush3.bf16.msra.mxu1 %v7261_v51 }
 0xadd   :  { %6797 = vmatprep.subr.bf16.mxu1 %v7452_v0 }
 0xae0   :  { %6798 = vmatpush3.bf16.msra.mxu1 %v7262_v52  ;;  %v7279_v52 = vld [vmem:[#allocation4 + $0x588] sm:$0xff]  }
 0xae1   :  { %6799 = vmatprep.subr.bf16.mxu1 %v7452_v0 }
 0xae4   :  { %v3062_v38 = vpop.f32.mrf.mxu1  ;;  %6800 = vmatpush3.bf16.msra.mxu1 %v7263_v26  ;;  %v7281_v26 = vld [vmem:[#allocation4 + $0x638] sm:$0xff]  }
 0xae5   :  { %6695 = vmatpush3.msra.mxu0 %v3062_v38  ;;  %6801 = vmatprep.subr.bf16.mxu1 %v7452_v0 }
 0xae6   :  { %v6692_v56 = vpop.f32.mrf.mxu1  ;;  %6697 = vmatmul.mubr.msk.f32.vlgmr.msra.gmra.mxu0 %vm760_vm4, %v7665_v39  ;;  %6705 = vmatprep.subr.mxu0 %v7452_v0  ;;  %v7266_v39 = vld [vmem:[#allocation4 + $0x530] sm:$0xff]  }
 0xae7   :  { %6706 = vmatpush3.msra.mxu0 %v7903_v40  ;;  %6699 = vmatprep.mubr.msk.f32.mxu0 %vm7453_vm0, %v7452_v0  ;;  %v7977_v40 = vadd.f32 %v7767_v14, %v7706_v3  ;;  %v7269_v3 = vld [vmem:[#allocation4 + $0x518] sm:$0xff]   ;;  %v7272_v14 = vld [vmem:[#allocation4 + $0x500] sm:$0xff]  }
 0xae8   :  { %v3065_v57 = vpop.f32.mrf.mxu1  ;;  %6802 = vmatpush3.bf16.msra.mxu1 %v7264_v46  ;;  %6716 = vmatprep.subr.bf16.mxu0 %v7265_v54 }
 0xae9   :  { %6827 = vmatprep.subr.mxu1 %v7452_v0 }
 0xaea   :  { %v6693_v44 = vpop.f32.mrf.mxu1  ;;  %6700 = vmatmul.mubr.msk.f32.gmra.mxu0 %vm760_vm4, %v7675_v49  ;;  %v7267_v49 = vld [vmem:[#allocation4 + $0x528] sm:$0xff]  }
 0xaeb   :  { %6804 = vmatmul.mubr.bf16.vlgmr.msra.gmra.mxu1 %v7885_v58  ;;  %6702 = vmatprep.mubr.msk.f32.mxu0 %vm7453_vm0, %v7452_v0 }
 0xaec   :  { %6829 = vmatprep.mubr.msk.f32.mxu1 %vm7453_vm0, %v7452_v0 }
 0xaee   :  { %6703 = vmatmul.mubr.msk.f32.gmra.mxu0 %vm760_vm4, %v7680_v53  ;;  %v7983_v53 = vadd.f32 %v7765_v13, %v7704_v2  ;;  %v7270_v2 = vld [vmem:[#allocation4 + $0x510] sm:$0xff]   ;;  %v7271_v13 = vld [vmem:[#allocation4 + $0x508] sm:$0xff]  }
 0xaef   :  { %6707 = vmatprep.mubr.msk.f32.mxu0 %vm7453_vm0, %v7452_v0 }
 0xaf0   :  { %v3228_v62 = vpack.c.bf16 %v7977_v40, %v7983_v53 }
 0xaf2   :  { %6708 = vmatmul.mubr.msk.f32.vlgmr.msra.gmra.mxu0 %vm760_vm4, %v7691_v59 }
 0xaf3   :  { %6717 = vmatpush3.bf16.msra.mxu0 %v7265_v54  ;;  %6710 = vmatprep.mubr.msk.f32.mxu0 %vm7453_vm0, %v7452_v0  ;;  %v5719_v54 = vld [vmem:[#allocation6 + $0xb] ss:$0 sm:$0xff] }
 0xaf4   :  { %6718 = vmatprep.subr.bf16.mxu0 %v7266_v39 }
 0xaf6   :  { %6711 = vmatmul.mubr.msk.f32.gmra.mxu0 %vm760_vm4, %v7699_v63 }
 0xaf7   :  { %6719 = vmatpush3.bf16.msra.mxu0 %v7266_v39  ;;  %6713 = vmatprep.mubr.msk.f32.mxu0 %vm7453_vm0, %v7452_v0 }
 0xaf8   :  { %6720 = vmatprep.subr.bf16.mxu0 %v7267_v49 }
 0xafa   :  { %6714 = vmatmul.mubr.msk.f32.gmra.mxu0 %vm760_vm4, %v7711_v7 }
 0xafb   :  { %6721 = vmatpush3.bf16.msra.mxu0 %v7267_v49  ;;  %6732 = vmatprep.mubr.bf16.mxu0 %v3228_v62 }
 0xafc   :  { %6722 = vmatprep.subr.bf16.mxu0 %v7268_v60 }
 0xaff   :  { %6723 = vmatpush3.bf16.msra.mxu0 %v7268_v60 }
 0xb00   :  { %6724 = vmatprep.subr.bf16.mxu0 %v7269_v3 }
 0xb03   :  { %6725 = vmatpush3.bf16.msra.mxu0 %v7269_v3 }
 0xb04   :  { %6726 = vmatprep.subr.bf16.mxu0 %v7270_v2 }
 0xb07   :  { %6727 = vmatpush3.bf16.msra.mxu0 %v7270_v2 }
 0xb08   :  { %6728 = vmatprep.subr.bf16.mxu0 %v7271_v13 }
 0xb0b   :  { %6729 = vmatpush3.bf16.msra.mxu0 %v7271_v13 }
 0xb0c   :  { %6730 = vmatprep.subr.bf16.mxu0 %v7272_v14 }
 0xb0f   :  { %6731 = vmatpush3.bf16.msra.mxu0 %v7272_v14 }
 0xb10   :  { %6756 = vmatprep.subr.mxu0 %v7452_v0 }
 0xb12   :  { %6733 = vmatmul.mubr.bf16.vlgmr.msra.gmra.mxu0 %v3229_v5 }
 0xb13   :  { %6758 = vmatprep.mubr.msk.f32.mxu0 %vm7453_vm0, %v7452_v0 }
 0xb8b   :  { %v3446_v36 = vpop.f32.mrf.mxu1 }
 0xb8c   :  { %6757 = vmatpush3.msk.msra.mxu0 %vm1173_vm13, %v3446_v36 }
 0xb8d   :  { %v6754_v4 = vpop.f32.mrf.mxu1  ;;  %6759 = vmatmul.mubr.msk.f32.vlgmr.msra.gmra.mxu0 %vm1163_vm15, %v7728_v23  ;;  %6767 = vmatprep.subr.bf16.mxu0 %v7273_v8 }
 0xb8e   :  { %6761 = vmatprep.mubr.msk.f32.mxu0 %vm7453_vm0, %v7452_v0  ;;  %6768 = vmatpush3.bf16.msra.mxu0 %v7273_v8 }
 0xb8f   :  { %v3449_v20 = vpop.f32.mrf.mxu1  ;;  %6769 = vmatprep.subr.bf16.mxu0 %v7274_v35 }
 0xb91   :  { %v6755_v9 = vpop.f32.mrf.mxu1  ;;  %6762 = vmatmul.mubr.msk.f32.gmra.mxu0 %vm1163_vm15, %v7736_v27 }
 0xb92   :  { %6764 = vmatprep.mubr.msk.f32.mxu0 %vm7453_vm0, %v7452_v0  ;;  %6770 = vmatpush3.bf16.msra.mxu0 %v7274_v35 }
 0xb93   :  { %6771 = vmatprep.subr.bf16.mxu0 %v7275_v10 }
 0xb95   :  { %6765 = vmatmul.mubr.msk.f32.gmra.mxu0 %vm1163_vm15, %v7744_v28 }
 0xb96   :  { %6772 = vmatpush3.bf16.msra.mxu0 %v7275_v10 }
 0xb97   :  { %6773 = vmatprep.subr.bf16.mxu0 %v7276_v12 }
 0xb9a   :  { %6774 = vmatpush3.bf16.msra.mxu0 %v7276_v12 }
 0xb9b   :  { %6775 = vmatprep.subr.bf16.mxu0 %v7277_v43 }
 0xb9e   :  { %6776 = vmatpush3.bf16.msra.mxu0 %v7277_v43  ;;  %v5720_v43 = vld [vmem:[#allocation6 + $0xc] ss:$0 sm:$0xff] }
 0xb9f   :  { %6777 = vmatprep.subr.bf16.mxu0 %v7278_v48 }
 0xba2   :  { %6778 = vmatpush3.bf16.msra.mxu0 %v7278_v48 }
 0xba3   :  { %6779 = vmatprep.subr.bf16.mxu0 %v7279_v52 }
 0xba6   :  { %v3134_v23 = vpop.f32.mrf.mxu0  ;;  %6780 = vmatpush3.bf16.msra.mxu0 %v7279_v52 }
 0xba8   :  { %v6698_v15 = vpop.f32.mrf.mxu0 }
 0xba9   :  { %v7283_v15 = vld [vmem:[#allocation4 + $0x628] sm:$0xff]  }
 0xbaa   :  { %v3139_v16 = vpop.f32.mrf.mxu0 }
 0xbab   :  { %v3780_v17 = vpop.f32.mrf.mxu1 }
 0xbac   :  { %v6701_v18 = vpop.f32.mrf.mxu0  ;;  %6828 = vmatpush3.msra.mxu1 %v3780_v17  ;;  %v7285_v17 = vld [vmem:[#allocation4 + $0x618] sm:$0xff]  }
 0xbad   :  { %v6805_v19 = vpop.f32.mrf.mxu1  ;;  %6830 = vmatmul.mubr.msk.f32.vlgmr.msra.gmra.mxu1 %vm760_vm4, %v7691_v59 }
 0xbae   :  { %v3144_v27 = vpop.f32.mrf.mxu0  ;;  %6832 = vmatprep.mubr.msk.f32.mxu1 %vm7453_vm0, %v7452_v0 }
 0xbaf   :  { %v3783_v21 = vpop.f32.mrf.mxu1 }
 0xbb0   :  { %v6704_v11 = vpop.f32.mrf.mxu0 }
 0xbb1   :  { %v6806_v28 = vpop.f32.mrf.mxu1  ;;  %6833 = vmatmul.mubr.msk.f32.gmra.mxu1 %vm760_vm4, %v7699_v63 }
 0xbb2   :  { %v3214_v25 = vpop.f32.mrf.mxu0  ;;  %6835 = vmatprep.mubr.msk.f32.mxu1 %vm7453_vm0, %v7452_v0 }
 0xbb3   :  { %v3215_v29 = vadd.f32 %v3214_v25, %v3134_v23  ;;  %v7282_v23 = vld [vmem:[#allocation4 + $0x630] sm:$0xff]  }
 0xbb4   :  { %v6709_v31 = vpop.f32.mrf.mxu0  ;;  %v7286_v25 = vld [vmem:[#allocation4 + $0x610] sm:$0xff]  }
 0xbb5   :  { %6836 = vmatmul.mubr.msk.f32.gmra.mxu1 %vm760_vm4, %v7711_v7  ;;  %v7280_v7 = vld [vmem:[#allocation4 + $0x580] sm:$0xff]  }
 0xbb6   :  { %v3219_v59 = vpop.f32.mrf.mxu0  ;;  %6781 = vmatprep.subr.bf16.mxu0 %v7280_v7  ;;  %v7288_v31 = vld [vmem:[#allocation4 + $0x600] sm:$0xff]  }
 0xbb7   :  { %v3220_v32 = vadd.f32 %v3219_v59, %v3139_v16  ;;  %6782 = vmatpush3.bf16.msra.mxu0 %v7280_v7  ;;  %v7284_v16 = vld [vmem:[#allocation4 + $0x620] sm:$0xff]   ;;  %v7289_v59 = vld [vmem:[#allocation4 + $0x678] sm:$0xff]  }
 0xbb8   :  { %v6712_v33 = vpop.f32.mrf.mxu0  ;;  %6807 = vmatprep.subr.bf16.mxu0 %v7281_v26  ;;  %6838 = vmatprep.subr.bf16.mxu1 %v7289_v59 }
 0xbb9   :  { %6839 = vmatpush3.bf16.msra.mxu1 %v7289_v59  ;;  %v7291_v33 = vld [vmem:[#allocation4 + $0x668] sm:$0xff]  }
 0xbba   :  { %v3224_v34 = vpop.f32.mrf.mxu0 }
 0xbbb   :  { %v3225_v22 = vadd.f32 %v3224_v34, %v3144_v27  ;;  %v7292_v34 = vld [vmem:[#allocation4 + $0x660] sm:$0xff]  }
 0xbbc   :  { %v6715_v42 = vpop.f32.mrf.mxu0 }
 0xbd2   :  { %v6734_v47 = vpop.f32.mrf.mxu0 }
 0xbd3   :  { %v3345_v63 = vadd.f32 %v6734_v47, %v3225_v22 }
 0xbd4   :  { %v3329_v50 = vpop.f32.mrf.mxu0 }
 0xbd5   :  { %v3343_v24 = vadd.f32 %v3329_v50, %v3215_v29  ;;  %v7287_v29 = vld [vmem:[#allocation4 + $0x608] sm:$0xff]  }
 0xbd6   :  { %v6735_v51 = vpop.f32.mrf.mxu0 }
 0xbd8   :  { %v3332_v38 = vpop.f32.mrf.mxu0 }
 0xbd9   :  { %v3344_v44 = vadd.f32 %v3332_v38, %v3220_v32  ;;  %v7290_v32 = vld [vmem:[#allocation4 + $0x670] sm:$0xff]  }
 0xbda   :  { %6840 = vmatprep.subr.bf16.mxu1 %v7290_v32 }
 0xbdb   :  { %6841 = vmatpush3.bf16.msra.mxu1 %v7290_v32 }
 0xbdc   :  { %6842 = vmatprep.subr.bf16.mxu1 %v7291_v33 }
 0xbdf   :  { %6843 = vmatpush3.bf16.msra.mxu1 %v7291_v33  ;;  %v7305_v33 = vld [vmem:[#allocation4 + $0x6f8] sm:$0xff]  }
 0xbe0   :  { %6844 = vmatprep.subr.bf16.mxu1 %v7292_v34 }
 0xbe3   :  { %6845 = vmatpush3.bf16.msra.mxu1 %v7292_v34  ;;  %v7307_v34 = vld [vmem:[#allocation4 + $0x6e8] sm:$0xff]  }
 0xc4d   :  { %v3521_v46 = vpop.f32.mrf.mxu0 }
 0xc4e   :  { %v3535_v56 = vadd.f32 %v3521_v46, %v3343_v24  ;;  %v7293_v46 = vld [vmem:[#allocation4 + $0x658] sm:$0xff]  }
 0xc4f   :  { %v6760_v57 = vpop.f32.mrf.mxu0  ;;  %6846 = vmatprep.subr.bf16.mxu1 %v7293_v46 }
 0xc50   :  { %v3546_v39 = vadd.f32 %v5719_v54, %v3535_v56  ;;  %6847 = vmatpush3.bf16.msra.mxu1 %v7293_v46 }
 0xc51   :  { %v3526_v49 = vpop.f32.mrf.mxu0 }
 0xc52   :  { %v3536_v60 = vadd.f32 %v3526_v49, %v3344_v44  ;;  %v3552_v3 = vmul.f32 0.01, %v3546_v39  ;;  %vm3549_vm5 = vcmp.gt.f32.partialorder %v3546_v39, 0.0  ;;  %v5748_v44 = vld [vmem:[#allocation6 + $0xd] ss:$0 sm:$0xff] }
 0xc53   :  { %v6763_v62 = vpop.f32.mrf.mxu0 }
 0xc54   :  { %v3547_v2 = vadd.f32 %v5719_v54, %v3536_v60  ;;  %v3555_v35 = vsel %vm3549_vm5, %v3546_v39, %v3552_v3 }
 0xc55   :  { %v3531_v13 = vpop.f32.mrf.mxu0 }
 0xc56   :  { %vm3550_vm6 = vcmp.gt.f32.partialorder %v3547_v2, 0.0  ;;  %v3553_v14 = vmul.f32 0.01, %v3547_v2  ;;  %v3537_v5 = vadd.f32 %v3531_v13, %v3345_v63 }
 0xc57   :  { %v6766_v8 = vpop.f32.mrf.mxu0 }
 0xc58   :  { %v3548_v36 = vadd.f32 %v5719_v54, %v3537_v5  ;;  %v3556_v4 = vsel %vm3550_vm6, %v3547_v2, %v3553_v14  ;;  %v7295_v54 = vld [vmem:[#allocation4 + $0x648] sm:$0xff]  }
 0xc59   :  { %v3558_v20 = vpack.c.bf16 %v3556_v4, %v3555_v35 }
 0xc5a   :  { %vm3551_vm7 = vcmp.gt.f32.partialorder %v3548_v36, 0.0  ;;  %v3554_v10 = vmul.f32 0.01, %v3548_v36 }
 0xc5b   :  { %6783 = vmatprep.mubr.bf16.mxu0 %v3558_v20 }
 0xc5c   :  { %v3557_v9 = vsel %vm3551_vm7, %v3548_v36, %v3554_v10 }
 0xc5d   :  { %v3559_v12 = vpack.c.bf16 %v3557_v9, %v3557_v9  ;;  %v7297_v9 = vld [vmem:[#allocation4 + $0x6b8] sm:$0xff]  }
 0xc5f   :  { %6784 = vmatmul.mubr.bf16.vlgmr.msra.gmra.mxu0 %v3559_v12 }
 0xc60   :  { %6808 = vmatpush3.bf16.msra.mxu0 %v7281_v26 }
 0xc61   :  { %6809 = vmatprep.subr.bf16.mxu0 %v7282_v23 }
 0xc64   :  { %6810 = vmatpush3.bf16.msra.mxu0 %v7282_v23  ;;  %v7298_v23 = vld [vmem:[#allocation4 + $0x6b0] sm:$0xff]  }
 0xc65   :  { %6811 = vmatprep.subr.bf16.mxu0 %v7283_v15 }
 0xc68   :  { %6812 = vmatpush3.bf16.msra.mxu0 %v7283_v15  ;;  %v7299_v15 = vld [vmem:[#allocation4 + $0x6a8] sm:$0xff]  }
 0xc69   :  { %6813 = vmatprep.subr.bf16.mxu0 %v7284_v16 }
 0xc6c   :  { %6814 = vmatpush3.bf16.msra.mxu0 %v7284_v16  ;;  %v7300_v16 = vld [vmem:[#allocation4 + $0x6a0] sm:$0xff]  }
 0xc6d   :  { %v8021_v18 = vpop.f32.mrf.mxu1  ;;  %6815 = vmatprep.subr.bf16.mxu0 %v7285_v17 }
 0xc6f   :  { %v6831_v19 = vpop.f32.mrf.mxu1 }
 0xc70   :  { %6816 = vmatpush3.bf16.msra.mxu0 %v7285_v17  ;;  %v7301_v17 = vld [vmem:[#allocation4 + $0x698] sm:$0xff]   ;;  %v7303_v19 = vld [vmem:[#allocation4 + $0x688] sm:$0xff]  }
 0xc71   :  { %v8023_v27 = vpop.f32.mrf.mxu1  ;;  %6817 = vmatprep.subr.bf16.mxu0 %v7286_v25 }
 0xc73   :  { %v6834_v21 = vpop.f32.mrf.mxu1 }
 0xc74   :  { %6818 = vmatpush3.bf16.msra.mxu0 %v7286_v25  ;;  %v5749_v21 = vld [vmem:[#allocation6 + $0xe] ss:$0 sm:$0xff] }
 0xc75   :  { %v3977_v11 = vpop.f32.mrf.mxu1  ;;  %6819 = vmatprep.subr.bf16.mxu0 %v7287_v29 }
 0xc77   :  { %v6837_v28 = vpop.f32.mrf.mxu1 }
 0xc78   :  { %6820 = vmatpush3.bf16.msra.mxu0 %v7287_v29 }
 0xc79   :  { %6821 = vmatprep.subr.bf16.mxu0 %v7288_v31 }
 0xc7c   :  { %6822 = vmatpush3.bf16.msra.mxu0 %v7288_v31 }
 0xc7d   :  { %6858 = vmatprep.subr.mxu0 %v7452_v0 }
 0xd1f   :  { %v6785_v22 = vpop.f32.mrf.mxu0 }
 0xd20   :  { %v8026_v48 = vadd.f32 %v6785_v22, %v5720_v43  ;;  %v7308_v22 = vld [vmem:[#allocation4 + $0x6e0] sm:$0xff]  }
 0xd21   :  { %v3667_v42 = vpop.f32.mrf.mxu0 }
 0xd22   :  { %v3668_v63 = vadd.f32 %v5720_v43, %v3667_v42  ;;  %v3787_v26 = vpack.c.bf16 %v8026_v48, %v8026_v48  ;;  %v7309_v42 = vld [vmem:[#allocation4 + $0x6d8] sm:$0xff]  }
 0xd23   :  { %v6786_v47 = vpop.f32.mrf.mxu0 }
 0xd24   :  { %v8029_v51 = vadd.f32 %v3668_v63, %v7983_v53  ;;  %v7294_v53 = vld [vmem:[#allocation4 + $0x650] sm:$0xff]   ;;  %v7311_v47 = vld [vmem:[#allocation4 + $0x6c8] sm:$0xff]  }
 0xd25   :  { %v3670_v50 = vpop.f32.mrf.mxu0  ;;  %6848 = vmatprep.subr.bf16.mxu1 %v7294_v53 }
 0xd26   :  { %v3671_v24 = vadd.f32 %v5720_v43, %v3670_v50  ;;  %6849 = vmatpush3.bf16.msra.mxu1 %v7294_v53 }
 0xd27   :  { %6850 = vmatprep.subr.bf16.mxu1 %v7295_v54 }
 0xd28   :  { %v3786_v52 = vpack.c.bf16 %v3671_v24, %v3668_v63  ;;  %v8032_v7 = vadd.f32 %v3671_v24, %v7977_v40  ;;  %v7296_v40 = vld [vmem:[#allocation4 + $0x640] sm:$0xff]  }
 0xd2a   :  { %6823 = vmatprep.mubr.bf16.mxu0 %v3786_v52  ;;  %v5123_v38 = vpack.c.bf16 %v8032_v7, %v8029_v51  ;;  %6851 = vmatpush3.bf16.msra.mxu1 %v7295_v54  ;;  %v7312_v52 = vld [vmem:[#allocation4 + $0x6c0] sm:$0xff]   ;;  %v7313_v54 = vld [vmem:[#allocation4 + $0x738] sm:$0xff]   ;;  %v5121_v51 = vadd.f32 %v8026_v48, %v7993_v1  ;;  %v7346_v1 = vld [vmem:[#allocation4 + $0x7f0] sm:$0xff]  }
 0xd2b   :  { %6824 = vmatmul.mubr.bf16.vlgmr.msra.gmra.mxu0 %v3787_v26  ;;  %6852 = vmatprep.subr.bf16.mxu1 %v7296_v40 }
 0xd2c   :  { %6864 = vmatprep.mubr.msk.f32.mxu0 %vm7453_vm0, %v7452_v0  ;;  %v5124_v7 = vpack.c.bf16 %v5121_v51, %v5121_v51  ;;  %v7373_v51 = vld [vmem:[#allocation4 + $0x8d8] sm:$0xff]  }
 0xd2e   :  { %6853 = vmatpush3.bf16.msra.mxu1 %v7296_v40 }
 0xd2f   :  { %6887 = vmatprep.subr.bf16.mxu1 %v7452_v0 }
 0xdeb   :  { %v6825_v56 = vpop.f32.mrf.mxu0 }
 0xdec   :  { %v3978_v57 = vadd.f32 %v6825_v56, %v3977_v11  ;;  %v7314_v56 = vld [vmem:[#allocation4 + $0x730] sm:$0xff]  }
 0xded   :  { %v3887_v39 = vpop.f32.mrf.mxu0 }
 0xdee   :  { %v3968_v49 = vadd.f32 %v8021_v18, %v3887_v39  ;;  %v3991_v60 = vadd.f32 %v5748_v44, %v3978_v57  ;;  %v7302_v18 = vld [vmem:[#allocation4 + $0x690] sm:$0xff]   ;;  %v7315_v57 = vld [vmem:[#allocation4 + $0x728] sm:$0xff]  }
 0xdef   :  { %v6826_v62 = vpop.f32.mrf.mxu0  ;;  %v7318_v39 = vld [vmem:[#allocation4 + $0x710] sm:$0xff]  }
 0xdf0   :  { %v3989_v3 = vadd.f32 %v5748_v44, %v3968_v49  ;;  %v3997_v14 = vmul.f32 0.01, %v3991_v60  ;;  %vm3994_vm8 = vcmp.gt.f32.partialorder %v3991_v60, 0.0  ;;  %v7319_v49 = vld [vmem:[#allocation4 + $0x708] sm:$0xff]  }
 0xdf1   :  { %v3890_v2 = vpop.f32.mrf.mxu0 }
 0xdf2   :  { %v3973_v13 = vadd.f32 %v8023_v27, %v3890_v2  ;;  %v3995_v5 = vmul.f32 0.01, %v3989_v3  ;;  %vm3992_vm9 = vcmp.gt.f32.partialorder %v3989_v3, 0.0  ;;  %v4000_v35 = vsel %vm3994_vm8, %v3991_v60, %v3997_v14  ;;  %v7304_v27 = vld [vmem:[#allocation4 + $0x680] sm:$0xff]   ;;  %v7321_v14 = vld [vmem:[#allocation4 + $0x778] sm:$0xff]  }
 0xdf3   :  { %v4002_v12 = vpack.c.bf16 %v4000_v35, %v4000_v35  ;;  %v7320_v60 = vld [vmem:[#allocation4 + $0x700] sm:$0xff]  }
 0xdf4   :  { %v3990_v8 = vadd.f32 %v5748_v44, %v3973_v13  ;;  %v3998_v4 = vsel %vm3992_vm9, %v3989_v3, %v3995_v5  ;;  %v7316_v44 = vld [vmem:[#allocation4 + $0x720] sm:$0xff]  }
 0xdf6   :  { %vm3993_vm10 = vcmp.gt.f32.partialorder %v3990_v8, 0.0  ;;  %v3996_v36 = vmul.f32 0.01, %v3990_v8 }
 0xdf8   :  { %v3999_v20 = vsel %vm3993_vm10, %v3990_v8, %v3996_v36  ;;  %v7322_v36 = vld [vmem:[#allocation4 + $0x770] sm:$0xff]  }
 0xdf9   :  { %v4001_v10 = vpack.c.bf16 %v3999_v20, %v3998_v4  ;;  %v7323_v20 = vld [vmem:[#allocation4 + $0x768] sm:$0xff]  }
 0xdfb   :  { %6854 = vmatprep.mubr.bf16.mxu1 %v4001_v10  ;;  %v7324_v10 = vld [vmem:[#allocation4 + $0x760] sm:$0xff]  }
 0xdfc   :  { %6855 = vmatmul.mubr.bf16.vlgmr.msra.gmra.mxu1 %v4002_v12  ;;  %v7327_v12 = vld [vmem:[#allocation4 + $0x748] sm:$0xff]  }
 0xdfd   :  { %6888 = vmatpush3.bf16.msra.mxu1 %v7297_v9  ;;  %6903 = vmatprep.mubr.msk.bf16.mxu1 %vm7453_vm0, %v7452_v0  ;;  %v7326_v9 = vld [vmem:[#allocation4 + $0x750] sm:$0xff]  }
 0xdfe   :  { %6889 = vmatprep.subr.bf16.mxu1 %v7452_v0 }
 0xe01   :  { %6890 = vmatpush3.bf16.msra.mxu1 %v7298_v23  ;;  %v7328_v23 = vld [vmem:[#allocation4 + $0x740] sm:$0xff]  }
 0xe02   :  { %6891 = vmatprep.subr.bf16.mxu1 %v7452_v0 }
 0xe05   :  { %6892 = vmatpush3.bf16.msra.mxu1 %v7299_v15 }
 0xe06   :  { %6893 = vmatprep.subr.bf16.mxu1 %v7452_v0 }
 0xe09   :  { %6894 = vmatpush3.bf16.msra.mxu1 %v7300_v16 }
 0xe0a   :  { %6895 = vmatprep.subr.bf16.mxu1 %v7452_v0 }
 0xe0d   :  { %6896 = vmatpush3.bf16.msra.mxu1 %v7301_v17  ;;  %v5785_v17 = vld [vmem:[#allocation6 + $0xf] ss:$0 sm:$0xff] }
 0xe0e   :  { %6897 = vmatprep.subr.bf16.mxu1 %v7452_v0 }
 0xe11   :  { %6898 = vmatpush3.bf16.msra.mxu1 %v7302_v18 }
 0xe12   :  { %6899 = vmatprep.subr.bf16.mxu1 %v7452_v0 }
 0xe15   :  { %6900 = vmatpush3.bf16.msra.mxu1 %v7303_v19 }
 0xe16   :  { %6901 = vmatprep.subr.bf16.mxu1 %v7452_v0 }
 0xe19   :  { %6902 = vmatpush3.bf16.msra.mxu1 %v7304_v27 }
 0xe1a   :  { %6927 = vmatprep.subr.mxu1 %v7452_v0 }
 0xe1c   :  { %6904 = vmatmul.mubr.bf16.vlgmr.msra.gmra.mxu1 %v7885_v58  ;;  %v7306_v58 = vld [vmem:[#allocation4 + $0x6f0] sm:$0xff]  }
 0xe1d   :  { %6929 = vmatprep.mubr.msk.f32.mxu1 %vm7453_vm0, %v7452_v0 }
 0xebc   :  { %v6856_v11 = vpop.f32.mrf.mxu1 }
 0xebd   :  { %v4119_v28 = vadd.f32 %v6856_v11, %v5749_v21 }
 0xebe   :  { %v4110_v25 = vpop.f32.mrf.mxu1 }
 0xebf   :  { %6859 = vmatpush3.msra.mxu0 %v4119_v28  ;;  %v4111_v32 = vadd.f32 %v5749_v21, %v4110_v25  ;;  %v7329_v28 = vld [vmem:[#allocation4 + $0x7b8] sm:$0xff]  }
 0xec0   :  { %v6857_v29 = vpop.f32.mrf.mxu1  ;;  %6860 = vmatprep.subr.mxu0 %v7452_v0 }
 0xec1   :  { %v7330_v29 = vld [vmem:[#allocation4 + $0x7b0] sm:$0xff]  }
 0xec2   :  { %v4113_v31 = vpop.f32.mrf.mxu1 }
 0xec3   :  { %v4114_v59 = vadd.f32 %v5749_v21, %v4113_v31  ;;  %v7331_v31 = vld [vmem:[#allocation4 + $0x7a8] sm:$0xff]  }
 0xec5   :  { %6861 = vmatpush3.msra.mxu0 %v4114_v59  ;;  %v7332_v59 = vld [vmem:[#allocation4 + $0x7a0] sm:$0xff]  }
 0xec6   :  { %6862 = vmatprep.subr.mxu0 %v7452_v0 }
 0xec7   :  { %6863 = vmatpush3.msra.mxu0 %v4111_v32  ;;  %v7333_v32 = vld [vmem:[#allocation4 + $0x798] sm:$0xff]  }
 0xec8   :  { %6865 = vmatmul.mubr.msk.f32.vlgmr.msra.gmra.mxu0 %vm162_vm11, %v7799_v61  ;;  %6867 = vmatprep.subr.bf16.mxu0 %v7452_v0  ;;  %v7310_v61 = vld [vmem:[#allocation4 + $0x6d0] sm:$0xff]  }
 0xec9   :  { %6868 = vmatpush3.bf16.msra.mxu0 %v7305_v33  ;;  %6883 = vmatprep.mubr.msk.bf16.mxu0 %vm7453_vm0, %v7452_v0  ;;  %v7334_v33 = vld [vmem:[#allocation4 + $0x790] sm:$0xff]  }
 0xeca   :  { %6869 = vmatprep.subr.bf16.mxu0 %v7452_v0 }
 0xecd   :  { %6870 = vmatpush3.bf16.msra.mxu0 %v7306_v58  ;;  %v7335_v58 = vld [vmem:[#allocation4 + $0x788] sm:$0xff]  }
 0xece   :  { %6871 = vmatprep.subr.bf16.mxu0 %v7452_v0 }
 0xed1   :  { %6872 = vmatpush3.bf16.msra.mxu0 %v7307_v34  ;;  %v7336_v34 = vld [vmem:[#allocation4 + $0x780] sm:$0xff]  }
 0xed2   :  { %6873 = vmatprep.subr.bf16.mxu0 %v7452_v0 }
 0xed5   :  { %6874 = vmatpush3.bf16.msra.mxu0 %v7308_v22  ;;  %v7337_v22 = vld [vmem:[#allocation4 + $0x878] sm:$0xff]  }
 0xed6   :  { %6875 = vmatprep.subr.bf16.mxu0 %v7452_v0 }
 0xed9   :  { %6876 = vmatpush3.bf16.msra.mxu0 %v7309_v42  ;;  %v7338_v42 = vld [vmem:[#allocation4 + $0x870] sm:$0xff]  }
 0xeda   :  { %6877 = vmatprep.subr.bf16.mxu0 %v7452_v0 }
 0xedc   :  { %v8068_v43 = vpop.f32.mrf.mxu1 }
 0xedd   :  { %6878 = vmatpush3.bf16.msra.mxu0 %v7310_v61  ;;  %v7339_v61 = vld [vmem:[#allocation4 + $0x868] sm:$0xff]  }
 0xede   :  { %v6905_v63 = vpop.f32.mrf.mxu1  ;;  %6879 = vmatprep.subr.bf16.mxu0 %v7452_v0 }
 0xedf   :  { %v7342_v63 = vld [vmem:[#allocation4 + $0x850] sm:$0xff]  }
 0xee0   :  { %v4403_v50 = vpop.f32.mrf.mxu1 }
 0xee1   :  { %6880 = vmatpush3.bf16.msra.mxu0 %v7311_v47  ;;  %v7341_v47 = vld [vmem:[#allocation4 + $0x858] sm:$0xff]   ;;  %v7343_v50 = vld [vmem:[#allocation4 + $0x848] sm:$0xff]  }
 0xee2   :  { %v6906_v24 = vpop.f32.mrf.mxu1  ;;  %6881 = vmatprep.subr.bf16.mxu0 %v7452_v0 }
 0xee5   :  { %6882 = vmatpush3.bf16.msra.mxu0 %v7312_v52 }
 0xee6   :  { %6907 = vmatprep.subr.bf16.mxu0 %v7452_v0 }
 0xf88   :  { %v4190_v26 = vpop.f32.mrf.mxu0 }
 0xf89   :  { %v4194_v46 = vmul.f32 %v7820_v37, %v4190_v26  ;;  %v7317_v37 = vld [vmem:[#allocation4 + $0x718] sm:$0xff]  }
 0xf8a   :  { %v6866_v53 = vpop.f32.mrf.mxu0  ;;  %v7345_v26 = vld [vmem:[#allocation4 + $0x7f8] sm:$0xff]  }
 0xf8b   :  { %v4212_v40 = vpack.c.bf16 %v4194_v46, %v4194_v46 }
 0xf8d   :  { %6884 = vmatmul.mubr.bf16.vlgmr.msra.gmra.mxu0 %v4212_v40  ;;  %v7348_v40 = vld [vmem:[#allocation4 + $0x7e0] sm:$0xff]  }
 0xf8e   :  { %6908 = vmatpush3.bf16.msra.mxu0 %v7313_v54  ;;  %6923 = vmatprep.mubr.msk.bf16.mxu0 %vm7453_vm0, %v7452_v0  ;;  %v7347_v54 = vld [vmem:[#allocation4 + $0x7e8] sm:$0xff]  }
 0xf8f   :  { %6909 = vmatprep.subr.bf16.mxu0 %v7452_v0 }
 0xf92   :  { %6910 = vmatpush3.bf16.msra.mxu0 %v7314_v56  ;;  %v7350_v56 = vld [vmem:[#allocation4 + $0x7d0] sm:$0xff]  }
 0xf93   :  { %6911 = vmatprep.subr.bf16.mxu0 %v7452_v0 }
 0xf96   :  { %6912 = vmatpush3.bf16.msra.mxu0 %v7315_v57  ;;  %v7351_v57 = vld [vmem:[#allocation4 + $0x7c8] sm:$0xff]  }
 0xf97   :  { %6913 = vmatprep.subr.bf16.mxu0 %v7452_v0 }
 0xf9a   :  { %6914 = vmatpush3.bf16.msra.mxu0 %v7316_v44 }
 0xf9b   :  { %6915 = vmatprep.subr.bf16.mxu0 %v7452_v0 }
 0xf9e   :  { %6916 = vmatpush3.bf16.msra.mxu0 %v7317_v37 }
 0xf9f   :  { %6917 = vmatprep.subr.bf16.mxu0 %v7452_v0 }
 0xfa2   :  { %6918 = vmatpush3.bf16.msra.mxu0 %v7318_v39 }
 0xfa3   :  { %6919 = vmatprep.subr.bf16.mxu0 %v7452_v0 }
 0xfa6   :  { %6920 = vmatpush3.bf16.msra.mxu0 %v7319_v49 }
 0xfa7   :  { %6921 = vmatprep.subr.bf16.mxu0 %v7452_v0 }
 0xfaa   :  { %6922 = vmatpush3.bf16.msra.mxu0 %v7320_v60  ;;  %v5822_v60 = vld [vmem:[#allocation6 + $0x13] ss:$0 sm:$0xff] }
 0xfab   :  { %6952 = vmatprep.subr.mxu0 %v7452_v0 }
 0xfad   :  { %6924 = vmatmul.mubr.bf16.vlgmr.msra.gmra.mxu0 %v7941_v45 }
 0xfae   :  { %6954 = vmatprep.mubr.msk.f32.mxu0 %vm7453_vm0, %v7452_v0 }
0x104d   :  { %v4312_v62 = vpop.f32.mrf.mxu0 }
0x104e   :  { %v4401_v15 = vadd.f32 %v8068_v43, %v4312_v62  ;;  %v7340_v43 = vld [vmem:[#allocation4 + $0x860] sm:$0xff]  }
0x104f   :  { %v6885_v3 = vpop.f32.mrf.mxu0 }
0x1051   :  { %v4315_v2 = vpop.f32.mrf.mxu0 }
0x1053   :  { %v6886_v13 = vpop.f32.mrf.mxu0 }
0x106d   :  { %v4505_v5 = vpop.f32.mrf.mxu0 }
0x106e   :  { %6928 = vmatpush3.msk.msra.mxu1 %vm1173_vm13, %v4505_v5  ;;  %v7352_v5 = vld [vmem:[#allocation4 + $0x7c0] sm:$0xff]  }
0x106f   :  { %v6925_v8 = vpop.f32.mrf.mxu0  ;;  %6930 = vmatmul.mubr.msk.f32.vlgmr.msra.gmra.mxu1 %vm1163_vm15, %v7838_v6  ;;  %6932 = vmatprep.subr.bf16.mxu1 %v7452_v0  ;;  %v7325_v6 = vld [vmem:[#allocation4 + $0x758] sm:$0xff]  }
0x1070   :  { %6933 = vmatpush3.bf16.msra.mxu1 %v7321_v14  ;;  %6948 = vmatprep.mubr.msk.bf16.mxu1 %vm7453_vm0, %v7452_v0 }
0x1071   :  { %v4508_v35 = vpop.f32.mrf.mxu0  ;;  %6934 = vmatprep.subr.bf16.mxu1 %v7452_v0 }
0x1073   :  { %v6926_v4 = vpop.f32.mrf.mxu0 }
0x1074   :  { %6935 = vmatpush3.bf16.msra.mxu1 %v7322_v36 }
0x1075   :  { %6936 = vmatprep.subr.bf16.mxu1 %v7452_v0 }
0x1078   :  { %6937 = vmatpush3.bf16.msra.mxu1 %v7323_v20 }
0x1079   :  { %6938 = vmatprep.subr.bf16.mxu1 %v7452_v0 }
0x107c   :  { %6939 = vmatpush3.bf16.msra.mxu1 %v7324_v10  ;;  %v7353_v10 = vld [vmem:[#allocation4 + $0x838] sm:$0xff]  }
0x107d   :  { %6940 = vmatprep.subr.bf16.mxu1 %v7452_v0 }
0x1080   :  { %6941 = vmatpush3.bf16.msra.mxu1 %v7325_v6 }
0x1081   :  { %6942 = vmatprep.subr.bf16.mxu1 %v7452_v0 }
0x1084   :  { %6943 = vmatpush3.bf16.msra.mxu1 %v7326_v9  ;;  %v7354_v9 = vld [vmem:[#allocation4 + $0x830] sm:$0xff]  }
0x1085   :  { %6944 = vmatprep.subr.bf16.mxu1 %v7452_v0 }
0x1088   :  { %6945 = vmatpush3.bf16.msra.mxu1 %v7327_v12  ;;  %v7355_v12 = vld [vmem:[#allocation4 + $0x828] sm:$0xff]  }
0x1089   :  { %6946 = vmatprep.subr.bf16.mxu1 %v7452_v0 }
0x108c   :  { %6947 = vmatpush3.bf16.msra.mxu1 %v7328_v23  ;;  %v7356_v23 = vld [vmem:[#allocation4 + $0x820] sm:$0xff]  }
0x108d   :  { %6977 = vmatprep.subr.bf16.mxu1 %v7452_v0 }
0x112f   :  { %v4580_v16 = vpop.f32.mrf.mxu1 }
0x1130   :  { %v4584_v18 = vadd.f32 %v4580_v16, %v4401_v15  ;;  %v7358_v15 = vld [vmem:[#allocation4 + $0x810] sm:$0xff]   ;;  %v7359_v16 = vld [vmem:[#allocation4 + $0x808] sm:$0xff]  }
0x1131   :  { %v6931_v19 = vpop.f32.mrf.mxu1 }
0x1132   :  { %v4593_v27 = vadd.f32 %v5785_v17, %v4584_v18  ;;  %v7360_v17 = vld [vmem:[#allocation4 + $0x800] sm:$0xff]   ;;  %v5812_v19 = vld [vmem:[#allocation6 + $0x11] ss:$0 sm:$0xff] }
0x1134   :  { %vm4594_vm13 = vcmp.gt.f32.partialorder %v4593_v27, 0.0  ;;  %v4595_v21 = vmul.f32 0.01, %v4593_v27 }
0x1136   :  { %v4596_v11 = vsel %vm4594_vm13, %v4593_v27, %v4595_v21 }
0x1137   :  { %v4597_v25 = vpack.c.bf16 %v4596_v11, %v4596_v11 }
0x1139   :  { %6949 = vmatmul.mubr.bf16.vlgmr.msra.gmra.mxu1 %v4597_v25 }
0x113a   :  { %6978 = vmatpush3.bf16.msra.mxu1 %v7329_v28  ;;  %6993 = vmatprep.mubr.msk.bf16.mxu1 %vm7453_vm0, %v7452_v0 }
0x113b   :  { %6979 = vmatprep.subr.bf16.mxu1 %v7452_v0 }
0x113e   :  { %6980 = vmatpush3.bf16.msra.mxu1 %v7330_v29 }
0x113f   :  { %6981 = vmatprep.subr.bf16.mxu1 %v7452_v0 }
0x1142   :  { %6982 = vmatpush3.bf16.msra.mxu1 %v7331_v31 }
0x1143   :  { %6983 = vmatprep.subr.bf16.mxu1 %v7452_v0 }
0x1146   :  { %6984 = vmatpush3.bf16.msra.mxu1 %v7332_v59  ;;  %v7361_v59 = vld [vmem:[#allocation4 + $0x8b8] sm:$0xff]  }
0x1147   :  { %6985 = vmatprep.subr.bf16.mxu1 %v7452_v0 }
0x114a   :  { %6986 = vmatpush3.bf16.msra.mxu1 %v7333_v32 }
0x114b   :  { %6987 = vmatprep.subr.bf16.mxu1 %v7452_v0 }
0x114e   :  { %6988 = vmatpush3.bf16.msra.mxu1 %v7334_v33  ;;  %v7362_v33 = vld [vmem:[#allocation4 + $0x8b0] sm:$0xff]  }
0x114f   :  { %6989 = vmatprep.subr.bf16.mxu1 %v7452_v0 }
0x1152   :  { %6990 = vmatpush3.bf16.msra.mxu1 %v7335_v58  ;;  %v7363_v58 = vld [vmem:[#allocation4 + $0x8a8] sm:$0xff]  }
0x1153   :  { %6991 = vmatprep.subr.bf16.mxu1 %v7452_v0 }
0x1156   :  { %6992 = vmatpush3.bf16.msra.mxu1 %v7336_v34  ;;  %v7364_v34 = vld [vmem:[#allocation4 + $0x8a0] sm:$0xff]  }
0x1157   :  { %7017 = vmatprep.subr.bf16.mxu1 %v7337_v22 }
0x1159   :  { %6994 = vmatmul.mubr.bf16.vlgmr.msra.gmra.mxu1 %v7941_v45  ;;  %v7344_v45 = vld [vmem:[#allocation4 + $0x840] sm:$0xff]  }
0x115a   :  { %7018 = vmatpush3.bf16.msra.mxu1 %v7337_v22  ;;  %7033 = vmatprep.mubr.bf16.mxu1 %v5123_v38  ;;  %v5786_v38 = vld [vmem:[#allocation6 + $0x10] ss:$0 sm:$0xff]  ;;  %v7365_v22 = vld [vmem:[#allocation4 + $0x898] sm:$0xff]  }
0x115b   :  { %7019 = vmatprep.subr.bf16.mxu1 %v7338_v42 }
0x115e   :  { %7020 = vmatpush3.bf16.msra.mxu1 %v7338_v42  ;;  %v7366_v42 = vld [vmem:[#allocation4 + $0x890] sm:$0xff]  }
0x115f   :  { %7021 = vmatprep.subr.bf16.mxu1 %v7339_v61 }
0x1162   :  { %7022 = vmatpush3.bf16.msra.mxu1 %v7339_v61  ;;  %v7367_v61 = vld [vmem:[#allocation4 + $0x888] sm:$0xff]  }
0x1163   :  { %7023 = vmatprep.subr.bf16.mxu1 %v7340_v43 }
0x1166   :  { %7024 = vmatpush3.bf16.msra.mxu1 %v7340_v43  ;;  %v7368_v43 = vld [vmem:[#allocation4 + $0x880] sm:$0xff]  }
0x1167   :  { %7025 = vmatprep.subr.bf16.mxu1 %v7341_v47 }
0x116a   :  { %7026 = vmatpush3.bf16.msra.mxu1 %v7341_v47  ;;  %v7369_v47 = vld [vmem:[#allocation4 + $0x8f8] sm:$0xff]  }
0x116b   :  { %7027 = vmatprep.subr.bf16.mxu1 %v7342_v63 }
0x116e   :  { %7028 = vmatpush3.bf16.msra.mxu1 %v7342_v63  ;;  %v7370_v63 = vld [vmem:[#allocation4 + $0x8f0] sm:$0xff]  }
0x116f   :  { %7029 = vmatprep.subr.bf16.mxu1 %v7343_v50 }
0x1172   :  { %7030 = vmatpush3.bf16.msra.mxu1 %v7343_v50  ;;  %v7371_v50 = vld [vmem:[#allocation4 + $0x8e8] sm:$0xff]  }
0x1173   :  { %7031 = vmatprep.subr.bf16.mxu1 %v7344_v45 }
0x1176   :  { %7032 = vmatpush3.bf16.msra.mxu1 %v7344_v45  ;;  %v7372_v45 = vld [vmem:[#allocation4 + $0x8e0] sm:$0xff]  }
0x1177   :  { %7057 = vmatprep.subr.bf16.mxu1 %v7452_v0 }
0x1179   :  { %7034 = vmatmul.mubr.bf16.vlgmr.msra.gmra.mxu1 %v5124_v7  ;;  %v7374_v7 = vld [vmem:[#allocation4 + $0x8d0] sm:$0xff]  }
0x117a   :  { %7073 = vmatprep.mubr.msk.bf16.mxu1 %vm7453_vm0, %v7452_v0  ;;  %7058 = vmatpush3.bf16.msra.mxu1 %v7369_v47 }
0x117b   :  { %7059 = vmatprep.subr.bf16.mxu1 %v7452_v0 }
0x117e   :  { %7060 = vmatpush3.bf16.msra.mxu1 %v7370_v63 }
0x117f   :  { %7061 = vmatprep.subr.bf16.mxu1 %v7452_v0 }
0x1182   :  { %7062 = vmatpush3.bf16.msra.mxu1 %v7371_v50 }
0x1183   :  { %7063 = vmatprep.subr.bf16.mxu1 %v7452_v0 }
0x1186   :  { %7064 = vmatpush3.bf16.msra.mxu1 %v7372_v45 }
0x1187   :  { %7065 = vmatprep.subr.bf16.mxu1 %v7452_v0 }
0x118a   :  { %7066 = vmatpush3.bf16.msra.mxu1 %v7373_v51 }
0x118b   :  { %7067 = vmatprep.subr.bf16.mxu1 %v7452_v0 }
0x118e   :  { %7068 = vmatpush3.bf16.msra.mxu1 %v7374_v7 }
0x118f   :  { %7069 = vmatprep.subr.bf16.mxu1 %v7452_v0 }
0x11f9   :  { %v4705_v24 = vpop.f32.mrf.mxu1 }
0x11fa   :  { %v4706_v52 = vadd.f32 %v5786_v38, %v4705_v24  ;;  %v5813_v38 = vld [vmem:[#allocation6 + $0x12] ss:$0 sm:$0xff] }
0x11fb   :  { %v6950_v46 = vpop.f32.mrf.mxu1 }
0x11fc   :  { %6953 = vmatpush3.msra.mxu0 %v4706_v52 }
0x11fd   :  { %v4708_v53 = vpop.f32.mrf.mxu1  ;;  %6955 = vmatmul.mubr.msk.f32.vlgmr.msra.gmra.mxu0 %vm760_vm4, %v7878_v55  ;;  %6957 = vmatprep.subr.bf16.mxu0 %v7452_v0  ;;  %v7349_v55 = vld [vmem:[#allocation4 + $0x7d8] sm:$0xff]  }
0x11fe   :  { %6958 = vmatpush3.bf16.msra.mxu0 %v7345_v26  ;;  %6973 = vmatprep.mubr.msk.bf16.mxu0 %vm7453_vm0, %v7452_v0 }
0x11ff   :  { %v6951_v48 = vpop.f32.mrf.mxu1  ;;  %6959 = vmatprep.subr.bf16.mxu0 %v7452_v0 }
0x1202   :  { %6960 = vmatpush3.bf16.msra.mxu0 %v7346_v1 }
0x1203   :  { %6961 = vmatprep.subr.bf16.mxu0 %v7452_v0 }
0x1206   :  { %6962 = vmatpush3.bf16.msra.mxu0 %v7347_v54  ;;  %v7375_v54 = vld [vmem:[#allocation4 + $0x8c8] sm:$0xff]  }
0x1207   :  { %6963 = vmatprep.subr.bf16.mxu0 %v7452_v0  ;;  %7070 = vmatpush3.bf16.msra.mxu1 %v7375_v54 }
0x1208   :  { %7071 = vmatprep.subr.bf16.mxu1 %v7452_v0 }
0x120a   :  { %6964 = vmatpush3.bf16.msra.mxu0 %v7348_v40  ;;  %v7376_v40 = vld [vmem:[#allocation4 + $0x8c0] sm:$0xff]  }
0x120b   :  { %6965 = vmatprep.subr.bf16.mxu0 %v7452_v0  ;;  %7072 = vmatpush3.bf16.msra.mxu1 %v7376_v40 }
0x120e   :  { %6966 = vmatpush3.bf16.msra.mxu0 %v7349_v55  ;;  %v5831_v55 = vld [vmem:[#allocation6 + $0x14] ss:$0 sm:$0xff] }
0x120f   :  { %6967 = vmatprep.subr.bf16.mxu0 %v7452_v0 }
0x1212   :  { %6968 = vmatpush3.bf16.msra.mxu0 %v7350_v56 }
0x1213   :  { %6969 = vmatprep.subr.bf16.mxu0 %v7452_v0 }
0x1216   :  { %6970 = vmatpush3.bf16.msra.mxu0 %v7351_v57 }
0x1217   :  { %6971 = vmatprep.subr.bf16.mxu0 %v7452_v0 }
0x1219   :  { %v4987_v44 = vpop.f32.mrf.mxu1 }
0x121a   :  { %6972 = vmatpush3.bf16.msra.mxu0 %v7352_v5 }
0x121b   :  { %v6995_v37 = vpop.f32.mrf.mxu1  ;;  %6997 = vmatprep.subr.bf16.mxu0 %v7452_v0 }
0x121d   :  { %v4990_v39 = vpop.f32.mrf.mxu1 }
0x121f   :  { %v6996_v49 = vpop.f32.mrf.mxu1 }
0x1239   :  { %v7035_v62 = vpop.f32.mrf.mxu1 }
0x123a   :  { %v5241_v3 = vadd.f32 %v7035_v62, %v5822_v60  ;;  %v5840_v62 = vld [vmem:[#allocation6 + $0x15] ss:$0 sm:$0xff] }
0x123b   :  { %v5232_v2 = vpop.f32.mrf.mxu1 }
0x123c   :  { %5248 = vst [vmem:[%s8184_s11 + $0x10] sm:$0xff] %v5241_v3  ;;  %v5233_v13 = vadd.f32 %v5822_v60, %v5232_v2 }
0x123d   :  { %v7036_v14 = vpop.f32.mrf.mxu1 }
0x123e   :  { %5246 = vst [vmem:[%s8184_s11] sm:$0xff] %v5233_v13 }
0x123f   :  { %v5235_v8 = vpop.f32.mrf.mxu1 }
0x1240   :  { %v5236_v36 = vadd.f32 %v5822_v60, %v5235_v8 }
0x1242   :  { %5247 = vst [vmem:[%s8184_s11 + $0x8] sm:$0xff] %v5236_v36 }
0x12bd   :  { %v4777_v35 = vpop.f32.mrf.mxu0 }
0x12be   :  { %v4781_v4 = vmul.f32 %v7900_v30, %v4777_v35  ;;  %v7357_v30 = vld [vmem:[#allocation4 + $0x818] sm:$0xff]  }
0x12bf   :  { %v6956_v20 = vpop.f32.mrf.mxu0 }
0x12c0   :  { %v4799_v6 = vpack.c.bf16 %v4781_v4, %v4781_v4 }
0x12c2   :  { %6974 = vmatmul.mubr.bf16.vlgmr.msra.gmra.mxu0 %v4799_v6 }
0x12c3   :  { %6998 = vmatpush3.bf16.msra.mxu0 %v7353_v10  ;;  %7013 = vmatprep.mubr.msk.bf16.mxu0 %vm7453_vm0, %v7452_v0 }
0x12c4   :  { %6999 = vmatprep.subr.bf16.mxu0 %v7452_v0 }
0x12c7   :  { %7000 = vmatpush3.bf16.msra.mxu0 %v7354_v9 }
0x12c8   :  { %7001 = vmatprep.subr.bf16.mxu0 %v7452_v0 }
0x12cb   :  { %7002 = vmatpush3.bf16.msra.mxu0 %v7355_v12 }
0x12cc   :  { %7003 = vmatprep.subr.bf16.mxu0 %v7452_v0 }
0x12cf   :  { %7004 = vmatpush3.bf16.msra.mxu0 %v7356_v23 }
0x12d0   :  { %7005 = vmatprep.subr.bf16.mxu0 %v7452_v0 }
0x12d3   :  { %7006 = vmatpush3.bf16.msra.mxu0 %v7357_v30 }
0x12d4   :  { %7007 = vmatprep.subr.bf16.mxu0 %v7452_v0 }
0x12d7   :  { %7008 = vmatpush3.bf16.msra.mxu0 %v7358_v15 }
0x12d8   :  { %7009 = vmatprep.subr.bf16.mxu0 %v7452_v0 }
0x12db   :  { %7010 = vmatpush3.bf16.msra.mxu0 %v7359_v16 }
0x12dc   :  { %7011 = vmatprep.subr.bf16.mxu0 %v7452_v0 }
0x12df   :  { %7012 = vmatpush3.bf16.msra.mxu0 %v7360_v17 }
0x12e0   :  { %7037 = vmatprep.subr.bf16.mxu0 %v7452_v0 }
0x1382   :  { %v4899_v18 = vpop.f32.mrf.mxu0 }
0x1383   :  { %v4988_v27 = vadd.f32 %v4987_v44, %v4899_v18 }
0x1384   :  { %v6975_v21 = vpop.f32.mrf.mxu0 }
0x1385   :  { %v5001_v11 = vadd.f32 %v5812_v19, %v4988_v27 }
0x1386   :  { %v4902_v28 = vpop.f32.mrf.mxu0 }
0x1387   :  { %vm5002_vm4 = vcmp.gt.f32.partialorder %v5001_v11, 0.0  ;;  %v5003_v25 = vmul.f32 0.01, %v5001_v11 }
0x1388   :  { %v6976_v29 = vpop.f32.mrf.mxu0 }
0x1389   :  { %v5004_v31 = vsel %vm5002_vm4, %v5001_v11, %v5003_v25 }
0x138a   :  { %v5005_v32 = vpack.c.bf16 %v5004_v31, %v5004_v31 }
0x138c   :  { %7014 = vmatmul.mubr.bf16.vlgmr.msra.gmra.mxu0 %v5005_v32 }
0x138d   :  { %7038 = vmatpush3.bf16.msra.mxu0 %v7361_v59  ;;  %7053 = vmatprep.mubr.msk.bf16.mxu0 %vm7453_vm0, %v7452_v0 }
0x138e   :  { %7039 = vmatprep.subr.bf16.mxu0 %v7452_v0 }
0x1391   :  { %7040 = vmatpush3.bf16.msra.mxu0 %v7362_v33 }
0x1392   :  { %7041 = vmatprep.subr.bf16.mxu0 %v7452_v0 }
0x1395   :  { %7042 = vmatpush3.bf16.msra.mxu0 %v7363_v58 }
0x1396   :  { %7043 = vmatprep.subr.bf16.mxu0 %v7452_v0 }
0x1399   :  { %7044 = vmatpush3.bf16.msra.mxu0 %v7364_v34 }
0x139a   :  { %7045 = vmatprep.subr.bf16.mxu0 %v7452_v0 }
0x139d   :  { %7046 = vmatpush3.bf16.msra.mxu0 %v7365_v22 }
0x139e   :  { %7047 = vmatprep.subr.bf16.mxu0 %v7452_v0 }
0x13a1   :  { %7048 = vmatpush3.bf16.msra.mxu0 %v7366_v42 }
0x13a2   :  { %7049 = vmatprep.subr.bf16.mxu0 %v7452_v0 }
0x13a5   :  { %7050 = vmatpush3.bf16.msra.mxu0 %v7367_v61 }
0x13a6   :  { %7051 = vmatprep.subr.bf16.mxu0 %v7452_v0 }
0x13a9   :  { %7052 = vmatpush3.bf16.msra.mxu0 %v7368_v43 }
0x144c   :  { %v5113_v24 = vpop.f32.mrf.mxu0 }
0x144d   :  { %v5114_v52 = vadd.f32 %v5813_v38, %v5113_v24 }
0x144e   :  { %v7015_v26 = vpop.f32.mrf.mxu0 }
0x144f   :  { %v5122_v46 = vadd.f32 %v5114_v52, %v7937_v41 }
0x1450   :  { %v5116_v53 = vpop.f32.mrf.mxu0 }
0x1451   :  { %v5249_v1 = vpack.c.bf16 %v5122_v46, %v5122_v46 }
0x1452   :  { %v7016_v48 = vpop.f32.mrf.mxu0 }
0x1453   :  { %7054 = vmatmul.mubr.bf16.vlgmr.msra.gmra.mxu0 %v5249_v1 }
0x1513   :  { %v5357_v56 = vpop.f32.mrf.mxu0 }
0x1514   :  { %v5358_v57 = vadd.f32 %v5831_v55, %v5357_v56 }
0x1515   :  { %v7055_v44 = vpop.f32.mrf.mxu0 }
0x1516   :  { %vm5363_vm0 = vcmp.gt.f32.partialorder %v5358_v57, 0.0  ;;  %v5364_v37 = vmul.f32 0.01, %v5358_v57 }
0x1517   :  { %v5360_v39 = vpop.f32.mrf.mxu0 }
0x1518   :  { %v5365_v49 = vsel %vm5363_vm0, %v5358_v57, %v5364_v37 }
0x1519   :  { %v5366_v60 = vpack.c.bf16 %v5365_v49, %v5365_v49  ;;  %v7056_v41 = vpop.f32.mrf.mxu0 }
0x151b   :  { %7074 = vmatmul.mubr.bf16.vlgmr.msra.gmra.mxu1 %v5366_v60 }
0x15db   :  { %v5474_v3 = vpop.f32.mrf.mxu1 }
0x15dc   :  { %v5475_v2 = vadd.f32 %v5840_v62, %v5474_v3 }
0x15dd   :  { %v7075_v13 = vpop.f32.mrf.mxu1 }
0x15de   :  { %5480 = vst [vmem:[%s8185_s12] sm:$0x3] %v5475_v2 }
0x15df   :  { %v5477_v0 = vpop.f32.mrf.mxu1 }
0x15e1   :  { %v7076_v14 = vpop.f32.mrf.mxu1 }
0x15e2   :  { %5489 = vsyncpa [#allocation3], 1 }
0x15e3   :  { %5490 = vsyncpa [#allocation5], 1 }

</bundles_post_ra>
